<compile_context>
chip_gen: v7x
topology: tpu7x:2x2x1
jax: 0.10.0
libtpu: 0.0.40
codegen_flags: <defaults>
</compile_context>

<pallas_src>
import functools
import math

import jax
import jax.numpy as jnp
from jax.experimental import pallas as pl
from jax.experimental.pallas import tpu as pltpu

LANE = 128
EPS = 1e-5


# ----------------------------------------------------------------------------
# helpers
# ----------------------------------------------------------------------------
def _round_up(x, m):
    return ((x + m - 1) // m) * m


def _pad2(a, r, c):
    return jnp.zeros((r, c), jnp.float32).at[: a.shape[0], : a.shape[1]].set(a)


def _pad1(a, c):
    return jnp.zeros((c,), jnp.float32).at[: a.shape[0]].set(a)


def _const_spec(a):
    """Full-extent block with a constant index map (weight stays resident)."""
    nd = a.ndim
    return pl.BlockSpec(a.shape, lambda i, _nd=nd: (0,) * _nd)


def _vmem_capacity_bytes():
    try:
        fn = getattr(pltpu, "get_tpu_info", None)
        if fn is not None:
            info = fn()
            for name in ("vmem_capacity_bytes", "vmem_bytes", "vmem_size_bytes"):
                v = getattr(info, name, None)
                if v:
                    return int(v)
    except Exception:
        pass
    return 64 * 1024 * 1024          # conservative: v7x physical VMEM per TC


def _vmem_limit_bytes(weights, rows, num_features, num_hidden):
    """Per-generation VMEM budget from the actual padded footprint."""
    hp = _round_up(num_hidden, LANE)
    f4p = _round_up(4 * num_hidden, LANE)
    wbytes = sum(int(w.size) * w.dtype.itemsize for w in weights)
    act = rows * (num_features + 6 * hp + f4p) * 4
    need = 2 * wbytes + 4 * act + (2 << 20)
    cap = _vmem_capacity_bytes()
    return int(min(max(need, 16 << 20), max(cap - (16 << 20), 24 << 20)))


def _mm(a, w):
    """Matmul with f32 accumulation; activations follow the weight dtype
    (no-op for f32 weights, bf16 MXU path when param_dtype=bfloat16)."""
    return jnp.dot(a.astype(w.dtype), w, preferred_element_type=jnp.float32)


def _masked_layer_norm(x, gamma, beta, nvalid):
    """LayerNorm over the first `nvalid` lanes of a lane-padded last dim.

    Invariant (maintained by zero-padding every weight column / bias lane
    >= nvalid): the padded lanes of `x` are exactly zero, so the mean needs
    no extra mask multiply; only `diff` must be re-masked.
    """
    lane = jax.lax.broadcasted_iota(jnp.int32, x.shape, x.ndim - 1)
    mask = (lane < nvalid).astype(jnp.float32)
    inv_n = 1.0 / float(nvalid)
    mean = jnp.sum(x, axis=-1, keepdims=True) * inv_n
    diff = (x - mean) * mask
    var = jnp.sum(diff * diff, axis=-1, keepdims=True) * inv_n
    inv = jax.lax.rsqrt(var + EPS)                 # EUP op (free slot)
    return diff * inv * gamma + beta               # padded lanes stay exactly 0


# ----------------------------------------------------------------------------
# in-kernel building blocks
# ----------------------------------------------------------------------------
def _grn_apply(xin, hidden, w0_ref, w12_ref, bl_ref, g_ref, be_ref,
               wgf_ref, bgf_ref, wf3_ref, bf3_ref):
    """GatedResidualNetwork on a (rows, *) tile, all rows at once."""
    h = _mm(xin, w0_ref[...]) + bl_ref[0]
    h = _masked_layer_norm(jnp.maximum(h, 0.0), g_ref[0], be_ref[0], hidden)
    h = _mm(h, w12_ref[0]) + bl_ref[1]
    h = _masked_layer_norm(jnp.maximum(h, 0.0), g_ref[1], be_ref[1], hidden)
    h = _mm(h, w12_ref[1]) + bl_ref[2]
    h = _masked_layer_norm(jnp.maximum(h, 0.0), g_ref[2], be_ref[2], hidden)
    # fused [gate | fc2] projection: one 2*Hp-wide GEMM fills the 256-wide MXU
    zx = _mm(h, wgf_ref[...]) + bgf_ref[0]
    half = wgf_ref.shape[1] // 2
    gate = pl.reciprocal(1.0 + jnp.exp(-zx[:, :half]), approx=True)  # sigmoid (EUP)
    x2 = zx[:, half:]
    skip = _mm(xin, wf3_ref[...]) + bf3_ref[0]
    return skip + gate * x2


def _tblock_apply(x_all, bt, s_len, hidden, num_heads, q_mask, prm):
    """One TransformerBlock on the whole (bt*s_len, Hp) tile."""
    wqkv, bqkv, wo, bo, g, be, w1, b1, w2, b2 = prm
    hp = x_all.shape[-1]
    scale = 1.0 / math.sqrt(hidden // num_heads)

    # --- self-attention sub-block (pre-LN, residual add) ---
    h = _masked_layer_norm(x_all, g[0:1], be[0:1], hidden)
    qkv = _mm(h, wqkv) + bqkv                       # one fused wide QKV GEMM
    q = qkv[:, :hp] * scale
    k = qkv[:, hp:2 * hp]
    v = qkv[:, 2 * hp:]

    ctx_parts = []
    for b in range(bt):
        r0 = b * s_len
        qb = q[r0:r0 + s_len]
        kb = k[r0:r0 + s_len]
        vb = v[r0:r0 + s_len]
        # All heads at once: masked per-head queries stacked along sublanes ->
        # ONE score GEMM, ONE softmax, ONE context GEMM (not num_heads each).
        q_hs = jnp.concatenate([qb] * num_heads, axis=0) * q_mask
        s = jax.lax.dot_general(q_hs, kb, (((1,), (1,)), ((), ())),
                                preferred_element_type=jnp.float32)
        s_max = jnp.max(s, axis=-1, keepdims=True)
        p = jnp.exp(s - s_max)
        a = p * pl.reciprocal(jnp.sum(p, axis=-1, keepdims=True), approx=True)
        ctx_hs = jnp.dot(a, vb, preferred_element_type=jnp.float32) * q_mask
        ctx = ctx_hs[0:s_len]
        for hh in range(1, num_heads):              # cheap VPU re-gather of heads
            ctx = ctx + ctx_hs[hh * s_len:(hh + 1) * s_len]
        ctx_parts.append(ctx)
    ctx_all = ctx_parts[0] if bt == 1 else jnp.concatenate(ctx_parts, axis=0)

    x_all = x_all + _mm(ctx_all, wo) + bo

    # --- feed-forward sub-block ---
    h = _masked_layer_norm(x_all, g[1:2], be[1:2], hidden)
    ff = jnp.maximum(_mm(h, w1) + b1, 0.0)
    return x_all + _mm(ff, w2) + b2


# ----------------------------------------------------------------------------
# fully fused forward kernel
# ----------------------------------------------------------------------------
def _tft_kernel(*refs, bt, s_len, hidden, num_heads):
    (x_ref,
     ew0, ew12, ebl, eg, ebe, ewgf, ebgf, ewf3, ebf3,
     twqkv, tbqkv, two, tbo, tg, tbe, tw1, tbb1, tw2, tbb2,
     dw0, dw12, dbl, dg, dbe, dwgf, dbgf, dwf3, dbf3,
     wfin, bfin,
     o_ref) = refs

    hp = ewgf.shape[0]
    dh = hidden // num_heads
    rows = bt * s_len

    # ---- encoder GRN on all (bt * s_len) rows at once ----
    xh = _grn_apply(x_ref[...], hidden,
                    ew0, ew12, ebl, eg, ebe, ewgf, ebgf, ewf3, ebf3)

    # ---- per-(head, query-row) lane mask, shared by both transformer blocks --
    lane = jax.lax.broadcasted_iota(jnp.int32, (s_len, hp), 1)
    q_mask = jnp.concatenate(
        [jnp.logical_and(lane >= h * dh, lane < (h + 1) * dh).astype(jnp.float32)
         for h in range(num_heads)], axis=0)        # (num_heads*S, Hp)

    # ---- two transformer blocks (weights stacked on a leading axis of 2) ----
    for blk in range(2):
        prm = (twqkv[blk], tbqkv[blk], two[blk], tbo[blk], tg[blk], tbe[blk],
               tw1[blk], tbb1[blk], tw2[blk], tbb2[blk])
        xh = _tblock_apply(xh, bt, s_len, hidden, num_heads, q_mask, prm)

    # ---- gather the last-timestep row of every batch element (one-hot matmul,
    #      avoids unaligned sublane value slices) ----
    rr = jax.lax.broadcasted_iota(jnp.int32, (bt, rows), 1)
    bb = jax.lax.broadcasted_iota(jnp.int32, (bt, rows), 0)
    sel = (rr == (bb + 1) * s_len - 1).astype(jnp.float32)       # (bt, rows)
    last = jnp.dot(sel, xh, preferred_element_type=jnp.float32)  # (bt, Hp)

    # ---- decoder GRN + final linear, only on the bt surviving rows ----
    dec = _grn_apply(last, hidden,
                     dw0, dw12, dbl, dg, dbe, dwgf, dbgf, dwf3, dbf3)
    o_ref[...] = _mm(dec, wfin[...]) + bfin[0]


# ----------------------------------------------------------------------------
# one-time parameter preparation (OUTSIDE the jitted hot path)
# ----------------------------------------------------------------------------
def pad_params(params, num_features, num_hidden, num_outputs, num_steps,
               param_dtype=jnp.float32):
    """Pad / fuse / stack every weight once.

    - lane-pads hidden/output dims to 128 with zeros
    - fuses GRN gate & fc2 into one (Hp, 2*Hp) matrix
    - fuses Q|K|V into one (Hp, 3*Hp) matrix
    - stacks the two transformer blocks' tensors on a leading axis of 2
    Use param_dtype=jnp.bfloat16 on v6e/v7x to halve weight footprint/DMA
    (matmuls still accumulate in f32).
    """
    hp = _round_up(num_hidden, LANE)
    f4p = _round_up(4 * num_hidden, LANE)
    opp = _round_up(num_outputs * num_steps, LANE)
    cast = lambda a: a.astype(param_dtype)

    def grn(p, fin):
        w0 = cast(_pad2(p["w"][0], fin, hp))
        w12 = cast(jnp.stack([_pad2(p["w"][1], hp, hp), _pad2(p["w"][2], hp, hp)]))
        bl = jnp.stack([_pad1(b, hp) for b in p["b"]])
        g = jnp.stack([_pad1(v, hp) for v in p["g"]])
        be = jnp.stack([_pad1(v, hp) for v in p["be"]])
        wgf = cast(jnp.concatenate(
            [_pad2(p["wg"], hp, hp), _pad2(p["wf2"], hp, hp)], axis=1))
        bgf = jnp.concatenate([_pad1(p["bg"], hp), _pad1(p["bf2"], hp)])[None]
        wf3 = cast(_pad2(p["wf3"], fin, hp))
        bf3 = _pad1(p["bf3"], hp)[None]
        return [w0, w12, bl, g, be, wgf, bgf, wf3, bf3]

    def tblock(p):
        wq, wk, wv = jnp.split(p["wqkv"], 3, axis=1)
        bq, bk, bv = jnp.split(p["bqkv"], 3)
        wqkv = cast(jnp.concatenate(
            [_pad2(wq, hp, hp), _pad2(wk, hp, hp), _pad2(wv, hp, hp)], axis=1))
        bqkv = jnp.concatenate([_pad1(bq, hp), _pad1(bk, hp), _pad1(bv, hp)])[None]
        wo = cast(_pad2(p["wo"], hp, hp))
        bo = _pad1(p["bo"], hp)[None]
        g = jnp.stack([_pad1(p["g1"], hp), _pad1(p["g2"], hp)])
        be = jnp.stack([_pad1(p["b1"], hp), _pad1(p["b2"], hp)])
        w1 = cast(_pad2(p["w1"], hp, f4p))
        b1 = _pad1(p["bb1"], f4p)[None]
        w2 = cast(_pad2(p["w2"], f4p, hp))
        b2 = _pad1(p["bb2"], hp)[None]
        return [wqkv, bqkv, wo, bo, g, be, w1, b1, w2, b2]

    enc = grn(params["enc"], num_features)          # encoder input stays unpadded
    dec = grn(params["dec"], hp)                    # decoder input is Hp-padded
    tbs = [jnp.stack([a, b]) for a, b in zip(tblock(params["tb1"]),
                                             tblock(params["tb2"]))]
    wfin = cast(_pad2(params["wfin"], hp, opp))
    bfin = _pad1(params["bfin"], opp)[None]
    return tuple(enc + tbs + dec + [wfin, bfin])


# ----------------------------------------------------------------------------
# forward wrapper (single pallas_call)
# ----------------------------------------------------------------------------
def tft_forward(x, weights, *, num_features, num_hidden, num_outputs,
                num_steps, num_heads):
    bsz, s_len, _ = x.shape
    opp = _round_up(num_outputs * num_steps, LANE)

    # Whole (small) batch in one grid step; 8-element batch tiles otherwise so
    # block row counts stay sublane-aligned and v7x's two TCs split the grid.
    if bsz <= 8:
        bt, b_pad = bsz, bsz
    else:
        bt = 8
        b_pad = _round_up(bsz, bt)
    n_tiles = b_pad // bt

    xflat = x.reshape(bsz * s_len, num_features)    # no per-call lane padding
    if b_pad != bsz:
        xflat = jnp.zeros((b_pad * s_len, num_features), x.dtype).at[
            : bsz * s_len].set(xflat)

    vmem = _vmem_limit_bytes(weights, bt * s_len, num_features, num_hidden)
    kernel = functools.partial(_tft_kernel, bt=bt, s_len=s_len,
                               hidden=num_hidden, num_heads=num_heads)

    out = pl.pallas_call(
        kernel,
        out_shape=jax.ShapeDtypeStruct((b_pad, opp), jnp.float32),
        grid=(n_tiles,),
        in_specs=([pl.BlockSpec((bt * s_len, num_features), lambda i: (i, 0))]
                  + [_const_spec(w) for w in weights]),
        out_specs=pl.BlockSpec((bt, opp), lambda i: (i, 0)),
        compiler_params=pltpu.CompilerParams(
            dimension_semantics=("parallel",),
            vmem_limit_bytes=vmem,
        ),
    )(xflat, *weights)

    y = out[:bsz, : num_outputs * num_steps]
    y = y.reshape(bsz, num_outputs, num_steps)
    return jnp.transpose(y, (0, 2, 1))              # (B, num_steps, num_outputs)


# ----------------------------------------------------------------------------
# pure-JAX reference (mirrors the PyTorch module in eval mode)
# ----------------------------------------------------------------------------
def _ln_ref(x, g, b):
    mu = jnp.mean(x, axis=-1, keepdims=True)
    var = jnp.mean((x - mu) ** 2, axis=-1, keepdims=True)
    return (x - mu) * jax.lax.rsqrt(var + EPS) * g + b


def _grn_ref(x, p):
    xin = x
    h = x
    for i in range(3):
        h = jax.nn.relu(h @ p["w"][i] + p["b"][i])
        h = _ln_ref(h, p["g"][i], p["be"][i])
    gate = jax.nn.sigmoid(h @ p["wg"] + p["bg"])
    x2 = h @ p["wf2"] + p["bf2"]
    return xin @ p["wf3"] + p["bf3"] + gate * x2


def _mha_ref(x, p, num_heads):
    bsz, s_len, hid = x.shape
    dh = hid // num_heads
    qkv = x @ p["wqkv"] + p["bqkv"]
    q, k, v = qkv[..., :hid], qkv[..., hid:2 * hid], qkv[..., 2 * hid:]
    split = lambda t: t.reshape(bsz, s_len, num_heads, dh).transpose(0, 2, 1, 3)
    q, k, v = split(q), split(k), split(v)
    s = jnp.einsum("bhqd,bhkd->bhqk", q, k) / math.sqrt(dh)
    a = jax.nn.softmax(s, axis=-1)
    ctx = jnp.einsum("bhqk,bhkd->bhqd", a, v)
    ctx = ctx.transpose(0, 2, 1, 3).reshape(bsz, s_len, hid)
    return ctx @ p["wo"] + p["bo"]


def _tblock_ref(x, p, num_heads):
    res = x
    h = _ln_ref(x, p["g1"], p["b1"])
    x = _mha_ref(h, p, num_heads) + res
    res = x
    h = _ln_ref(x, p["g2"], p["b2"])
    ff = jax.nn.relu(h @ p["w1"] + p["bb1"]) @ p["w2"] + p["bb2"]
    return ff + res


def tft_ref(x, params, *, num_hidden, num_outputs, num_steps, num_heads):
    bsz, s_len, _ = x.shape
    h = _grn_ref(x, params["enc"])
    h = _tblock_ref(h, params["tb1"], num_heads)
    h = _tblock_ref(h, params["tb2"], num_heads)
    h = _grn_ref(h, params["dec"])
    y = h @ params["wfin"] + params["bfin"]
    y = y.reshape(bsz, s_len, num_outputs, num_steps)[:, -1]
    return jnp.transpose(y, (0, 2, 1))


# ----------------------------------------------------------------------------
# parameter init (random but deterministic)
# ----------------------------------------------------------------------------
def init_params(key, num_features, num_hidden, num_outputs, num_steps):
    keys = iter(jax.random.split(key, 128))

    def dense(kin, kout):
        w = jax.random.normal(next(keys), (kin, kout), jnp.float32) / math.sqrt(kin)
        bvec = 0.1 * jax.random.normal(next(keys), (kout,), jnp.float32)
        return w, bvec

    def lnp(kdim):
        g = 1.0 + 0.1 * jax.random.normal(next(keys), (kdim,), jnp.float32)
        bvec = 0.1 * jax.random.normal(next(keys), (kdim,), jnp.float32)
        return g, bvec

    def grn(fin, hid, fout):
        ws, bs, gs, bes = [], [], [], []
        for i in range(3):
            w, bvec = dense(fin if i == 0 else hid, hid)
            g, be = lnp(hid)
            ws.append(w), bs.append(bvec), gs.append(g), bes.append(be)
        wg, bg = dense(hid, fout)
        wf2, bf2 = dense(hid, fout)
        wf3, bf3 = dense(fin, fout)
        return dict(w=ws, b=bs, g=gs, be=bes, wg=wg, bg=bg,
                    wf2=wf2, bf2=bf2, wf3=wf3, bf3=bf3)

    def tblock(hid):
        wq, bq = dense(hid, hid)
        wk, bk = dense(hid, hid)
        wv, bv = dense(hid, hid)
        wo, bo = dense(hid, hid)
        g1, b1 = lnp(hid)
        g2, b2 = lnp(hid)
        w1, bb1 = dense(hid, 4 * hid)
        w2, bb2 = dense(4 * hid, hid)
        return dict(wqkv=jnp.concatenate([wq, wk, wv], axis=1),
                    bqkv=jnp.concatenate([bq, bk, bv]),
                    wo=wo, bo=bo, g1=g1, b1=b1, g2=g2, b2=b2,
                    w1=w1, bb1=bb1, w2=w2, bb2=bb2)

    wfin, bfin = dense(num_hidden, num_outputs * num_steps)
    return dict(enc=grn(num_features, num_hidden, num_hidden),
                tb1=tblock(num_hidden), tb2=tblock(num_hidden),
                dec=grn(num_hidden, num_hidden, num_hidden),
                wfin=wfin, bfin=bfin)


# ----------------------------------------------------------------------------
if __name__ == "__main__":
    B, S = 2, 8
    NUM_FEATURES, NUM_HIDDEN = 16, 32
    NUM_OUTPUTS, NUM_STEPS, NUM_HEADS = 3, 4, 8

    key = jax.random.PRNGKey(0)
    kx, kp = jax.random.split(key)
    x = jax.random.normal(kx, (B, S, NUM_FEATURES), jnp.float32)
    params = init_params(kp, NUM_FEATURES, NUM_HIDDEN, NUM_OUTPUTS, NUM_STEPS)

    # pad / fuse / stack all weights ONCE, outside the jitted hot path
    weights = pad_params(params, NUM_FEATURES, NUM_HIDDEN, NUM_OUTPUTS,
                         NUM_STEPS, param_dtype=jnp.float32)

    fwd = jax.jit(functools.partial(
        tft_forward, num_features=NUM_FEATURES, num_hidden=NUM_HIDDEN,
        num_outputs=NUM_OUTPUTS, num_steps=NUM_STEPS, num_heads=NUM_HEADS))
    out = jax.block_until_ready(fwd(x, weights))
    assert out.shape == (B, NUM_STEPS, NUM_OUTPUTS), out.shape

    ref = tft_ref(x, params, num_hidden=NUM_HIDDEN, num_outputs=NUM_OUTPUTS,
                  num_steps=NUM_STEPS, num_heads=NUM_HEADS)
    err = float(jnp.max(jnp.abs(out - ref)))
    if not err < 5e-2:
        raise AssertionError(f"mismatch vs reference: max abs err = {err}")
    print("KERNEL_OK")
</pallas_src>

<mosaic_0001>
module attributes {stable_mosaic.version = 11 : i64} {
  func.func @_tft_kernel(%arg0: i32, %arg1: memref<16x16xf32, #tpu.memory_space<vmem>>, %arg2: memref<16x128xf32, #tpu.memory_space<vmem>>, %arg3: memref<2x128x128xf32, #tpu.memory_space<vmem>>, %arg4: memref<3x128xf32, #tpu.memory_space<vmem>>, %arg5: memref<3x128xf32, #tpu.memory_space<vmem>>, %arg6: memref<3x128xf32, #tpu.memory_space<vmem>>, %arg7: memref<128x256xf32, #tpu.memory_space<vmem>>, %arg8: memref<1x256xf32, #tpu.memory_space<vmem>>, %arg9: memref<16x128xf32, #tpu.memory_space<vmem>>, %arg10: memref<1x128xf32, #tpu.memory_space<vmem>>, %arg11: memref<2x128x384xf32, #tpu.memory_space<vmem>>, %arg12: memref<2x1x384xf32, #tpu.memory_space<vmem>>, %arg13: memref<2x128x128xf32, #tpu.memory_space<vmem>>, %arg14: memref<2x1x128xf32, #tpu.memory_space<vmem>>, %arg15: memref<2x2x128xf32, #tpu.memory_space<vmem>>, %arg16: memref<2x2x128xf32, #tpu.memory_space<vmem>>, %arg17: memref<2x128x128xf32, #tpu.memory_space<vmem>>, %arg18: memref<2x1x128xf32, #tpu.memory_space<vmem>>, %arg19: memref<2x128x128xf32, #tpu.memory_space<vmem>>, %arg20: memref<2x1x128xf32, #tpu.memory_space<vmem>>, %arg21: memref<128x128xf32, #tpu.memory_space<vmem>>, %arg22: memref<2x128x128xf32, #tpu.memory_space<vmem>>, %arg23: memref<3x128xf32, #tpu.memory_space<vmem>>, %arg24: memref<3x128xf32, #tpu.memory_space<vmem>>, %arg25: memref<3x128xf32, #tpu.memory_space<vmem>>, %arg26: memref<128x256xf32, #tpu.memory_space<vmem>>, %arg27: memref<1x256xf32, #tpu.memory_space<vmem>>, %arg28: memref<128x128xf32, #tpu.memory_space<vmem>>, %arg29: memref<1x128xf32, #tpu.memory_space<vmem>>, %arg30: memref<128x128xf32, #tpu.memory_space<vmem>>, %arg31: memref<1x128xf32, #tpu.memory_space<vmem>>, %arg32: memref<2x128xf32, #tpu.memory_space<vmem>>) attributes {dimension_semantics = [#tpu.dimension_semantics<parallel>], iteration_bounds = array<i64: 1>, scalar_prefetch = 0 : i64, scratch_operands = 0 : i64, tpu.core_type = #tpu.core_type<tc>, window_params = [{transform_indices = @transform_0, window_bounds = array<i64: 16, 16>}, {pipeline_mode = #tpu.pipeline_mode<synchronous>, transform_indices = @transform_1, window_bounds = array<i64: 16, 128>}, {pipeline_mode = #tpu.pipeline_mode<synchronous>, transform_indices = @transform_2, window_bounds = array<i64: 2, 128, 128>}, {pipeline_mode = #tpu.pipeline_mode<synchronous>, transform_indices = @transform_3, window_bounds = array<i64: 3, 128>}, {pipeline_mode = #tpu.pipeline_mode<synchronous>, transform_indices = @transform_4, window_bounds = array<i64: 3, 128>}, {pipeline_mode = #tpu.pipeline_mode<synchronous>, transform_indices = @transform_5, window_bounds = array<i64: 3, 128>}, {pipeline_mode = #tpu.pipeline_mode<synchronous>, transform_indices = @transform_6, window_bounds = array<i64: 128, 256>}, {pipeline_mode = #tpu.pipeline_mode<synchronous>, transform_indices = @transform_7, window_bounds = array<i64: 1, 256>}, {pipeline_mode = #tpu.pipeline_mode<synchronous>, transform_indices = @transform_8, window_bounds = array<i64: 16, 128>}, {pipeline_mode = #tpu.pipeline_mode<synchronous>, transform_indices = @transform_9, window_bounds = array<i64: 1, 128>}, {pipeline_mode = #tpu.pipeline_mode<synchronous>, transform_indices = @transform_10, window_bounds = array<i64: 2, 128, 384>}, {pipeline_mode = #tpu.pipeline_mode<synchronous>, transform_indices = @transform_11, window_bounds = array<i64: 2, 1, 384>}, {pipeline_mode = #tpu.pipeline_mode<synchronous>, transform_indices = @transform_12, window_bounds = array<i64: 2, 128, 128>}, {pipeline_mode = #tpu.pipeline_mode<synchronous>, transform_indices = @transform_13, window_bounds = array<i64: 2, 1, 128>}, {pipeline_mode = #tpu.pipeline_mode<synchronous>, transform_indices = @transform_14, window_bounds = array<i64: 2, 2, 128>}, {pipeline_mode = #tpu.pipeline_mode<synchronous>, transform_indices = @transform_15, window_bounds = array<i64: 2, 2, 128>}, {pipeline_mode = #tpu.pipeline_mode<synchronous>, transform_indices = @transform_16, window_bounds = array<i64: 2, 128, 128>}, {pipeline_mode = #tpu.pipeline_mode<synchronous>, transform_indices = @transform_17, window_bounds = array<i64: 2, 1, 128>}, {pipeline_mode = #tpu.pipeline_mode<synchronous>, transform_indices = @transform_18, window_bounds = array<i64: 2, 128, 128>}, {pipeline_mode = #tpu.pipeline_mode<synchronous>, transform_indices = @transform_19, window_bounds = array<i64: 2, 1, 128>}, {pipeline_mode = #tpu.pipeline_mode<synchronous>, transform_indices = @transform_20, window_bounds = array<i64: 128, 128>}, {pipeline_mode = #tpu.pipeline_mode<synchronous>, transform_indices = @transform_21, window_bounds = array<i64: 2, 128, 128>}, {pipeline_mode = #tpu.pipeline_mode<synchronous>, transform_indices = @transform_22, window_bounds = array<i64: 3, 128>}, {pipeline_mode = #tpu.pipeline_mode<synchronous>, transform_indices = @transform_23, window_bounds = array<i64: 3, 128>}, {pipeline_mode = #tpu.pipeline_mode<synchronous>, transform_indices = @transform_24, window_bounds = array<i64: 3, 128>}, {pipeline_mode = #tpu.pipeline_mode<synchronous>, transform_indices = @transform_25, window_bounds = array<i64: 128, 256>}, {pipeline_mode = #tpu.pipeline_mode<synchronous>, transform_indices = @transform_26, window_bounds = array<i64: 1, 256>}, {pipeline_mode = #tpu.pipeline_mode<synchronous>, transform_indices = @transform_27, window_bounds = array<i64: 128, 128>}, {pipeline_mode = #tpu.pipeline_mode<synchronous>, transform_indices = @transform_28, window_bounds = array<i64: 1, 128>}, {pipeline_mode = #tpu.pipeline_mode<synchronous>, transform_indices = @transform_29, window_bounds = array<i64: 128, 128>}, {pipeline_mode = #tpu.pipeline_mode<synchronous>, transform_indices = @transform_30, window_bounds = array<i64: 1, 128>}, {transform_indices = @transform_31, window_bounds = array<i64: 2, 128>}]} {
    %c0 = arith.constant 0 : index
    %c0_0 = arith.constant 0 : index
    %0 = vector.load %arg1[%c0, %c0_0] : memref<16x16xf32, #tpu.memory_space<vmem>>, vector<16x16xf32>
    %c0_1 = arith.constant 0 : index
    %c0_2 = arith.constant 0 : index
    %1 = vector.load %arg2[%c0_1, %c0_2] : memref<16x128xf32, #tpu.memory_space<vmem>>, vector<16x128xf32>
    %cst = arith.constant dense<0.000000e+00> : vector<16x128xf32>
    %2 = tpu.matmul %0, %1, %cst {dimension_numbers = #tpu.dot_dimension_numbers<[1], [0], [0], [1], [0, 0, 1, 1], [], []>} : vector<16x16xf32>, vector<16x128xf32>, vector<16x128xf32> -> vector<16x128xf32>
    %c0_3 = arith.constant 0 : index
    %c0_4 = arith.constant 0 : index
    %3 = vector.load %arg4[%c0_3, %c0_4] : memref<3x128xf32, #tpu.memory_space<vmem>>, vector<1x128xf32>
    %4 = vector.shape_cast %3 : vector<1x128xf32> to vector<128xf32>
    %5 = vector.shape_cast %4 : vector<128xf32> to vector<1x128xf32>
    %6 = vector.broadcast %5 : vector<1x128xf32> to vector<16x128xf32>
    %7 = arith.addf %2, %6 : vector<16x128xf32>
    %cst_5 = arith.constant 0.000000e+00 : f32
    %8 = vector.broadcast %cst_5 : f32 to vector<16x128xf32>
    %9 = arith.maximumf %7, %8 : vector<16x128xf32>
    %c0_6 = arith.constant 0 : index
    %c0_7 = arith.constant 0 : index
    %10 = vector.load %arg5[%c0_6, %c0_7] : memref<3x128xf32, #tpu.memory_space<vmem>>, vector<1x128xf32>
    %11 = vector.shape_cast %10 : vector<1x128xf32> to vector<128xf32>
    %c0_8 = arith.constant 0 : index
    %c0_9 = arith.constant 0 : index
    %12 = vector.load %arg6[%c0_8, %c0_9] : memref<3x128xf32, #tpu.memory_space<vmem>>, vector<1x128xf32>
    %13 = vector.shape_cast %12 : vector<1x128xf32> to vector<128xf32>
    %14 = tpu.iota {dimensions = array<i32: 1>} : vector<16x128xi32>
    %c32_i32 = arith.constant 32 : i32
    %15 = vector.broadcast %c32_i32 : i32 to vector<16x128xi32>
    %16 = arith.cmpi slt, %14, %15 : vector<16x128xi32>
    %17 = arith.extui %16 : vector<16x128xi1> to vector<16x128xi32>
    %18 = arith.sitofp %17 : vector<16x128xi32> to vector<16x128xf32>
    %cst_10 = arith.constant dense<0.000000e+00> : vector<16xf32>
    %19 = vector.multi_reduction <add>, %9, %cst_10 [1] : vector<16x128xf32> to vector<16xf32>
    %20 = vector.shape_cast %19 : vector<16xf32> to vector<16x1xf32>
    %cst_11 = arith.constant 3.125000e-02 : f32
    %21 = vector.broadcast %cst_11 : f32 to vector<16x1xf32>
    %22 = arith.mulf %20, %21 : vector<16x1xf32>
    %23 = vector.broadcast %22 : vector<16x1xf32> to vector<16x128xf32>
    %24 = arith.subf %9, %23 : vector<16x128xf32>
    %25 = arith.mulf %24, %18 : vector<16x128xf32>
    %26 = arith.mulf %25, %25 : vector<16x128xf32>
    %cst_12 = arith.constant dense<0.000000e+00> : vector<16xf32>
    %27 = vector.multi_reduction <add>, %26, %cst_12 [1] : vector<16x128xf32> to vector<16xf32>
    %28 = vector.shape_cast %27 : vector<16xf32> to vector<16x1xf32>
    %cst_13 = arith.constant 3.125000e-02 : f32
    %29 = vector.broadcast %cst_13 : f32 to vector<16x1xf32>
    %30 = arith.mulf %28, %29 : vector<16x1xf32>
    %cst_14 = arith.constant 9.99999974E-6 : f32
    %31 = vector.broadcast %cst_14 : f32 to vector<16x1xf32>
    %32 = arith.addf %30, %31 : vector<16x1xf32>
    %33 = math.rsqrt %32 : vector<16x1xf32>
    %34 = vector.broadcast %33 : vector<16x1xf32> to vector<16x128xf32>
    %35 = arith.mulf %25, %34 : vector<16x128xf32>
    %36 = vector.shape_cast %11 : vector<128xf32> to vector<1x128xf32>
    %37 = vector.broadcast %36 : vector<1x128xf32> to vector<16x128xf32>
    %38 = arith.mulf %35, %37 : vector<16x128xf32>
    %39 = vector.shape_cast %13 : vector<128xf32> to vector<1x128xf32>
    %40 = vector.broadcast %39 : vector<1x128xf32> to vector<16x128xf32>
    %41 = arith.addf %38, %40 : vector<16x128xf32>
    %c0_15 = arith.constant 0 : index
    %c0_16 = arith.constant 0 : index
    %c0_17 = arith.constant 0 : index
    %42 = vector.load %arg3[%c0_15, %c0_16, %c0_17] : memref<2x128x128xf32, #tpu.memory_space<vmem>>, vector<1x128x128xf32>
    %43 = vector.shape_cast %42 : vector<1x128x128xf32> to vector<128x128xf32>
    %cst_18 = arith.constant dense<0.000000e+00> : vector<16x128xf32>
    %44 = tpu.matmul %41, %43, %cst_18 {dimension_numbers = #tpu.dot_dimension_numbers<[1], [0], [0], [1], [0, 0, 1, 1], [], []>} : vector<16x128xf32>, vector<128x128xf32>, vector<16x128xf32> -> vector<16x128xf32>
    %c1 = arith.constant 1 : index
    %c0_19 = arith.constant 0 : index
    %45 = vector.load %arg4[%c1, %c0_19] : memref<3x128xf32, #tpu.memory_space<vmem>>, vector<1x128xf32>
    %46 = vector.shape_cast %45 : vector<1x128xf32> to vector<128xf32>
    %47 = vector.shape_cast %46 : vector<128xf32> to vector<1x128xf32>
    %48 = vector.broadcast %47 : vector<1x128xf32> to vector<16x128xf32>
    %49 = arith.addf %44, %48 : vector<16x128xf32>
    %cst_20 = arith.constant 0.000000e+00 : f32
    %50 = vector.broadcast %cst_20 : f32 to vector<16x128xf32>
    %51 = arith.maximumf %49, %50 : vector<16x128xf32>
    %c1_21 = arith.constant 1 : index
    %c0_22 = arith.constant 0 : index
    %52 = vector.load %arg5[%c1_21, %c0_22] : memref<3x128xf32, #tpu.memory_space<vmem>>, vector<1x128xf32>
    %53 = vector.shape_cast %52 : vector<1x128xf32> to vector<128xf32>
    %c1_23 = arith.constant 1 : index
    %c0_24 = arith.constant 0 : index
    %54 = vector.load %arg6[%c1_23, %c0_24] : memref<3x128xf32, #tpu.memory_space<vmem>>, vector<1x128xf32>
    %55 = vector.shape_cast %54 : vector<1x128xf32> to vector<128xf32>
    %56 = tpu.iota {dimensions = array<i32: 1>} : vector<16x128xi32>
    %c32_i32_25 = arith.constant 32 : i32
    %57 = vector.broadcast %c32_i32_25 : i32 to vector<16x128xi32>
    %58 = arith.cmpi slt, %56, %57 : vector<16x128xi32>
    %59 = arith.extui %58 : vector<16x128xi1> to vector<16x128xi32>
    %60 = arith.sitofp %59 : vector<16x128xi32> to vector<16x128xf32>
    %cst_26 = arith.constant dense<0.000000e+00> : vector<16xf32>
    %61 = vector.multi_reduction <add>, %51, %cst_26 [1] : vector<16x128xf32> to vector<16xf32>
    %62 = vector.shape_cast %61 : vector<16xf32> to vector<16x1xf32>
    %cst_27 = arith.constant 3.125000e-02 : f32
    %63 = vector.broadcast %cst_27 : f32 to vector<16x1xf32>
    %64 = arith.mulf %62, %63 : vector<16x1xf32>
    %65 = vector.broadcast %64 : vector<16x1xf32> to vector<16x128xf32>
    %66 = arith.subf %51, %65 : vector<16x128xf32>
    %67 = arith.mulf %66, %60 : vector<16x128xf32>
    %68 = arith.mulf %67, %67 : vector<16x128xf32>
    %cst_28 = arith.constant dense<0.000000e+00> : vector<16xf32>
    %69 = vector.multi_reduction <add>, %68, %cst_28 [1] : vector<16x128xf32> to vector<16xf32>
    %70 = vector.shape_cast %69 : vector<16xf32> to vector<16x1xf32>
    %cst_29 = arith.constant 3.125000e-02 : f32
    %71 = vector.broadcast %cst_29 : f32 to vector<16x1xf32>
    %72 = arith.mulf %70, %71 : vector<16x1xf32>
    %cst_30 = arith.constant 9.99999974E-6 : f32
    %73 = vector.broadcast %cst_30 : f32 to vector<16x1xf32>
    %74 = arith.addf %72, %73 : vector<16x1xf32>
    %75 = math.rsqrt %74 : vector<16x1xf32>
    %76 = vector.broadcast %75 : vector<16x1xf32> to vector<16x128xf32>
    %77 = arith.mulf %67, %76 : vector<16x128xf32>
    %78 = vector.shape_cast %53 : vector<128xf32> to vector<1x128xf32>
    %79 = vector.broadcast %78 : vector<1x128xf32> to vector<16x128xf32>
    %80 = arith.mulf %77, %79 : vector<16x128xf32>
    %81 = vector.shape_cast %55 : vector<128xf32> to vector<1x128xf32>
    %82 = vector.broadcast %81 : vector<1x128xf32> to vector<16x128xf32>
    %83 = arith.addf %80, %82 : vector<16x128xf32>
    %c1_31 = arith.constant 1 : index
    %c0_32 = arith.constant 0 : index
    %c0_33 = arith.constant 0 : index
    %84 = vector.load %arg3[%c1_31, %c0_32, %c0_33] : memref<2x128x128xf32, #tpu.memory_space<vmem>>, vector<1x128x128xf32>
    %85 = vector.shape_cast %84 : vector<1x128x128xf32> to vector<128x128xf32>
    %cst_34 = arith.constant dense<0.000000e+00> : vector<16x128xf32>
    %86 = tpu.matmul %83, %85, %cst_34 {dimension_numbers = #tpu.dot_dimension_numbers<[1], [0], [0], [1], [0, 0, 1, 1], [], []>} : vector<16x128xf32>, vector<128x128xf32>, vector<16x128xf32> -> vector<16x128xf32>
    %c2 = arith.constant 2 : index
    %c0_35 = arith.constant 0 : index
    %87 = vector.load %arg4[%c2, %c0_35] : memref<3x128xf32, #tpu.memory_space<vmem>>, vector<1x128xf32>
    %88 = vector.shape_cast %87 : vector<1x128xf32> to vector<128xf32>
    %89 = vector.shape_cast %88 : vector<128xf32> to vector<1x128xf32>
    %90 = vector.broadcast %89 : vector<1x128xf32> to vector<16x128xf32>
    %91 = arith.addf %86, %90 : vector<16x128xf32>
    %cst_36 = arith.constant 0.000000e+00 : f32
    %92 = vector.broadcast %cst_36 : f32 to vector<16x128xf32>
    %93 = arith.maximumf %91, %92 : vector<16x128xf32>
    %c2_37 = arith.constant 2 : index
    %c0_38 = arith.constant 0 : index
    %94 = vector.load %arg5[%c2_37, %c0_38] : memref<3x128xf32, #tpu.memory_space<vmem>>, vector<1x128xf32>
    %95 = vector.shape_cast %94 : vector<1x128xf32> to vector<128xf32>
    %c2_39 = arith.constant 2 : index
    %c0_40 = arith.constant 0 : index
    %96 = vector.load %arg6[%c2_39, %c0_40] : memref<3x128xf32, #tpu.memory_space<vmem>>, vector<1x128xf32>
    %97 = vector.shape_cast %96 : vector<1x128xf32> to vector<128xf32>
    %98 = tpu.iota {dimensions = array<i32: 1>} : vector<16x128xi32>
    %c32_i32_41 = arith.constant 32 : i32
    %99 = vector.broadcast %c32_i32_41 : i32 to vector<16x128xi32>
    %100 = arith.cmpi slt, %98, %99 : vector<16x128xi32>
    %101 = arith.extui %100 : vector<16x128xi1> to vector<16x128xi32>
    %102 = arith.sitofp %101 : vector<16x128xi32> to vector<16x128xf32>
    %cst_42 = arith.constant dense<0.000000e+00> : vector<16xf32>
    %103 = vector.multi_reduction <add>, %93, %cst_42 [1] : vector<16x128xf32> to vector<16xf32>
    %104 = vector.shape_cast %103 : vector<16xf32> to vector<16x1xf32>
    %cst_43 = arith.constant 3.125000e-02 : f32
    %105 = vector.broadcast %cst_43 : f32 to vector<16x1xf32>
    %106 = arith.mulf %104, %105 : vector<16x1xf32>
    %107 = vector.broadcast %106 : vector<16x1xf32> to vector<16x128xf32>
    %108 = arith.subf %93, %107 : vector<16x128xf32>
    %109 = arith.mulf %108, %102 : vector<16x128xf32>
    %110 = arith.mulf %109, %109 : vector<16x128xf32>
    %cst_44 = arith.constant dense<0.000000e+00> : vector<16xf32>
    %111 = vector.multi_reduction <add>, %110, %cst_44 [1] : vector<16x128xf32> to vector<16xf32>
    %112 = vector.shape_cast %111 : vector<16xf32> to vector<16x1xf32>
    %cst_45 = arith.constant 3.125000e-02 : f32
    %113 = vector.broadcast %cst_45 : f32 to vector<16x1xf32>
    %114 = arith.mulf %112, %113 : vector<16x1xf32>
    %cst_46 = arith.constant 9.99999974E-6 : f32
    %115 = vector.broadcast %cst_46 : f32 to vector<16x1xf32>
    %116 = arith.addf %114, %115 : vector<16x1xf32>
    %117 = math.rsqrt %116 : vector<16x1xf32>
    %118 = vector.broadcast %117 : vector<16x1xf32> to vector<16x128xf32>
    %119 = arith.mulf %109, %118 : vector<16x128xf32>
    %120 = vector.shape_cast %95 : vector<128xf32> to vector<1x128xf32>
    %121 = vector.broadcast %120 : vector<1x128xf32> to vector<16x128xf32>
    %122 = arith.mulf %119, %121 : vector<16x128xf32>
    %123 = vector.shape_cast %97 : vector<128xf32> to vector<1x128xf32>
    %124 = vector.broadcast %123 : vector<1x128xf32> to vector<16x128xf32>
    %125 = arith.addf %122, %124 : vector<16x128xf32>
    %c0_47 = arith.constant 0 : index
    %c0_48 = arith.constant 0 : index
    %126 = vector.load %arg7[%c0_47, %c0_48] : memref<128x256xf32, #tpu.memory_space<vmem>>, vector<128x256xf32>
    %cst_49 = arith.constant dense<0.000000e+00> : vector<16x256xf32>
    %127 = tpu.matmul %125, %126, %cst_49 {dimension_numbers = #tpu.dot_dimension_numbers<[1], [0], [0], [1], [0, 0, 1, 1], [], []>} : vector<16x128xf32>, vector<128x256xf32>, vector<16x256xf32> -> vector<16x256xf32>
    %c0_50 = arith.constant 0 : index
    %c0_51 = arith.constant 0 : index
    %128 = vector.load %arg8[%c0_50, %c0_51] : memref<1x256xf32, #tpu.memory_space<vmem>>, vector<1x256xf32>
    %129 = vector.shape_cast %128 : vector<1x256xf32> to vector<256xf32>
    %130 = vector.shape_cast %129 : vector<256xf32> to vector<1x256xf32>
    %131 = vector.broadcast %130 : vector<1x256xf32> to vector<16x256xf32>
    %132 = arith.addf %127, %131 : vector<16x256xf32>
    %133 = vector.extract_strided_slice %132 {offsets = [0, 0], sizes = [16, 128], strides = [1, 1]} : vector<16x256xf32> to vector<16x128xf32>
    %cst_52 = arith.constant 0.000000e+00 : f32
    %134 = vector.broadcast %cst_52 : f32 to vector<16x128xf32>
    %135 = arith.subf %134, %133 : vector<16x128xf32>
    %136 = math.exp %135 : vector<16x128xf32>
    %cst_53 = arith.constant 1.000000e+00 : f32
    %137 = vector.broadcast %cst_53 : f32 to vector<16x128xf32>
    %138 = arith.addf %137, %136 : vector<16x128xf32>
    %139 = tpu.reciprocal %138 {approx = true} : vector<16x128xf32> -> vector<16x128xf32>
    %140 = vector.extract_strided_slice %132 {offsets = [0, 128], sizes = [16, 128], strides = [1, 1]} : vector<16x256xf32> to vector<16x128xf32>
    %c0_54 = arith.constant 0 : index
    %c0_55 = arith.constant 0 : index
    %141 = vector.load %arg9[%c0_54, %c0_55] : memref<16x128xf32, #tpu.memory_space<vmem>>, vector<16x128xf32>
    %cst_56 = arith.constant dense<0.000000e+00> : vector<16x128xf32>
    %142 = tpu.matmul %0, %141, %cst_56 {dimension_numbers = #tpu.dot_dimension_numbers<[1], [0], [0], [1], [0, 0, 1, 1], [], []>} : vector<16x16xf32>, vector<16x128xf32>, vector<16x128xf32> -> vector<16x128xf32>
    %c0_57 = arith.constant 0 : index
    %c0_58 = arith.constant 0 : index
    %143 = vector.load %arg10[%c0_57, %c0_58] : memref<1x128xf32, #tpu.memory_space<vmem>>, vector<1x128xf32>
    %144 = vector.shape_cast %143 : vector<1x128xf32> to vector<128xf32>
    %145 = vector.shape_cast %144 : vector<128xf32> to vector<1x128xf32>
    %146 = vector.broadcast %145 : vector<1x128xf32> to vector<16x128xf32>
    %147 = arith.addf %142, %146 : vector<16x128xf32>
    %148 = arith.mulf %139, %140 : vector<16x128xf32>
    %149 = arith.addf %147, %148 : vector<16x128xf32>
    %150 = tpu.iota {dimensions = array<i32: 1>} : vector<8x128xi32>
    %c0_i32 = arith.constant 0 : i32
    %151 = vector.broadcast %c0_i32 : i32 to vector<8x128xi32>
    %152 = arith.cmpi sge, %150, %151 : vector<8x128xi32>
    %c4_i32 = arith.constant 4 : i32
    %153 = vector.broadcast %c4_i32 : i32 to vector<8x128xi32>
    %154 = arith.cmpi slt, %150, %153 : vector<8x128xi32>
    %155 = arith.andi %152, %154 : vector<8x128xi1>
    %156 = arith.extui %155 : vector<8x128xi1> to vector<8x128xi32>
    %157 = arith.sitofp %156 : vector<8x128xi32> to vector<8x128xf32>
    %c4_i32_59 = arith.constant 4 : i32
    %158 = vector.broadcast %c4_i32_59 : i32 to vector<8x128xi32>
    %159 = arith.cmpi sge, %150, %158 : vector<8x128xi32>
    %c8_i32 = arith.constant 8 : i32
    %160 = vector.broadcast %c8_i32 : i32 to vector<8x128xi32>
    %161 = arith.cmpi slt, %150, %160 : vector<8x128xi32>
    %162 = arith.andi %159, %161 : vector<8x128xi1>
    %163 = arith.extui %162 : vector<8x128xi1> to vector<8x128xi32>
    %164 = arith.sitofp %163 : vector<8x128xi32> to vector<8x128xf32>
    %c8_i32_60 = arith.constant 8 : i32
    %165 = vector.broadcast %c8_i32_60 : i32 to vector<8x128xi32>
    %166 = arith.cmpi sge, %150, %165 : vector<8x128xi32>
    %c12_i32 = arith.constant 12 : i32
    %167 = vector.broadcast %c12_i32 : i32 to vector<8x128xi32>
    %168 = arith.cmpi slt, %150, %167 : vector<8x128xi32>
    %169 = arith.andi %166, %168 : vector<8x128xi1>
    %170 = arith.extui %169 : vector<8x128xi1> to vector<8x128xi32>
    %171 = arith.sitofp %170 : vector<8x128xi32> to vector<8x128xf32>
    %c12_i32_61 = arith.constant 12 : i32
    %172 = vector.broadcast %c12_i32_61 : i32 to vector<8x128xi32>
    %173 = arith.cmpi sge, %150, %172 : vector<8x128xi32>
    %c16_i32 = arith.constant 16 : i32
    %174 = vector.broadcast %c16_i32 : i32 to vector<8x128xi32>
    %175 = arith.cmpi slt, %150, %174 : vector<8x128xi32>
    %176 = arith.andi %173, %175 : vector<8x128xi1>
    %177 = arith.extui %176 : vector<8x128xi1> to vector<8x128xi32>
    %178 = arith.sitofp %177 : vector<8x128xi32> to vector<8x128xf32>
    %c16_i32_62 = arith.constant 16 : i32
    %179 = vector.broadcast %c16_i32_62 : i32 to vector<8x128xi32>
    %180 = arith.cmpi sge, %150, %179 : vector<8x128xi32>
    %c20_i32 = arith.constant 20 : i32
    %181 = vector.broadcast %c20_i32 : i32 to vector<8x128xi32>
    %182 = arith.cmpi slt, %150, %181 : vector<8x128xi32>
    %183 = arith.andi %180, %182 : vector<8x128xi1>
    %184 = arith.extui %183 : vector<8x128xi1> to vector<8x128xi32>
    %185 = arith.sitofp %184 : vector<8x128xi32> to vector<8x128xf32>
    %c20_i32_63 = arith.constant 20 : i32
    %186 = vector.broadcast %c20_i32_63 : i32 to vector<8x128xi32>
    %187 = arith.cmpi sge, %150, %186 : vector<8x128xi32>
    %c24_i32 = arith.constant 24 : i32
    %188 = vector.broadcast %c24_i32 : i32 to vector<8x128xi32>
    %189 = arith.cmpi slt, %150, %188 : vector<8x128xi32>
    %190 = arith.andi %187, %189 : vector<8x128xi1>
    %191 = arith.extui %190 : vector<8x128xi1> to vector<8x128xi32>
    %192 = arith.sitofp %191 : vector<8x128xi32> to vector<8x128xf32>
    %c24_i32_64 = arith.constant 24 : i32
    %193 = vector.broadcast %c24_i32_64 : i32 to vector<8x128xi32>
    %194 = arith.cmpi sge, %150, %193 : vector<8x128xi32>
    %c28_i32 = arith.constant 28 : i32
    %195 = vector.broadcast %c28_i32 : i32 to vector<8x128xi32>
    %196 = arith.cmpi slt, %150, %195 : vector<8x128xi32>
    %197 = arith.andi %194, %196 : vector<8x128xi1>
    %198 = arith.extui %197 : vector<8x128xi1> to vector<8x128xi32>
    %199 = arith.sitofp %198 : vector<8x128xi32> to vector<8x128xf32>
    %c28_i32_65 = arith.constant 28 : i32
    %200 = vector.broadcast %c28_i32_65 : i32 to vector<8x128xi32>
    %201 = arith.cmpi sge, %150, %200 : vector<8x128xi32>
    %c32_i32_66 = arith.constant 32 : i32
    %202 = vector.broadcast %c32_i32_66 : i32 to vector<8x128xi32>
    %203 = arith.cmpi slt, %150, %202 : vector<8x128xi32>
    %204 = arith.andi %201, %203 : vector<8x128xi1>
    %205 = arith.extui %204 : vector<8x128xi1> to vector<8x128xi32>
    %206 = arith.sitofp %205 : vector<8x128xi32> to vector<8x128xf32>
    %207 = tpu.concatenate %157, %164, %171, %178, %185, %192, %199, %206 in 0 : vector<8x128xf32>, vector<8x128xf32>, vector<8x128xf32>, vector<8x128xf32>, vector<8x128xf32>, vector<8x128xf32>, vector<8x128xf32>, vector<8x128xf32> -> vector<64x128xf32>
    %c0_67 = arith.constant 0 : index
    %c0_68 = arith.constant 0 : index
    %c0_69 = arith.constant 0 : index
    %208 = vector.load %arg11[%c0_67, %c0_68, %c0_69] : memref<2x128x384xf32, #tpu.memory_space<vmem>>, vector<1x128x384xf32>
    %209 = vector.shape_cast %208 : vector<1x128x384xf32> to vector<128x384xf32>
    %c0_70 = arith.constant 0 : index
    %c0_71 = arith.constant 0 : index
    %c0_72 = arith.constant 0 : index
    %210 = vector.load %arg12[%c0_70, %c0_71, %c0_72] : memref<2x1x384xf32, #tpu.memory_space<vmem>>, vector<1x1x384xf32>
    %211 = vector.shape_cast %210 : vector<1x1x384xf32> to vector<1x384xf32>
    %c0_73 = arith.constant 0 : index
    %c0_74 = arith.constant 0 : index
    %c0_75 = arith.constant 0 : index
    %212 = vector.load %arg13[%c0_73, %c0_74, %c0_75] : memref<2x128x128xf32, #tpu.memory_space<vmem>>, vector<1x128x128xf32>
    %213 = vector.shape_cast %212 : vector<1x128x128xf32> to vector<128x128xf32>
    %c0_76 = arith.constant 0 : index
    %c0_77 = arith.constant 0 : index
    %c0_78 = arith.constant 0 : index
    %214 = vector.load %arg14[%c0_76, %c0_77, %c0_78] : memref<2x1x128xf32, #tpu.memory_space<vmem>>, vector<1x1x128xf32>
    %215 = vector.shape_cast %214 : vector<1x1x128xf32> to vector<1x128xf32>
    %c0_79 = arith.constant 0 : index
    %c0_80 = arith.constant 0 : index
    %c0_81 = arith.constant 0 : index
    %216 = vector.load %arg15[%c0_79, %c0_80, %c0_81] : memref<2x2x128xf32, #tpu.memory_space<vmem>>, vector<1x2x128xf32>
    %217 = vector.shape_cast %216 : vector<1x2x128xf32> to vector<2x128xf32>
    %c0_82 = arith.constant 0 : index
    %c0_83 = arith.constant 0 : index
    %c0_84 = arith.constant 0 : index
    %218 = vector.load %arg16[%c0_82, %c0_83, %c0_84] : memref<2x2x128xf32, #tpu.memory_space<vmem>>, vector<1x2x128xf32>
    %219 = vector.shape_cast %218 : vector<1x2x128xf32> to vector<2x128xf32>
    %c0_85 = arith.constant 0 : index
    %c0_86 = arith.constant 0 : index
    %c0_87 = arith.constant 0 : index
    %220 = vector.load %arg17[%c0_85, %c0_86, %c0_87] : memref<2x128x128xf32, #tpu.memory_space<vmem>>, vector<1x128x128xf32>
    %221 = vector.shape_cast %220 : vector<1x128x128xf32> to vector<128x128xf32>
    %c0_88 = arith.constant 0 : index
    %c0_89 = arith.constant 0 : index
    %c0_90 = arith.constant 0 : index
    %222 = vector.load %arg18[%c0_88, %c0_89, %c0_90] : memref<2x1x128xf32, #tpu.memory_space<vmem>>, vector<1x1x128xf32>
    %223 = vector.shape_cast %222 : vector<1x1x128xf32> to vector<1x128xf32>
    %c0_91 = arith.constant 0 : index
    %c0_92 = arith.constant 0 : index
    %c0_93 = arith.constant 0 : index
    %224 = vector.load %arg19[%c0_91, %c0_92, %c0_93] : memref<2x128x128xf32, #tpu.memory_space<vmem>>, vector<1x128x128xf32>
    %225 = vector.shape_cast %224 : vector<1x128x128xf32> to vector<128x128xf32>
    %c0_94 = arith.constant 0 : index
    %c0_95 = arith.constant 0 : index
    %c0_96 = arith.constant 0 : index
    %226 = vector.load %arg20[%c0_94, %c0_95, %c0_96] : memref<2x1x128xf32, #tpu.memory_space<vmem>>, vector<1x1x128xf32>
    %227 = vector.shape_cast %226 : vector<1x1x128xf32> to vector<1x128xf32>
    %228 = vector.extract_strided_slice %217 {offsets = [0, 0], sizes = [1, 128], strides = [1, 1]} : vector<2x128xf32> to vector<1x128xf32>
    %229 = vector.extract_strided_slice %219 {offsets = [0, 0], sizes = [1, 128], strides = [1, 1]} : vector<2x128xf32> to vector<1x128xf32>
    %230 = tpu.iota {dimensions = array<i32: 1>} : vector<16x128xi32>
    %c32_i32_97 = arith.constant 32 : i32
    %231 = vector.broadcast %c32_i32_97 : i32 to vector<16x128xi32>
    %232 = arith.cmpi slt, %230, %231 : vector<16x128xi32>
    %233 = arith.extui %232 : vector<16x128xi1> to vector<16x128xi32>
    %234 = arith.sitofp %233 : vector<16x128xi32> to vector<16x128xf32>
    %cst_98 = arith.constant dense<0.000000e+00> : vector<16xf32>
    %235 = vector.multi_reduction <add>, %149, %cst_98 [1] : vector<16x128xf32> to vector<16xf32>
    %236 = vector.shape_cast %235 : vector<16xf32> to vector<16x1xf32>
    %cst_99 = arith.constant 3.125000e-02 : f32
    %237 = vector.broadcast %cst_99 : f32 to vector<16x1xf32>
    %238 = arith.mulf %236, %237 : vector<16x1xf32>
    %239 = vector.broadcast %238 : vector<16x1xf32> to vector<16x128xf32>
    %240 = arith.subf %149, %239 : vector<16x128xf32>
    %241 = arith.mulf %240, %234 : vector<16x128xf32>
    %242 = arith.mulf %241, %241 : vector<16x128xf32>
    %cst_100 = arith.constant dense<0.000000e+00> : vector<16xf32>
    %243 = vector.multi_reduction <add>, %242, %cst_100 [1] : vector<16x128xf32> to vector<16xf32>
    %244 = vector.shape_cast %243 : vector<16xf32> to vector<16x1xf32>
    %cst_101 = arith.constant 3.125000e-02 : f32
    %245 = vector.broadcast %cst_101 : f32 to vector<16x1xf32>
    %246 = arith.mulf %244, %245 : vector<16x1xf32>
    %cst_102 = arith.constant 9.99999974E-6 : f32
    %247 = vector.broadcast %cst_102 : f32 to vector<16x1xf32>
    %248 = arith.addf %246, %247 : vector<16x1xf32>
    %249 = math.rsqrt %248 : vector<16x1xf32>
    %250 = vector.broadcast %249 : vector<16x1xf32> to vector<16x128xf32>
    %251 = arith.mulf %241, %250 : vector<16x128xf32>
    %252 = vector.broadcast %228 : vector<1x128xf32> to vector<16x128xf32>
    %253 = arith.mulf %251, %252 : vector<16x128xf32>
    %254 = vector.broadcast %229 : vector<1x128xf32> to vector<16x128xf32>
    %255 = arith.addf %253, %254 : vector<16x128xf32>
    %cst_103 = arith.constant dense<0.000000e+00> : vector<16x384xf32>
    %256 = tpu.matmul %255, %209, %cst_103 {dimension_numbers = #tpu.dot_dimension_numbers<[1], [0], [0], [1], [0, 0, 1, 1], [], []>} : vector<16x128xf32>, vector<128x384xf32>, vector<16x384xf32> -> vector<16x384xf32>
    %257 = vector.broadcast %211 : vector<1x384xf32> to vector<16x384xf32>
    %258 = arith.addf %256, %257 : vector<16x384xf32>
    %259 = vector.extract_strided_slice %258 {offsets = [0, 0], sizes = [16, 128], strides = [1, 1]} : vector<16x384xf32> to vector<16x128xf32>
    %cst_104 = arith.constant 5.000000e-01 : f32
    %260 = vector.broadcast %cst_104 : f32 to vector<16x128xf32>
    %261 = arith.mulf %259, %260 : vector<16x128xf32>
    %262 = vector.extract_strided_slice %258 {offsets = [0, 128], sizes = [16, 128], strides = [1, 1]} : vector<16x384xf32> to vector<16x128xf32>
    %263 = vector.extract_strided_slice %258 {offsets = [0, 256], sizes = [16, 128], strides = [1, 1]} : vector<16x384xf32> to vector<16x128xf32>
    %264 = vector.extract_strided_slice %261 {offsets = [0, 0], sizes = [8, 128], strides = [1, 1]} : vector<16x128xf32> to vector<8x128xf32>
    %265 = vector.extract_strided_slice %262 {offsets = [0, 0], sizes = [8, 128], strides = [1, 1]} : vector<16x128xf32> to vector<8x128xf32>
    %266 = vector.extract_strided_slice %263 {offsets = [0, 0], sizes = [8, 128], strides = [1, 1]} : vector<16x128xf32> to vector<8x128xf32>
    %267 = tpu.concatenate %264, %264, %264, %264, %264, %264, %264, %264 in 0 : vector<8x128xf32>, vector<8x128xf32>, vector<8x128xf32>, vector<8x128xf32>, vector<8x128xf32>, vector<8x128xf32>, vector<8x128xf32>, vector<8x128xf32> -> vector<64x128xf32>
    %268 = arith.mulf %267, %207 : vector<64x128xf32>
    %cst_105 = arith.constant dense<0.000000e+00> : vector<64x8xf32>
    %269 = tpu.matmul %268, %265, %cst_105 {dimension_numbers = #tpu.dot_dimension_numbers<[1], [1], [0], [0], [0, 0, 1, 0], [], []>} : vector<64x128xf32>, vector<8x128xf32>, vector<64x8xf32> -> vector<64x8xf32>
    %cst_106 = arith.constant dense<0xFF800000> : vector<64xf32>
    %270 = vector.multi_reduction <maximumf>, %269, %cst_106 [1] : vector<64x8xf32> to vector<64xf32>
    %271 = vector.shape_cast %270 : vector<64xf32> to vector<64x1xf32>
    %272 = vector.broadcast %271 : vector<64x1xf32> to vector<64x8xf32>
    %273 = arith.subf %269, %272 : vector<64x8xf32>
    %274 = math.exp %273 : vector<64x8xf32>
    %cst_107 = arith.constant dense<0.000000e+00> : vector<64xf32>
    %275 = vector.multi_reduction <add>, %274, %cst_107 [1] : vector<64x8xf32> to vector<64xf32>
    %276 = vector.shape_cast %275 : vector<64xf32> to vector<64x1xf32>
    %277 = tpu.reciprocal %276 {approx = true} : vector<64x1xf32> -> vector<64x1xf32>
    %278 = vector.broadcast %277 : vector<64x1xf32> to vector<64x8xf32>
    %279 = arith.mulf %274, %278 : vector<64x8xf32>
    %cst_108 = arith.constant dense<0.000000e+00> : vector<64x128xf32>
    %280 = tpu.matmul %279, %266, %cst_108 {dimension_numbers = #tpu.dot_dimension_numbers<[1], [0], [0], [1], [0, 0, 1, 1], [], []>} : vector<64x8xf32>, vector<8x128xf32>, vector<64x128xf32> -> vector<64x128xf32>
    %281 = arith.mulf %280, %207 : vector<64x128xf32>
    %282 = vector.extract_strided_slice %281 {offsets = [0, 0], sizes = [8, 128], strides = [1, 1]} : vector<64x128xf32> to vector<8x128xf32>
    %283 = vector.extract_strided_slice %281 {offsets = [8, 0], sizes = [8, 128], strides = [1, 1]} : vector<64x128xf32> to vector<8x128xf32>
    %284 = arith.addf %282, %283 : vector<8x128xf32>
    %285 = vector.extract_strided_slice %281 {offsets = [16, 0], sizes = [8, 128], strides = [1, 1]} : vector<64x128xf32> to vector<8x128xf32>
    %286 = arith.addf %284, %285 : vector<8x128xf32>
    %287 = vector.extract_strided_slice %281 {offsets = [24, 0], sizes = [8, 128], strides = [1, 1]} : vector<64x128xf32> to vector<8x128xf32>
    %288 = arith.addf %286, %287 : vector<8x128xf32>
    %289 = vector.extract_strided_slice %281 {offsets = [32, 0], sizes = [8, 128], strides = [1, 1]} : vector<64x128xf32> to vector<8x128xf32>
    %290 = arith.addf %288, %289 : vector<8x128xf32>
    %291 = vector.extract_strided_slice %281 {offsets = [40, 0], sizes = [8, 128], strides = [1, 1]} : vector<64x128xf32> to vector<8x128xf32>
    %292 = arith.addf %290, %291 : vector<8x128xf32>
    %293 = vector.extract_strided_slice %281 {offsets = [48, 0], sizes = [8, 128], strides = [1, 1]} : vector<64x128xf32> to vector<8x128xf32>
    %294 = arith.addf %292, %293 : vector<8x128xf32>
    %295 = vector.extract_strided_slice %281 {offsets = [56, 0], sizes = [8, 128], strides = [1, 1]} : vector<64x128xf32> to vector<8x128xf32>
    %296 = arith.addf %294, %295 : vector<8x128xf32>
    %297 = vector.extract_strided_slice %261 {offsets = [8, 0], sizes = [8, 128], strides = [1, 1]} : vector<16x128xf32> to vector<8x128xf32>
    %298 = vector.extract_strided_slice %262 {offsets = [8, 0], sizes = [8, 128], strides = [1, 1]} : vector<16x128xf32> to vector<8x128xf32>
    %299 = vector.extract_strided_slice %263 {offsets = [8, 0], sizes = [8, 128], strides = [1, 1]} : vector<16x128xf32> to vector<8x128xf32>
    %300 = tpu.concatenate %297, %297, %297, %297, %297, %297, %297, %297 in 0 : vector<8x128xf32>, vector<8x128xf32>, vector<8x128xf32>, vector<8x128xf32>, vector<8x128xf32>, vector<8x128xf32>, vector<8x128xf32>, vector<8x128xf32> -> vector<64x128xf32>
    %301 = arith.mulf %300, %207 : vector<64x128xf32>
    %cst_109 = arith.constant dense<0.000000e+00> : vector<64x8xf32>
    %302 = tpu.matmul %301, %298, %cst_109 {dimension_numbers = #tpu.dot_dimension_numbers<[1], [1], [0], [0], [0, 0, 1, 0], [], []>} : vector<64x128xf32>, vector<8x128xf32>, vector<64x8xf32> -> vector<64x8xf32>
    %cst_110 = arith.constant dense<0xFF800000> : vector<64xf32>
    %303 = vector.multi_reduction <maximumf>, %302, %cst_110 [1] : vector<64x8xf32> to vector<64xf32>
    %304 = vector.shape_cast %303 : vector<64xf32> to vector<64x1xf32>
    %305 = vector.broadcast %304 : vector<64x1xf32> to vector<64x8xf32>
    %306 = arith.subf %302, %305 : vector<64x8xf32>
    %307 = math.exp %306 : vector<64x8xf32>
    %cst_111 = arith.constant dense<0.000000e+00> : vector<64xf32>
    %308 = vector.multi_reduction <add>, %307, %cst_111 [1] : vector<64x8xf32> to vector<64xf32>
    %309 = vector.shape_cast %308 : vector<64xf32> to vector<64x1xf32>
    %310 = tpu.reciprocal %309 {approx = true} : vector<64x1xf32> -> vector<64x1xf32>
    %311 = vector.broadcast %310 : vector<64x1xf32> to vector<64x8xf32>
    %312 = arith.mulf %307, %311 : vector<64x8xf32>
    %cst_112 = arith.constant dense<0.000000e+00> : vector<64x128xf32>
    %313 = tpu.matmul %312, %299, %cst_112 {dimension_numbers = #tpu.dot_dimension_numbers<[1], [0], [0], [1], [0, 0, 1, 1], [], []>} : vector<64x8xf32>, vector<8x128xf32>, vector<64x128xf32> -> vector<64x128xf32>
    %314 = arith.mulf %313, %207 : vector<64x128xf32>
    %315 = vector.extract_strided_slice %314 {offsets = [0, 0], sizes = [8, 128], strides = [1, 1]} : vector<64x128xf32> to vector<8x128xf32>
    %316 = vector.extract_strided_slice %314 {offsets = [8, 0], sizes = [8, 128], strides = [1, 1]} : vector<64x128xf32> to vector<8x128xf32>
    %317 = arith.addf %315, %316 : vector<8x128xf32>
    %318 = vector.extract_strided_slice %314 {offsets = [16, 0], sizes = [8, 128], strides = [1, 1]} : vector<64x128xf32> to vector<8x128xf32>
    %319 = arith.addf %317, %318 : vector<8x128xf32>
    %320 = vector.extract_strided_slice %314 {offsets = [24, 0], sizes = [8, 128], strides = [1, 1]} : vector<64x128xf32> to vector<8x128xf32>
    %321 = arith.addf %319, %320 : vector<8x128xf32>
    %322 = vector.extract_strided_slice %314 {offsets = [32, 0], sizes = [8, 128], strides = [1, 1]} : vector<64x128xf32> to vector<8x128xf32>
    %323 = arith.addf %321, %322 : vector<8x128xf32>
    %324 = vector.extract_strided_slice %314 {offsets = [40, 0], sizes = [8, 128], strides = [1, 1]} : vector<64x128xf32> to vector<8x128xf32>
    %325 = arith.addf %323, %324 : vector<8x128xf32>
    %326 = vector.extract_strided_slice %314 {offsets = [48, 0], sizes = [8, 128], strides = [1, 1]} : vector<64x128xf32> to vector<8x128xf32>
    %327 = arith.addf %325, %326 : vector<8x128xf32>
    %328 = vector.extract_strided_slice %314 {offsets = [56, 0], sizes = [8, 128], strides = [1, 1]} : vector<64x128xf32> to vector<8x128xf32>
    %329 = arith.addf %327, %328 : vector<8x128xf32>
    %330 = tpu.concatenate %296, %329 in 0 : vector<8x128xf32>, vector<8x128xf32> -> vector<16x128xf32>
    %cst_113 = arith.constant dense<0.000000e+00> : vector<16x128xf32>
    %331 = tpu.matmul %330, %213, %cst_113 {dimension_numbers = #tpu.dot_dimension_numbers<[1], [0], [0], [1], [0, 0, 1, 1], [], []>} : vector<16x128xf32>, vector<128x128xf32>, vector<16x128xf32> -> vector<16x128xf32>
    %332 = arith.addf %149, %331 : vector<16x128xf32>
    %333 = vector.broadcast %215 : vector<1x128xf32> to vector<16x128xf32>
    %334 = arith.addf %332, %333 : vector<16x128xf32>
    %335 = vector.extract_strided_slice %217 {offsets = [1, 0], sizes = [1, 128], strides = [1, 1]} : vector<2x128xf32> to vector<1x128xf32>
    %336 = vector.extract_strided_slice %219 {offsets = [1, 0], sizes = [1, 128], strides = [1, 1]} : vector<2x128xf32> to vector<1x128xf32>
    %337 = tpu.iota {dimensions = array<i32: 1>} : vector<16x128xi32>
    %c32_i32_114 = arith.constant 32 : i32
    %338 = vector.broadcast %c32_i32_114 : i32 to vector<16x128xi32>
    %339 = arith.cmpi slt, %337, %338 : vector<16x128xi32>
    %340 = arith.extui %339 : vector<16x128xi1> to vector<16x128xi32>
    %341 = arith.sitofp %340 : vector<16x128xi32> to vector<16x128xf32>
    %cst_115 = arith.constant dense<0.000000e+00> : vector<16xf32>
    %342 = vector.multi_reduction <add>, %334, %cst_115 [1] : vector<16x128xf32> to vector<16xf32>
    %343 = vector.shape_cast %342 : vector<16xf32> to vector<16x1xf32>
    %cst_116 = arith.constant 3.125000e-02 : f32
    %344 = vector.broadcast %cst_116 : f32 to vector<16x1xf32>
    %345 = arith.mulf %343, %344 : vector<16x1xf32>
    %346 = vector.broadcast %345 : vector<16x1xf32> to vector<16x128xf32>
    %347 = arith.subf %334, %346 : vector<16x128xf32>
    %348 = arith.mulf %347, %341 : vector<16x128xf32>
    %349 = arith.mulf %348, %348 : vector<16x128xf32>
    %cst_117 = arith.constant dense<0.000000e+00> : vector<16xf32>
    %350 = vector.multi_reduction <add>, %349, %cst_117 [1] : vector<16x128xf32> to vector<16xf32>
    %351 = vector.shape_cast %350 : vector<16xf32> to vector<16x1xf32>
    %cst_118 = arith.constant 3.125000e-02 : f32
    %352 = vector.broadcast %cst_118 : f32 to vector<16x1xf32>
    %353 = arith.mulf %351, %352 : vector<16x1xf32>
    %cst_119 = arith.constant 9.99999974E-6 : f32
    %354 = vector.broadcast %cst_119 : f32 to vector<16x1xf32>
    %355 = arith.addf %353, %354 : vector<16x1xf32>
    %356 = math.rsqrt %355 : vector<16x1xf32>
    %357 = vector.broadcast %356 : vector<16x1xf32> to vector<16x128xf32>
    %358 = arith.mulf %348, %357 : vector<16x128xf32>
    %359 = vector.broadcast %335 : vector<1x128xf32> to vector<16x128xf32>
    %360 = arith.mulf %358, %359 : vector<16x128xf32>
    %361 = vector.broadcast %336 : vector<1x128xf32> to vector<16x128xf32>
    %362 = arith.addf %360, %361 : vector<16x128xf32>
    %cst_120 = arith.constant dense<0.000000e+00> : vector<16x128xf32>
    %363 = tpu.matmul %362, %221, %cst_120 {dimension_numbers = #tpu.dot_dimension_numbers<[1], [0], [0], [1], [0, 0, 1, 1], [], []>} : vector<16x128xf32>, vector<128x128xf32>, vector<16x128xf32> -> vector<16x128xf32>
    %364 = vector.broadcast %223 : vector<1x128xf32> to vector<16x128xf32>
    %365 = arith.addf %363, %364 : vector<16x128xf32>
    %cst_121 = arith.constant 0.000000e+00 : f32
    %366 = vector.broadcast %cst_121 : f32 to vector<16x128xf32>
    %367 = arith.maximumf %365, %366 : vector<16x128xf32>
    %cst_122 = arith.constant dense<0.000000e+00> : vector<16x128xf32>
    %368 = tpu.matmul %367, %225, %cst_122 {dimension_numbers = #tpu.dot_dimension_numbers<[1], [0], [0], [1], [0, 0, 1, 1], [], []>} : vector<16x128xf32>, vector<128x128xf32>, vector<16x128xf32> -> vector<16x128xf32>
    %369 = arith.addf %334, %368 : vector<16x128xf32>
    %370 = vector.broadcast %227 : vector<1x128xf32> to vector<16x128xf32>
    %371 = arith.addf %369, %370 : vector<16x128xf32>
    %c1_123 = arith.constant 1 : index
    %c0_124 = arith.constant 0 : index
    %c0_125 = arith.constant 0 : index
    %372 = vector.load %arg11[%c1_123, %c0_124, %c0_125] : memref<2x128x384xf32, #tpu.memory_space<vmem>>, vector<1x128x384xf32>
    %373 = vector.shape_cast %372 : vector<1x128x384xf32> to vector<128x384xf32>
    %c1_126 = arith.constant 1 : index
    %c0_127 = arith.constant 0 : index
    %c0_128 = arith.constant 0 : index
    %374 = vector.load %arg12[%c1_126, %c0_127, %c0_128] : memref<2x1x384xf32, #tpu.memory_space<vmem>>, vector<1x1x384xf32>
    %375 = vector.shape_cast %374 : vector<1x1x384xf32> to vector<1x384xf32>
    %c1_129 = arith.constant 1 : index
    %c0_130 = arith.constant 0 : index
    %c0_131 = arith.constant 0 : index
    %376 = vector.load %arg13[%c1_129, %c0_130, %c0_131] : memref<2x128x128xf32, #tpu.memory_space<vmem>>, vector<1x128x128xf32>
    %377 = vector.shape_cast %376 : vector<1x128x128xf32> to vector<128x128xf32>
    %c1_132 = arith.constant 1 : index
    %c0_133 = arith.constant 0 : index
    %c0_134 = arith.constant 0 : index
    %378 = vector.load %arg14[%c1_132, %c0_133, %c0_134] : memref<2x1x128xf32, #tpu.memory_space<vmem>>, vector<1x1x128xf32>
    %379 = vector.shape_cast %378 : vector<1x1x128xf32> to vector<1x128xf32>
    %c1_135 = arith.constant 1 : index
    %c0_136 = arith.constant 0 : index
    %c0_137 = arith.constant 0 : index
    %380 = vector.load %arg15[%c1_135, %c0_136, %c0_137] : memref<2x2x128xf32, #tpu.memory_space<vmem>>, vector<1x2x128xf32>
    %381 = vector.shape_cast %380 : vector<1x2x128xf32> to vector<2x128xf32>
    %c1_138 = arith.constant 1 : index
    %c0_139 = arith.constant 0 : index
    %c0_140 = arith.constant 0 : index
    %382 = vector.load %arg16[%c1_138, %c0_139, %c0_140] : memref<2x2x128xf32, #tpu.memory_space<vmem>>, vector<1x2x128xf32>
    %383 = vector.shape_cast %382 : vector<1x2x128xf32> to vector<2x128xf32>
    %c1_141 = arith.constant 1 : index
    %c0_142 = arith.constant 0 : index
    %c0_143 = arith.constant 0 : index
    %384 = vector.load %arg17[%c1_141, %c0_142, %c0_143] : memref<2x128x128xf32, #tpu.memory_space<vmem>>, vector<1x128x128xf32>
    %385 = vector.shape_cast %384 : vector<1x128x128xf32> to vector<128x128xf32>
    %c1_144 = arith.constant 1 : index
    %c0_145 = arith.constant 0 : index
    %c0_146 = arith.constant 0 : index
    %386 = vector.load %arg18[%c1_144, %c0_145, %c0_146] : memref<2x1x128xf32, #tpu.memory_space<vmem>>, vector<1x1x128xf32>
    %387 = vector.shape_cast %386 : vector<1x1x128xf32> to vector<1x128xf32>
    %c1_147 = arith.constant 1 : index
    %c0_148 = arith.constant 0 : index
    %c0_149 = arith.constant 0 : index
    %388 = vector.load %arg19[%c1_147, %c0_148, %c0_149] : memref<2x128x128xf32, #tpu.memory_space<vmem>>, vector<1x128x128xf32>
    %389 = vector.shape_cast %388 : vector<1x128x128xf32> to vector<128x128xf32>
    %c1_150 = arith.constant 1 : index
    %c0_151 = arith.constant 0 : index
    %c0_152 = arith.constant 0 : index
    %390 = vector.load %arg20[%c1_150, %c0_151, %c0_152] : memref<2x1x128xf32, #tpu.memory_space<vmem>>, vector<1x1x128xf32>
    %391 = vector.shape_cast %390 : vector<1x1x128xf32> to vector<1x128xf32>
    %392 = vector.extract_strided_slice %381 {offsets = [0, 0], sizes = [1, 128], strides = [1, 1]} : vector<2x128xf32> to vector<1x128xf32>
    %393 = vector.extract_strided_slice %383 {offsets = [0, 0], sizes = [1, 128], strides = [1, 1]} : vector<2x128xf32> to vector<1x128xf32>
    %394 = tpu.iota {dimensions = array<i32: 1>} : vector<16x128xi32>
    %c32_i32_153 = arith.constant 32 : i32
    %395 = vector.broadcast %c32_i32_153 : i32 to vector<16x128xi32>
    %396 = arith.cmpi slt, %394, %395 : vector<16x128xi32>
    %397 = arith.extui %396 : vector<16x128xi1> to vector<16x128xi32>
    %398 = arith.sitofp %397 : vector<16x128xi32> to vector<16x128xf32>
    %cst_154 = arith.constant dense<0.000000e+00> : vector<16xf32>
    %399 = vector.multi_reduction <add>, %371, %cst_154 [1] : vector<16x128xf32> to vector<16xf32>
    %400 = vector.shape_cast %399 : vector<16xf32> to vector<16x1xf32>
    %cst_155 = arith.constant 3.125000e-02 : f32
    %401 = vector.broadcast %cst_155 : f32 to vector<16x1xf32>
    %402 = arith.mulf %400, %401 : vector<16x1xf32>
    %403 = vector.broadcast %402 : vector<16x1xf32> to vector<16x128xf32>
    %404 = arith.subf %371, %403 : vector<16x128xf32>
    %405 = arith.mulf %404, %398 : vector<16x128xf32>
    %406 = arith.mulf %405, %405 : vector<16x128xf32>
    %cst_156 = arith.constant dense<0.000000e+00> : vector<16xf32>
    %407 = vector.multi_reduction <add>, %406, %cst_156 [1] : vector<16x128xf32> to vector<16xf32>
    %408 = vector.shape_cast %407 : vector<16xf32> to vector<16x1xf32>
    %cst_157 = arith.constant 3.125000e-02 : f32
    %409 = vector.broadcast %cst_157 : f32 to vector<16x1xf32>
    %410 = arith.mulf %408, %409 : vector<16x1xf32>
    %cst_158 = arith.constant 9.99999974E-6 : f32
    %411 = vector.broadcast %cst_158 : f32 to vector<16x1xf32>
    %412 = arith.addf %410, %411 : vector<16x1xf32>
    %413 = math.rsqrt %412 : vector<16x1xf32>
    %414 = vector.broadcast %413 : vector<16x1xf32> to vector<16x128xf32>
    %415 = arith.mulf %405, %414 : vector<16x128xf32>
    %416 = vector.broadcast %392 : vector<1x128xf32> to vector<16x128xf32>
    %417 = arith.mulf %415, %416 : vector<16x128xf32>
    %418 = vector.broadcast %393 : vector<1x128xf32> to vector<16x128xf32>
    %419 = arith.addf %417, %418 : vector<16x128xf32>
    %cst_159 = arith.constant dense<0.000000e+00> : vector<16x384xf32>
    %420 = tpu.matmul %419, %373, %cst_159 {dimension_numbers = #tpu.dot_dimension_numbers<[1], [0], [0], [1], [0, 0, 1, 1], [], []>} : vector<16x128xf32>, vector<128x384xf32>, vector<16x384xf32> -> vector<16x384xf32>
    %421 = vector.broadcast %375 : vector<1x384xf32> to vector<16x384xf32>
    %422 = arith.addf %420, %421 : vector<16x384xf32>
    %423 = vector.extract_strided_slice %422 {offsets = [0, 0], sizes = [16, 128], strides = [1, 1]} : vector<16x384xf32> to vector<16x128xf32>
    %cst_160 = arith.constant 5.000000e-01 : f32
    %424 = vector.broadcast %cst_160 : f32 to vector<16x128xf32>
    %425 = arith.mulf %423, %424 : vector<16x128xf32>
    %426 = vector.extract_strided_slice %422 {offsets = [0, 128], sizes = [16, 128], strides = [1, 1]} : vector<16x384xf32> to vector<16x128xf32>
    %427 = vector.extract_strided_slice %422 {offsets = [0, 256], sizes = [16, 128], strides = [1, 1]} : vector<16x384xf32> to vector<16x128xf32>
    %428 = vector.extract_strided_slice %425 {offsets = [0, 0], sizes = [8, 128], strides = [1, 1]} : vector<16x128xf32> to vector<8x128xf32>
    %429 = vector.extract_strided_slice %426 {offsets = [0, 0], sizes = [8, 128], strides = [1, 1]} : vector<16x128xf32> to vector<8x128xf32>
    %430 = vector.extract_strided_slice %427 {offsets = [0, 0], sizes = [8, 128], strides = [1, 1]} : vector<16x128xf32> to vector<8x128xf32>
    %431 = tpu.concatenate %428, %428, %428, %428, %428, %428, %428, %428 in 0 : vector<8x128xf32>, vector<8x128xf32>, vector<8x128xf32>, vector<8x128xf32>, vector<8x128xf32>, vector<8x128xf32>, vector<8x128xf32>, vector<8x128xf32> -> vector<64x128xf32>
    %432 = arith.mulf %431, %207 : vector<64x128xf32>
    %cst_161 = arith.constant dense<0.000000e+00> : vector<64x8xf32>
    %433 = tpu.matmul %432, %429, %cst_161 {dimension_numbers = #tpu.dot_dimension_numbers<[1], [1], [0], [0], [0, 0, 1, 0], [], []>} : vector<64x128xf32>, vector<8x128xf32>, vector<64x8xf32> -> vector<64x8xf32>
    %cst_162 = arith.constant dense<0xFF800000> : vector<64xf32>
    %434 = vector.multi_reduction <maximumf>, %433, %cst_162 [1] : vector<64x8xf32> to vector<64xf32>
    %435 = vector.shape_cast %434 : vector<64xf32> to vector<64x1xf32>
    %436 = vector.broadcast %435 : vector<64x1xf32> to vector<64x8xf32>
    %437 = arith.subf %433, %436 : vector<64x8xf32>
    %438 = math.exp %437 : vector<64x8xf32>
    %cst_163 = arith.constant dense<0.000000e+00> : vector<64xf32>
    %439 = vector.multi_reduction <add>, %438, %cst_163 [1] : vector<64x8xf32> to vector<64xf32>
    %440 = vector.shape_cast %439 : vector<64xf32> to vector<64x1xf32>
    %441 = tpu.reciprocal %440 {approx = true} : vector<64x1xf32> -> vector<64x1xf32>
    %442 = vector.broadcast %441 : vector<64x1xf32> to vector<64x8xf32>
    %443 = arith.mulf %438, %442 : vector<64x8xf32>
    %cst_164 = arith.constant dense<0.000000e+00> : vector<64x128xf32>
    %444 = tpu.matmul %443, %430, %cst_164 {dimension_numbers = #tpu.dot_dimension_numbers<[1], [0], [0], [1], [0, 0, 1, 1], [], []>} : vector<64x8xf32>, vector<8x128xf32>, vector<64x128xf32> -> vector<64x128xf32>
    %445 = arith.mulf %444, %207 : vector<64x128xf32>
    %446 = vector.extract_strided_slice %445 {offsets = [0, 0], sizes = [8, 128], strides = [1, 1]} : vector<64x128xf32> to vector<8x128xf32>
    %447 = vector.extract_strided_slice %445 {offsets = [8, 0], sizes = [8, 128], strides = [1, 1]} : vector<64x128xf32> to vector<8x128xf32>
    %448 = arith.addf %446, %447 : vector<8x128xf32>
    %449 = vector.extract_strided_slice %445 {offsets = [16, 0], sizes = [8, 128], strides = [1, 1]} : vector<64x128xf32> to vector<8x128xf32>
    %450 = arith.addf %448, %449 : vector<8x128xf32>
    %451 = vector.extract_strided_slice %445 {offsets = [24, 0], sizes = [8, 128], strides = [1, 1]} : vector<64x128xf32> to vector<8x128xf32>
    %452 = arith.addf %450, %451 : vector<8x128xf32>
    %453 = vector.extract_strided_slice %445 {offsets = [32, 0], sizes = [8, 128], strides = [1, 1]} : vector<64x128xf32> to vector<8x128xf32>
    %454 = arith.addf %452, %453 : vector<8x128xf32>
    %455 = vector.extract_strided_slice %445 {offsets = [40, 0], sizes = [8, 128], strides = [1, 1]} : vector<64x128xf32> to vector<8x128xf32>
    %456 = arith.addf %454, %455 : vector<8x128xf32>
    %457 = vector.extract_strided_slice %445 {offsets = [48, 0], sizes = [8, 128], strides = [1, 1]} : vector<64x128xf32> to vector<8x128xf32>
    %458 = arith.addf %456, %457 : vector<8x128xf32>
    %459 = vector.extract_strided_slice %445 {offsets = [56, 0], sizes = [8, 128], strides = [1, 1]} : vector<64x128xf32> to vector<8x128xf32>
    %460 = arith.addf %458, %459 : vector<8x128xf32>
    %461 = vector.extract_strided_slice %425 {offsets = [8, 0], sizes = [8, 128], strides = [1, 1]} : vector<16x128xf32> to vector<8x128xf32>
    %462 = vector.extract_strided_slice %426 {offsets = [8, 0], sizes = [8, 128], strides = [1, 1]} : vector<16x128xf32> to vector<8x128xf32>
    %463 = vector.extract_strided_slice %427 {offsets = [8, 0], sizes = [8, 128], strides = [1, 1]} : vector<16x128xf32> to vector<8x128xf32>
    %464 = tpu.concatenate %461, %461, %461, %461, %461, %461, %461, %461 in 0 : vector<8x128xf32>, vector<8x128xf32>, vector<8x128xf32>, vector<8x128xf32>, vector<8x128xf32>, vector<8x128xf32>, vector<8x128xf32>, vector<8x128xf32> -> vector<64x128xf32>
    %465 = arith.mulf %464, %207 : vector<64x128xf32>
    %cst_165 = arith.constant dense<0.000000e+00> : vector<64x8xf32>
    %466 = tpu.matmul %465, %462, %cst_165 {dimension_numbers = #tpu.dot_dimension_numbers<[1], [1], [0], [0], [0, 0, 1, 0], [], []>} : vector<64x128xf32>, vector<8x128xf32>, vector<64x8xf32> -> vector<64x8xf32>
    %cst_166 = arith.constant dense<0xFF800000> : vector<64xf32>
    %467 = vector.multi_reduction <maximumf>, %466, %cst_166 [1] : vector<64x8xf32> to vector<64xf32>
    %468 = vector.shape_cast %467 : vector<64xf32> to vector<64x1xf32>
    %469 = vector.broadcast %468 : vector<64x1xf32> to vector<64x8xf32>
    %470 = arith.subf %466, %469 : vector<64x8xf32>
    %471 = math.exp %470 : vector<64x8xf32>
    %cst_167 = arith.constant dense<0.000000e+00> : vector<64xf32>
    %472 = vector.multi_reduction <add>, %471, %cst_167 [1] : vector<64x8xf32> to vector<64xf32>
    %473 = vector.shape_cast %472 : vector<64xf32> to vector<64x1xf32>
    %474 = tpu.reciprocal %473 {approx = true} : vector<64x1xf32> -> vector<64x1xf32>
    %475 = vector.broadcast %474 : vector<64x1xf32> to vector<64x8xf32>
    %476 = arith.mulf %471, %475 : vector<64x8xf32>
    %cst_168 = arith.constant dense<0.000000e+00> : vector<64x128xf32>
    %477 = tpu.matmul %476, %463, %cst_168 {dimension_numbers = #tpu.dot_dimension_numbers<[1], [0], [0], [1], [0, 0, 1, 1], [], []>} : vector<64x8xf32>, vector<8x128xf32>, vector<64x128xf32> -> vector<64x128xf32>
    %478 = arith.mulf %477, %207 : vector<64x128xf32>
    %479 = vector.extract_strided_slice %478 {offsets = [0, 0], sizes = [8, 128], strides = [1, 1]} : vector<64x128xf32> to vector<8x128xf32>
    %480 = vector.extract_strided_slice %478 {offsets = [8, 0], sizes = [8, 128], strides = [1, 1]} : vector<64x128xf32> to vector<8x128xf32>
    %481 = arith.addf %479, %480 : vector<8x128xf32>
    %482 = vector.extract_strided_slice %478 {offsets = [16, 0], sizes = [8, 128], strides = [1, 1]} : vector<64x128xf32> to vector<8x128xf32>
    %483 = arith.addf %481, %482 : vector<8x128xf32>
    %484 = vector.extract_strided_slice %478 {offsets = [24, 0], sizes = [8, 128], strides = [1, 1]} : vector<64x128xf32> to vector<8x128xf32>
    %485 = arith.addf %483, %484 : vector<8x128xf32>
    %486 = vector.extract_strided_slice %478 {offsets = [32, 0], sizes = [8, 128], strides = [1, 1]} : vector<64x128xf32> to vector<8x128xf32>
    %487 = arith.addf %485, %486 : vector<8x128xf32>
    %488 = vector.extract_strided_slice %478 {offsets = [40, 0], sizes = [8, 128], strides = [1, 1]} : vector<64x128xf32> to vector<8x128xf32>
    %489 = arith.addf %487, %488 : vector<8x128xf32>
    %490 = vector.extract_strided_slice %478 {offsets = [48, 0], sizes = [8, 128], strides = [1, 1]} : vector<64x128xf32> to vector<8x128xf32>
    %491 = arith.addf %489, %490 : vector<8x128xf32>
    %492 = vector.extract_strided_slice %478 {offsets = [56, 0], sizes = [8, 128], strides = [1, 1]} : vector<64x128xf32> to vector<8x128xf32>
    %493 = arith.addf %491, %492 : vector<8x128xf32>
    %494 = tpu.concatenate %460, %493 in 0 : vector<8x128xf32>, vector<8x128xf32> -> vector<16x128xf32>
    %cst_169 = arith.constant dense<0.000000e+00> : vector<16x128xf32>
    %495 = tpu.matmul %494, %377, %cst_169 {dimension_numbers = #tpu.dot_dimension_numbers<[1], [0], [0], [1], [0, 0, 1, 1], [], []>} : vector<16x128xf32>, vector<128x128xf32>, vector<16x128xf32> -> vector<16x128xf32>
    %496 = arith.addf %371, %495 : vector<16x128xf32>
    %497 = vector.broadcast %379 : vector<1x128xf32> to vector<16x128xf32>
    %498 = arith.addf %496, %497 : vector<16x128xf32>
    %499 = vector.extract_strided_slice %381 {offsets = [1, 0], sizes = [1, 128], strides = [1, 1]} : vector<2x128xf32> to vector<1x128xf32>
    %500 = vector.extract_strided_slice %383 {offsets = [1, 0], sizes = [1, 128], strides = [1, 1]} : vector<2x128xf32> to vector<1x128xf32>
    %501 = tpu.iota {dimensions = array<i32: 1>} : vector<16x128xi32>
    %c32_i32_170 = arith.constant 32 : i32
    %502 = vector.broadcast %c32_i32_170 : i32 to vector<16x128xi32>
    %503 = arith.cmpi slt, %501, %502 : vector<16x128xi32>
    %504 = arith.extui %503 : vector<16x128xi1> to vector<16x128xi32>
    %505 = arith.sitofp %504 : vector<16x128xi32> to vector<16x128xf32>
    %cst_171 = arith.constant dense<0.000000e+00> : vector<16xf32>
    %506 = vector.multi_reduction <add>, %498, %cst_171 [1] : vector<16x128xf32> to vector<16xf32>
    %507 = vector.shape_cast %506 : vector<16xf32> to vector<16x1xf32>
    %cst_172 = arith.constant 3.125000e-02 : f32
    %508 = vector.broadcast %cst_172 : f32 to vector<16x1xf32>
    %509 = arith.mulf %507, %508 : vector<16x1xf32>
    %510 = vector.broadcast %509 : vector<16x1xf32> to vector<16x128xf32>
    %511 = arith.subf %498, %510 : vector<16x128xf32>
    %512 = arith.mulf %511, %505 : vector<16x128xf32>
    %513 = arith.mulf %512, %512 : vector<16x128xf32>
    %cst_173 = arith.constant dense<0.000000e+00> : vector<16xf32>
    %514 = vector.multi_reduction <add>, %513, %cst_173 [1] : vector<16x128xf32> to vector<16xf32>
    %515 = vector.shape_cast %514 : vector<16xf32> to vector<16x1xf32>
    %cst_174 = arith.constant 3.125000e-02 : f32
    %516 = vector.broadcast %cst_174 : f32 to vector<16x1xf32>
    %517 = arith.mulf %515, %516 : vector<16x1xf32>
    %cst_175 = arith.constant 9.99999974E-6 : f32
    %518 = vector.broadcast %cst_175 : f32 to vector<16x1xf32>
    %519 = arith.addf %517, %518 : vector<16x1xf32>
    %520 = math.rsqrt %519 : vector<16x1xf32>
    %521 = vector.broadcast %520 : vector<16x1xf32> to vector<16x128xf32>
    %522 = arith.mulf %512, %521 : vector<16x128xf32>
    %523 = vector.broadcast %499 : vector<1x128xf32> to vector<16x128xf32>
    %524 = arith.mulf %522, %523 : vector<16x128xf32>
    %525 = vector.broadcast %500 : vector<1x128xf32> to vector<16x128xf32>
    %526 = arith.addf %524, %525 : vector<16x128xf32>
    %cst_176 = arith.constant dense<0.000000e+00> : vector<16x128xf32>
    %527 = tpu.matmul %526, %385, %cst_176 {dimension_numbers = #tpu.dot_dimension_numbers<[1], [0], [0], [1], [0, 0, 1, 1], [], []>} : vector<16x128xf32>, vector<128x128xf32>, vector<16x128xf32> -> vector<16x128xf32>
    %528 = vector.broadcast %387 : vector<1x128xf32> to vector<16x128xf32>
    %529 = arith.addf %527, %528 : vector<16x128xf32>
    %cst_177 = arith.constant 0.000000e+00 : f32
    %530 = vector.broadcast %cst_177 : f32 to vector<16x128xf32>
    %531 = arith.maximumf %529, %530 : vector<16x128xf32>
    %cst_178 = arith.constant dense<0.000000e+00> : vector<16x128xf32>
    %532 = tpu.matmul %531, %389, %cst_178 {dimension_numbers = #tpu.dot_dimension_numbers<[1], [0], [0], [1], [0, 0, 1, 1], [], []>} : vector<16x128xf32>, vector<128x128xf32>, vector<16x128xf32> -> vector<16x128xf32>
    %533 = arith.addf %498, %532 : vector<16x128xf32>
    %534 = vector.broadcast %391 : vector<1x128xf32> to vector<16x128xf32>
    %535 = arith.addf %533, %534 : vector<16x128xf32>
    %536 = tpu.iota {dimensions = array<i32: 1>} : vector<2x16xi32>
    %537 = tpu.iota {dimensions = array<i32: 0>} : vector<2x16xi32>
    %c1_i32 = arith.constant 1 : i32
    %538 = vector.broadcast %c1_i32 : i32 to vector<2x16xi32>
    %539 = arith.addi %537, %538 : vector<2x16xi32>
    %c8_i32_179 = arith.constant 8 : i32
    %540 = vector.broadcast %c8_i32_179 : i32 to vector<2x16xi32>
    %541 = arith.muli %539, %540 : vector<2x16xi32>
    %c1_i32_180 = arith.constant 1 : i32
    %542 = vector.broadcast %c1_i32_180 : i32 to vector<2x16xi32>
    %543 = arith.subi %541, %542 : vector<2x16xi32>
    %544 = arith.cmpi eq, %536, %543 : vector<2x16xi32>
    %545 = arith.extui %544 : vector<2x16xi1> to vector<2x16xi32>
    %546 = arith.sitofp %545 : vector<2x16xi32> to vector<2x16xf32>
    %cst_181 = arith.constant dense<0.000000e+00> : vector<2x128xf32>
    %547 = tpu.matmul %546, %535, %cst_181 {dimension_numbers = #tpu.dot_dimension_numbers<[1], [0], [0], [1], [0, 0, 1, 1], [], []>} : vector<2x16xf32>, vector<16x128xf32>, vector<2x128xf32> -> vector<2x128xf32>
    %c0_182 = arith.constant 0 : index
    %c0_183 = arith.constant 0 : index
    %548 = vector.load %arg21[%c0_182, %c0_183] : memref<128x128xf32, #tpu.memory_space<vmem>>, vector<128x128xf32>
    %cst_184 = arith.constant dense<0.000000e+00> : vector<2x128xf32>
    %549 = tpu.matmul %547, %548, %cst_184 {dimension_numbers = #tpu.dot_dimension_numbers<[1], [0], [0], [1], [0, 0, 1, 1], [], []>} : vector<2x128xf32>, vector<128x128xf32>, vector<2x128xf32> -> vector<2x128xf32>
    %c0_185 = arith.constant 0 : index
    %c0_186 = arith.constant 0 : index
    %550 = vector.load %arg23[%c0_185, %c0_186] : memref<3x128xf32, #tpu.memory_space<vmem>>, vector<1x128xf32>
    %551 = vector.shape_cast %550 : vector<1x128xf32> to vector<128xf32>
    %552 = vector.shape_cast %551 : vector<128xf32> to vector<1x128xf32>
    %553 = vector.broadcast %552 : vector<1x128xf32> to vector<2x128xf32>
    %554 = arith.addf %549, %553 : vector<2x128xf32>
    %cst_187 = arith.constant 0.000000e+00 : f32
    %555 = vector.broadcast %cst_187 : f32 to vector<2x128xf32>
    %556 = arith.maximumf %554, %555 : vector<2x128xf32>
    %c0_188 = arith.constant 0 : index
    %c0_189 = arith.constant 0 : index
    %557 = vector.load %arg24[%c0_188, %c0_189] : memref<3x128xf32, #tpu.memory_space<vmem>>, vector<1x128xf32>
    %558 = vector.shape_cast %557 : vector<1x128xf32> to vector<128xf32>
    %c0_190 = arith.constant 0 : index
    %c0_191 = arith.constant 0 : index
    %559 = vector.load %arg25[%c0_190, %c0_191] : memref<3x128xf32, #tpu.memory_space<vmem>>, vector<1x128xf32>
    %560 = vector.shape_cast %559 : vector<1x128xf32> to vector<128xf32>
    %561 = tpu.iota {dimensions = array<i32: 1>} : vector<2x128xi32>
    %c32_i32_192 = arith.constant 32 : i32
    %562 = vector.broadcast %c32_i32_192 : i32 to vector<2x128xi32>
    %563 = arith.cmpi slt, %561, %562 : vector<2x128xi32>
    %564 = arith.extui %563 : vector<2x128xi1> to vector<2x128xi32>
    %565 = arith.sitofp %564 : vector<2x128xi32> to vector<2x128xf32>
    %cst_193 = arith.constant dense<0.000000e+00> : vector<2xf32>
    %566 = vector.multi_reduction <add>, %556, %cst_193 [1] : vector<2x128xf32> to vector<2xf32>
    %567 = vector.shape_cast %566 : vector<2xf32> to vector<2x1xf32>
    %cst_194 = arith.constant 3.125000e-02 : f32
    %568 = vector.broadcast %cst_194 : f32 to vector<2x1xf32>
    %569 = arith.mulf %567, %568 : vector<2x1xf32>
    %570 = vector.broadcast %569 : vector<2x1xf32> to vector<2x128xf32>
    %571 = arith.subf %556, %570 : vector<2x128xf32>
    %572 = arith.mulf %571, %565 : vector<2x128xf32>
    %573 = arith.mulf %572, %572 : vector<2x128xf32>
    %cst_195 = arith.constant dense<0.000000e+00> : vector<2xf32>
    %574 = vector.multi_reduction <add>, %573, %cst_195 [1] : vector<2x128xf32> to vector<2xf32>
    %575 = vector.shape_cast %574 : vector<2xf32> to vector<2x1xf32>
    %cst_196 = arith.constant 3.125000e-02 : f32
    %576 = vector.broadcast %cst_196 : f32 to vector<2x1xf32>
    %577 = arith.mulf %575, %576 : vector<2x1xf32>
    %cst_197 = arith.constant 9.99999974E-6 : f32
    %578 = vector.broadcast %cst_197 : f32 to vector<2x1xf32>
    %579 = arith.addf %577, %578 : vector<2x1xf32>
    %580 = math.rsqrt %579 : vector<2x1xf32>
    %581 = vector.broadcast %580 : vector<2x1xf32> to vector<2x128xf32>
    %582 = arith.mulf %572, %581 : vector<2x128xf32>
    %583 = vector.shape_cast %558 : vector<128xf32> to vector<1x128xf32>
    %584 = vector.broadcast %583 : vector<1x128xf32> to vector<2x128xf32>
    %585 = arith.mulf %582, %584 : vector<2x128xf32>
    %586 = vector.shape_cast %560 : vector<128xf32> to vector<1x128xf32>
    %587 = vector.broadcast %586 : vector<1x128xf32> to vector<2x128xf32>
    %588 = arith.addf %585, %587 : vector<2x128xf32>
    %c0_198 = arith.constant 0 : index
    %c0_199 = arith.constant 0 : index
    %c0_200 = arith.constant 0 : index
    %589 = vector.load %arg22[%c0_198, %c0_199, %c0_200] : memref<2x128x128xf32, #tpu.memory_space<vmem>>, vector<1x128x128xf32>
    %590 = vector.shape_cast %589 : vector<1x128x128xf32> to vector<128x128xf32>
    %cst_201 = arith.constant dense<0.000000e+00> : vector<2x128xf32>
    %591 = tpu.matmul %588, %590, %cst_201 {dimension_numbers = #tpu.dot_dimension_numbers<[1], [0], [0], [1], [0, 0, 1, 1], [], []>} : vector<2x128xf32>, vector<128x128xf32>, vector<2x128xf32> -> vector<2x128xf32>
    %c1_202 = arith.constant 1 : index
    %c0_203 = arith.constant 0 : index
    %592 = vector.load %arg23[%c1_202, %c0_203] : memref<3x128xf32, #tpu.memory_space<vmem>>, vector<1x128xf32>
    %593 = vector.shape_cast %592 : vector<1x128xf32> to vector<128xf32>
    %594 = vector.shape_cast %593 : vector<128xf32> to vector<1x128xf32>
    %595 = vector.broadcast %594 : vector<1x128xf32> to vector<2x128xf32>
    %596 = arith.addf %591, %595 : vector<2x128xf32>
    %cst_204 = arith.constant 0.000000e+00 : f32
    %597 = vector.broadcast %cst_204 : f32 to vector<2x128xf32>
    %598 = arith.maximumf %596, %597 : vector<2x128xf32>
    %c1_205 = arith.constant 1 : index
    %c0_206 = arith.constant 0 : index
    %599 = vector.load %arg24[%c1_205, %c0_206] : memref<3x128xf32, #tpu.memory_space<vmem>>, vector<1x128xf32>
    %600 = vector.shape_cast %599 : vector<1x128xf32> to vector<128xf32>
    %c1_207 = arith.constant 1 : index
    %c0_208 = arith.constant 0 : index
    %601 = vector.load %arg25[%c1_207, %c0_208] : memref<3x128xf32, #tpu.memory_space<vmem>>, vector<1x128xf32>
    %602 = vector.shape_cast %601 : vector<1x128xf32> to vector<128xf32>
    %603 = tpu.iota {dimensions = array<i32: 1>} : vector<2x128xi32>
    %c32_i32_209 = arith.constant 32 : i32
    %604 = vector.broadcast %c32_i32_209 : i32 to vector<2x128xi32>
    %605 = arith.cmpi slt, %603, %604 : vector<2x128xi32>
    %606 = arith.extui %605 : vector<2x128xi1> to vector<2x128xi32>
    %607 = arith.sitofp %606 : vector<2x128xi32> to vector<2x128xf32>
    %cst_210 = arith.constant dense<0.000000e+00> : vector<2xf32>
    %608 = vector.multi_reduction <add>, %598, %cst_210 [1] : vector<2x128xf32> to vector<2xf32>
    %609 = vector.shape_cast %608 : vector<2xf32> to vector<2x1xf32>
    %cst_211 = arith.constant 3.125000e-02 : f32
    %610 = vector.broadcast %cst_211 : f32 to vector<2x1xf32>
    %611 = arith.mulf %609, %610 : vector<2x1xf32>
    %612 = vector.broadcast %611 : vector<2x1xf32> to vector<2x128xf32>
    %613 = arith.subf %598, %612 : vector<2x128xf32>
    %614 = arith.mulf %613, %607 : vector<2x128xf32>
    %615 = arith.mulf %614, %614 : vector<2x128xf32>
    %cst_212 = arith.constant dense<0.000000e+00> : vector<2xf32>
    %616 = vector.multi_reduction <add>, %615, %cst_212 [1] : vector<2x128xf32> to vector<2xf32>
    %617 = vector.shape_cast %616 : vector<2xf32> to vector<2x1xf32>
    %cst_213 = arith.constant 3.125000e-02 : f32
    %618 = vector.broadcast %cst_213 : f32 to vector<2x1xf32>
    %619 = arith.mulf %617, %618 : vector<2x1xf32>
    %cst_214 = arith.constant 9.99999974E-6 : f32
    %620 = vector.broadcast %cst_214 : f32 to vector<2x1xf32>
    %621 = arith.addf %619, %620 : vector<2x1xf32>
    %622 = math.rsqrt %621 : vector<2x1xf32>
    %623 = vector.broadcast %622 : vector<2x1xf32> to vector<2x128xf32>
    %624 = arith.mulf %614, %623 : vector<2x128xf32>
    %625 = vector.shape_cast %600 : vector<128xf32> to vector<1x128xf32>
    %626 = vector.broadcast %625 : vector<1x128xf32> to vector<2x128xf32>
    %627 = arith.mulf %624, %626 : vector<2x128xf32>
    %628 = vector.shape_cast %602 : vector<128xf32> to vector<1x128xf32>
    %629 = vector.broadcast %628 : vector<1x128xf32> to vector<2x128xf32>
    %630 = arith.addf %627, %629 : vector<2x128xf32>
    %c1_215 = arith.constant 1 : index
    %c0_216 = arith.constant 0 : index
    %c0_217 = arith.constant 0 : index
    %631 = vector.load %arg22[%c1_215, %c0_216, %c0_217] : memref<2x128x128xf32, #tpu.memory_space<vmem>>, vector<1x128x128xf32>
    %632 = vector.shape_cast %631 : vector<1x128x128xf32> to vector<128x128xf32>
    %cst_218 = arith.constant dense<0.000000e+00> : vector<2x128xf32>
    %633 = tpu.matmul %630, %632, %cst_218 {dimension_numbers = #tpu.dot_dimension_numbers<[1], [0], [0], [1], [0, 0, 1, 1], [], []>} : vector<2x128xf32>, vector<128x128xf32>, vector<2x128xf32> -> vector<2x128xf32>
    %c2_219 = arith.constant 2 : index
    %c0_220 = arith.constant 0 : index
    %634 = vector.load %arg23[%c2_219, %c0_220] : memref<3x128xf32, #tpu.memory_space<vmem>>, vector<1x128xf32>
    %635 = vector.shape_cast %634 : vector<1x128xf32> to vector<128xf32>
    %636 = vector.shape_cast %635 : vector<128xf32> to vector<1x128xf32>
    %637 = vector.broadcast %636 : vector<1x128xf32> to vector<2x128xf32>
    %638 = arith.addf %633, %637 : vector<2x128xf32>
    %cst_221 = arith.constant 0.000000e+00 : f32
    %639 = vector.broadcast %cst_221 : f32 to vector<2x128xf32>
    %640 = arith.maximumf %638, %639 : vector<2x128xf32>
    %c2_222 = arith.constant 2 : index
    %c0_223 = arith.constant 0 : index
    %641 = vector.load %arg24[%c2_222, %c0_223] : memref<3x128xf32, #tpu.memory_space<vmem>>, vector<1x128xf32>
    %642 = vector.shape_cast %641 : vector<1x128xf32> to vector<128xf32>
    %c2_224 = arith.constant 2 : index
    %c0_225 = arith.constant 0 : index
    %643 = vector.load %arg25[%c2_224, %c0_225] : memref<3x128xf32, #tpu.memory_space<vmem>>, vector<1x128xf32>
    %644 = vector.shape_cast %643 : vector<1x128xf32> to vector<128xf32>
    %645 = tpu.iota {dimensions = array<i32: 1>} : vector<2x128xi32>
    %c32_i32_226 = arith.constant 32 : i32
    %646 = vector.broadcast %c32_i32_226 : i32 to vector<2x128xi32>
    %647 = arith.cmpi slt, %645, %646 : vector<2x128xi32>
    %648 = arith.extui %647 : vector<2x128xi1> to vector<2x128xi32>
    %649 = arith.sitofp %648 : vector<2x128xi32> to vector<2x128xf32>
    %cst_227 = arith.constant dense<0.000000e+00> : vector<2xf32>
    %650 = vector.multi_reduction <add>, %640, %cst_227 [1] : vector<2x128xf32> to vector<2xf32>
    %651 = vector.shape_cast %650 : vector<2xf32> to vector<2x1xf32>
    %cst_228 = arith.constant 3.125000e-02 : f32
    %652 = vector.broadcast %cst_228 : f32 to vector<2x1xf32>
    %653 = arith.mulf %651, %652 : vector<2x1xf32>
    %654 = vector.broadcast %653 : vector<2x1xf32> to vector<2x128xf32>
    %655 = arith.subf %640, %654 : vector<2x128xf32>
    %656 = arith.mulf %655, %649 : vector<2x128xf32>
    %657 = arith.mulf %656, %656 : vector<2x128xf32>
    %cst_229 = arith.constant dense<0.000000e+00> : vector<2xf32>
    %658 = vector.multi_reduction <add>, %657, %cst_229 [1] : vector<2x128xf32> to vector<2xf32>
    %659 = vector.shape_cast %658 : vector<2xf32> to vector<2x1xf32>
    %cst_230 = arith.constant 3.125000e-02 : f32
    %660 = vector.broadcast %cst_230 : f32 to vector<2x1xf32>
    %661 = arith.mulf %659, %660 : vector<2x1xf32>
    %cst_231 = arith.constant 9.99999974E-6 : f32
    %662 = vector.broadcast %cst_231 : f32 to vector<2x1xf32>
    %663 = arith.addf %661, %662 : vector<2x1xf32>
    %664 = math.rsqrt %663 : vector<2x1xf32>
    %665 = vector.broadcast %664 : vector<2x1xf32> to vector<2x128xf32>
    %666 = arith.mulf %656, %665 : vector<2x128xf32>
    %667 = vector.shape_cast %642 : vector<128xf32> to vector<1x128xf32>
    %668 = vector.broadcast %667 : vector<1x128xf32> to vector<2x128xf32>
    %669 = arith.mulf %666, %668 : vector<2x128xf32>
    %670 = vector.shape_cast %644 : vector<128xf32> to vector<1x128xf32>
    %671 = vector.broadcast %670 : vector<1x128xf32> to vector<2x128xf32>
    %672 = arith.addf %669, %671 : vector<2x128xf32>
    %c0_232 = arith.constant 0 : index
    %c0_233 = arith.constant 0 : index
    %673 = vector.load %arg26[%c0_232, %c0_233] : memref<128x256xf32, #tpu.memory_space<vmem>>, vector<128x256xf32>
    %cst_234 = arith.constant dense<0.000000e+00> : vector<2x256xf32>
    %674 = tpu.matmul %672, %673, %cst_234 {dimension_numbers = #tpu.dot_dimension_numbers<[1], [0], [0], [1], [0, 0, 1, 1], [], []>} : vector<2x128xf32>, vector<128x256xf32>, vector<2x256xf32> -> vector<2x256xf32>
    %c0_235 = arith.constant 0 : index
    %c0_236 = arith.constant 0 : index
    %675 = vector.load %arg27[%c0_235, %c0_236] : memref<1x256xf32, #tpu.memory_space<vmem>>, vector<1x256xf32>
    %676 = vector.shape_cast %675 : vector<1x256xf32> to vector<256xf32>
    %677 = vector.shape_cast %676 : vector<256xf32> to vector<1x256xf32>
    %678 = vector.broadcast %677 : vector<1x256xf32> to vector<2x256xf32>
    %679 = arith.addf %674, %678 : vector<2x256xf32>
    %680 = vector.extract_strided_slice %679 {offsets = [0, 0], sizes = [2, 128], strides = [1, 1]} : vector<2x256xf32> to vector<2x128xf32>
    %cst_237 = arith.constant 0.000000e+00 : f32
    %681 = vector.broadcast %cst_237 : f32 to vector<2x128xf32>
    %682 = arith.subf %681, %680 : vector<2x128xf32>
    %683 = math.exp %682 : vector<2x128xf32>
    %cst_238 = arith.constant 1.000000e+00 : f32
    %684 = vector.broadcast %cst_238 : f32 to vector<2x128xf32>
    %685 = arith.addf %684, %683 : vector<2x128xf32>
    %686 = tpu.reciprocal %685 {approx = true} : vector<2x128xf32> -> vector<2x128xf32>
    %687 = vector.extract_strided_slice %679 {offsets = [0, 128], sizes = [2, 128], strides = [1, 1]} : vector<2x256xf32> to vector<2x128xf32>
    %c0_239 = arith.constant 0 : index
    %c0_240 = arith.constant 0 : index
    %688 = vector.load %arg28[%c0_239, %c0_240] : memref<128x128xf32, #tpu.memory_space<vmem>>, vector<128x128xf32>
    %cst_241 = arith.constant dense<0.000000e+00> : vector<2x128xf32>
    %689 = tpu.matmul %547, %688, %cst_241 {dimension_numbers = #tpu.dot_dimension_numbers<[1], [0], [0], [1], [0, 0, 1, 1], [], []>} : vector<2x128xf32>, vector<128x128xf32>, vector<2x128xf32> -> vector<2x128xf32>
    %c0_242 = arith.constant 0 : index
    %c0_243 = arith.constant 0 : index
    %690 = vector.load %arg29[%c0_242, %c0_243] : memref<1x128xf32, #tpu.memory_space<vmem>>, vector<1x128xf32>
    %691 = vector.shape_cast %690 : vector<1x128xf32> to vector<128xf32>
    %692 = vector.shape_cast %691 : vector<128xf32> to vector<1x128xf32>
    %693 = vector.broadcast %692 : vector<1x128xf32> to vector<2x128xf32>
    %694 = arith.addf %689, %693 : vector<2x128xf32>
    %695 = arith.mulf %686, %687 : vector<2x128xf32>
    %696 = arith.addf %694, %695 : vector<2x128xf32>
    %c0_244 = arith.constant 0 : index
    %c0_245 = arith.constant 0 : index
    %697 = vector.load %arg30[%c0_244, %c0_245] : memref<128x128xf32, #tpu.memory_space<vmem>>, vector<128x128xf32>
    %cst_246 = arith.constant dense<0.000000e+00> : vector<2x128xf32>
    %698 = tpu.matmul %696, %697, %cst_246 {dimension_numbers = #tpu.dot_dimension_numbers<[1], [0], [0], [1], [0, 0, 1, 1], [], []>} : vector<2x128xf32>, vector<128x128xf32>, vector<2x128xf32> -> vector<2x128xf32>
    %c0_247 = arith.constant 0 : index
    %c0_248 = arith.constant 0 : index
    %699 = vector.load %arg31[%c0_247, %c0_248] : memref<1x128xf32, #tpu.memory_space<vmem>>, vector<1x128xf32>
    %700 = vector.shape_cast %699 : vector<1x128xf32> to vector<128xf32>
    %701 = vector.shape_cast %700 : vector<128xf32> to vector<1x128xf32>
    %702 = vector.broadcast %701 : vector<1x128xf32> to vector<2x128xf32>
    %703 = arith.addf %698, %702 : vector<2x128xf32>
    %c0_249 = arith.constant 0 : index
    %c0_250 = arith.constant 0 : index
    %704 = vector.load %arg32[%c0_249, %c0_250] : memref<2x128xf32, #tpu.memory_space<vmem>>, vector<2x128xf32>
    tpu.vector_store %arg32[%c0_249, %c0_250], %703 {strides = array<i32>} : memref<2x128xf32, #tpu.memory_space<vmem>>, vector<2x128xf32>,
    return
  }
  func.func @transform_0(%arg0: i32) -> (i32, i32) {
    %c0_i32 = arith.constant 0 : i32
    %c0_i32_0 = arith.constant 0 : i32
    return %arg0, %c0_i32 : i32, i32
  }
  func.func @transform_1(%arg0: i32) -> (i32, i32) {
    %c0_i32 = arith.constant 0 : i32
    %c0_i32_0 = arith.constant 0 : i32
    %c0_i32_1 = arith.constant 0 : i32
    return %c0_i32, %c0_i32_0 : i32, i32
  }
  func.func @transform_2(%arg0: i32) -> (i32, i32, i32) {
    %c0_i32 = arith.constant 0 : i32
    %c0_i32_0 = arith.constant 0 : i32
    %c0_i32_1 = arith.constant 0 : i32
    %c0_i32_2 = arith.constant 0 : i32
    return %c0_i32, %c0_i32_0, %c0_i32_1 : i32, i32, i32
  }
  func.func @transform_3(%arg0: i32) -> (i32, i32) {
    %c0_i32 = arith.constant 0 : i32
    %c0_i32_0 = arith.constant 0 : i32
    %c0_i32_1 = arith.constant 0 : i32
    return %c0_i32, %c0_i32_0 : i32, i32
  }
  func.func @transform_4(%arg0: i32) -> (i32, i32) {
    %c0_i32 = arith.constant 0 : i32
    %c0_i32_0 = arith.constant 0 : i32
    %c0_i32_1 = arith.constant 0 : i32
    return %c0_i32, %c0_i32_0 : i32, i32
  }
  func.func @transform_5(%arg0: i32) -> (i32, i32) {
    %c0_i32 = arith.constant 0 : i32
    %c0_i32_0 = arith.constant 0 : i32
    %c0_i32_1 = arith.constant 0 : i32
    return %c0_i32, %c0_i32_0 : i32, i32
  }
  func.func @transform_6(%arg0: i32) -> (i32, i32) {
    %c0_i32 = arith.constant 0 : i32
    %c0_i32_0 = arith.constant 0 : i32
    %c0_i32_1 = arith.constant 0 : i32
    return %c0_i32, %c0_i32_0 : i32, i32
  }
  func.func @transform_7(%arg0: i32) -> (i32, i32) {
    %c0_i32 = arith.constant 0 : i32
    %c0_i32_0 = arith.constant 0 : i32
    %c0_i32_1 = arith.constant 0 : i32
    return %c0_i32, %c0_i32_0 : i32, i32
  }
  func.func @transform_8(%arg0: i32) -> (i32, i32) {
    %c0_i32 = arith.constant 0 : i32
    %c0_i32_0 = arith.constant 0 : i32
    %c0_i32_1 = arith.constant 0 : i32
    return %c0_i32, %c0_i32_0 : i32, i32
  }
  func.func @transform_9(%arg0: i32) -> (i32, i32) {
    %c0_i32 = arith.constant 0 : i32
    %c0_i32_0 = arith.constant 0 : i32
    %c0_i32_1 = arith.constant 0 : i32
    return %c0_i32, %c0_i32_0 : i32, i32
  }
  func.func @transform_10(%arg0: i32) -> (i32, i32, i32) {
    %c0_i32 = arith.constant 0 : i32
    %c0_i32_0 = arith.constant 0 : i32
    %c0_i32_1 = arith.constant 0 : i32
    %c0_i32_2 = arith.constant 0 : i32
    return %c0_i32, %c0_i32_0, %c0_i32_1 : i32, i32, i32
  }
  func.func @transform_11(%arg0: i32) -> (i32, i32, i32) {
    %c0_i32 = arith.constant 0 : i32
    %c0_i32_0 = arith.constant 0 : i32
    %c0_i32_1 = arith.constant 0 : i32
    %c0_i32_2 = arith.constant 0 : i32
    return %c0_i32, %c0_i32_0, %c0_i32_1 : i32, i32, i32
  }
  func.func @transform_12(%arg0: i32) -> (i32, i32, i32) {
    %c0_i32 = arith.constant 0 : i32
    %c0_i32_0 = arith.constant 0 : i32
    %c0_i32_1 = arith.constant 0 : i32
    %c0_i32_2 = arith.constant 0 : i32
    return %c0_i32, %c0_i32_0, %c0_i32_1 : i32, i32, i32
  }
  func.func @transform_13(%arg0: i32) -> (i32, i32, i32) {
    %c0_i32 = arith.constant 0 : i32
    %c0_i32_0 = arith.constant 0 : i32
    %c0_i32_1 = arith.constant 0 : i32
    %c0_i32_2 = arith.constant 0 : i32
    return %c0_i32, %c0_i32_0, %c0_i32_1 : i32, i32, i32
  }
  func.func @transform_14(%arg0: i32) -> (i32, i32, i32) {
    %c0_i32 = arith.constant 0 : i32
    %c0_i32_0 = arith.constant 0 : i32
    %c0_i32_1 = arith.constant 0 : i32
    %c0_i32_2 = arith.constant 0 : i32
    return %c0_i32, %c0_i32_0, %c0_i32_1 : i32, i32, i32
  }
  func.func @transform_15(%arg0: i32) -> (i32, i32, i32) {
    %c0_i32 = arith.constant 0 : i32
    %c0_i32_0 = arith.constant 0 : i32
    %c0_i32_1 = arith.constant 0 : i32
    %c0_i32_2 = arith.constant 0 : i32
    return %c0_i32, %c0_i32_0, %c0_i32_1 : i32, i32, i32
  }
  func.func @transform_16(%arg0: i32) -> (i32, i32, i32) {
    %c0_i32 = arith.constant 0 : i32
    %c0_i32_0 = arith.constant 0 : i32
    %c0_i32_1 = arith.constant 0 : i32
    %c0_i32_2 = arith.constant 0 : i32
    return %c0_i32, %c0_i32_0, %c0_i32_1 : i32, i32, i32
  }
  func.func @transform_17(%arg0: i32) -> (i32, i32, i32) {
    %c0_i32 = arith.constant 0 : i32
    %c0_i32_0 = arith.constant 0 : i32
    %c0_i32_1 = arith.constant 0 : i32
    %c0_i32_2 = arith.constant 0 : i32
    return %c0_i32, %c0_i32_0, %c0_i32_1 : i32, i32, i32
  }
  func.func @transform_18(%arg0: i32) -> (i32, i32, i32) {
    %c0_i32 = arith.constant 0 : i32
    %c0_i32_0 = arith.constant 0 : i32
    %c0_i32_1 = arith.constant 0 : i32
    %c0_i32_2 = arith.constant 0 : i32
    return %c0_i32, %c0_i32_0, %c0_i32_1 : i32, i32, i32
  }
  func.func @transform_19(%arg0: i32) -> (i32, i32, i32) {
    %c0_i32 = arith.constant 0 : i32
    %c0_i32_0 = arith.constant 0 : i32
    %c0_i32_1 = arith.constant 0 : i32
    %c0_i32_2 = arith.constant 0 : i32
    return %c0_i32, %c0_i32_0, %c0_i32_1 : i32, i32, i32
  }
  func.func @transform_20(%arg0: i32) -> (i32, i32) {
    %c0_i32 = arith.constant 0 : i32
    %c0_i32_0 = arith.constant 0 : i32
    %c0_i32_1 = arith.constant 0 : i32
    return %c0_i32, %c0_i32_0 : i32, i32
  }
  func.func @transform_21(%arg0: i32) -> (i32, i32, i32) {
    %c0_i32 = arith.constant 0 : i32
    %c0_i32_0 = arith.constant 0 : i32
    %c0_i32_1 = arith.constant 0 : i32
    %c0_i32_2 = arith.constant 0 : i32
    return %c0_i32, %c0_i32_0, %c0_i32_1 : i32, i32, i32
  }
  func.func @transform_22(%arg0: i32) -> (i32, i32) {
    %c0_i32 = arith.constant 0 : i32
    %c0_i32_0 = arith.constant 0 : i32
    %c0_i32_1 = arith.constant 0 : i32
    return %c0_i32, %c0_i32_0 : i32, i32
  }
  func.func @transform_23(%arg0: i32) -> (i32, i32) {
    %c0_i32 = arith.constant 0 : i32
    %c0_i32_0 = arith.constant 0 : i32
    %c0_i32_1 = arith.constant 0 : i32
    return %c0_i32, %c0_i32_0 : i32, i32
  }
  func.func @transform_24(%arg0: i32) -> (i32, i32) {
    %c0_i32 = arith.constant 0 : i32
    %c0_i32_0 = arith.constant 0 : i32
    %c0_i32_1 = arith.constant 0 : i32
    return %c0_i32, %c0_i32_0 : i32, i32
  }
  func.func @transform_25(%arg0: i32) -> (i32, i32) {
    %c0_i32 = arith.constant 0 : i32
    %c0_i32_0 = arith.constant 0 : i32
    %c0_i32_1 = arith.constant 0 : i32
    return %c0_i32, %c0_i32_0 : i32, i32
  }
  func.func @transform_26(%arg0: i32) -> (i32, i32) {
    %c0_i32 = arith.constant 0 : i32
    %c0_i32_0 = arith.constant 0 : i32
    %c0_i32_1 = arith.constant 0 : i32
    return %c0_i32, %c0_i32_0 : i32, i32
  }
  func.func @transform_27(%arg0: i32) -> (i32, i32) {
    %c0_i32 = arith.constant 0 : i32
    %c0_i32_0 = arith.constant 0 : i32
    %c0_i32_1 = arith.constant 0 : i32
    return %c0_i32, %c0_i32_0 : i32, i32
  }
  func.func @transform_28(%arg0: i32) -> (i32, i32) {
    %c0_i32 = arith.constant 0 : i32
    %c0_i32_0 = arith.constant 0 : i32
    %c0_i32_1 = arith.constant 0 : i32
    return %c0_i32, %c0_i32_0 : i32, i32
  }
  func.func @transform_29(%arg0: i32) -> (i32, i32) {
    %c0_i32 = arith.constant 0 : i32
    %c0_i32_0 = arith.constant 0 : i32
    %c0_i32_1 = arith.constant 0 : i32
    return %c0_i32, %c0_i32_0 : i32, i32
  }
  func.func @transform_30(%arg0: i32) -> (i32, i32) {
    %c0_i32 = arith.constant 0 : i32
    %c0_i32_0 = arith.constant 0 : i32
    %c0_i32_1 = arith.constant 0 : i32
    return %c0_i32, %c0_i32_0 : i32, i32
  }
  func.func @transform_31(%arg0: i32) -> (i32, i32) {
    %c0_i32 = arith.constant 0 : i32
    %c0_i32_0 = arith.constant 0 : i32
    return %arg0, %c0_i32 : i32, i32
  }
}

</mosaic_0001>

<bundles_post_ra>
// kernel: tft_forward.1
= control target key start
LH: loop header
LB: loop body
LE: loop exit
PB: predicated region body
PF: predicated region fallthrough
CT: control target
= control target key end

     0   :  { %s6651_s6 = smov 1   ;;  %s6652_s10 = smov 2   ;;  %s7711_s0 = inlined_call_operand.smem [shape: u32[32], index: -1, kind: input, shape index: {}] }
   0x1   :  { %s6715_s5 = sld [smem:[%s7711_s0]]   ;;  %s6653_s14 = smov 3  }
   0x2   :  { %s6720_s9 = sld [smem:[%s7711_s0 + %s6651_s6]]   ;;  %s6654_s18 = smov 4  }
   0x3   :  { %s6725_s13 = sld [smem:[%s7711_s0 + %s6652_s10]]   ;;  %s6655_s22 = smov 5  }
   0x4   :  { %s6730_s17 = sld [smem:[%s7711_s0 + %s6653_s14]]   ;;  %s6656_s26 = smov 6  }
   0x5   :  { %s6735_s21 = sld [smem:[%s7711_s0 + %s6654_s18]]   ;;  %s6657_s30 = smov 7  }
   0x6   :  { %s6740_s25 = sld [smem:[%s7711_s0 + %s6655_s22]]   ;;  %s6658_s4 = smov 8  }
   0x7   :  { %s6745_s29 = sld [smem:[%s7711_s0 + %s6656_s26]]   ;;  %s6659_s10 = smov 9  }
   0x8   :  { %s6750_s3 = sld [smem:[%s7711_s0 + %s6657_s30]]   ;;  %s6660_s15 = smov 10  }
   0x9   :  { %s6755_s8 = sld [smem:[%s7711_s0 + %s6658_s4]]   ;;  %s6661_s20 = smov 11  }
   0xa   :  { %7725 = sst [smem:[#allocation36_spill]] %s6730_s17  ;;  %s6662_s26 = smov 12  }
   0xb   :  { %7726 = sst [smem:[#allocation37_spill]] %s6735_s21  ;;  %s6663_s1 = smov 13  }
   0xc   :  { %s6760_s14 = sld [smem:[%s7711_s0 + %s6659_s10]]   ;;  %s6664_s7 = smov 14  }
   0xd   :  { %s6765_s19 = sld [smem:[%s7711_s0 + %s6660_s15]]   ;;  %s6665_s15 = smov 15  }
   0xe   :  { %s6770_s24 = sld [smem:[%s7711_s0 + %s6661_s20]]   ;;  %s6666_s22 = smov 16  }
   0xf   :  { %7727 = sst [smem:[#allocation38_spill]] %s6755_s8  ;;  %s6667_s28 = smov 17  }
  0x10   :  { %s6775_s30 = sld [smem:[%s7711_s0 + %s6662_s26]]  }
  0x11   :  { %s6780_s6 = sld [smem:[%s7711_s0 + %s6663_s1]]  }
  0x12   :  { %s6785_s12 = sld [smem:[%s7711_s0 + %s6664_s7]]   ;;  %s6668_s7 = smov 18  }
  0x13   :  { %s6790_s20 = sld [smem:[%s7711_s0 + %s6665_s15]]   ;;  %s6669_s15 = smov 19  }
  0x14   :  { %7728 = sst [smem:[#allocation39_spill]] %s6770_s24 }
  0x15   :  { %s6795_s27 = sld [smem:[%s7711_s0 + %s6666_s22]]   ;;  %s6670_s22 = smov 20  }
  0x16   :  { %s6800_s4 = sld [smem:[%s7711_s0 + %s6667_s28]]   ;;  %s6671_s28 = smov 21  }
  0x17   :  { %7729 = sst [smem:[#allocation40_spill]] %s6780_s6 }
  0x18   :  { %7730 = sst [smem:[#allocation41_spill]] %s6785_s12 }
  0x19   :  { %7731 = sst [smem:[#allocation42_spill]] %s6790_s20 }
  0x1a   :  { %s6805_s6 = sld [smem:[%s7711_s0 + %s6668_s7]]   ;;  %s6672_s7 = smov 22  }
  0x1b   :  { %s6810_s24 = sld [smem:[%s7711_s0 + %s6669_s15]]   ;;  %s6673_s15 = smov 23  }
  0x1c   :  { %7732 = sst [smem:[#allocation43_spill]] %s6800_s4 }
  0x1d   :  { %s6815_s20 = sld [smem:[%s7711_s0 + %s6670_s22]]   ;;  %s6674_s22 = smov 24  }
  0x1e   :  { %s6820_s4 = sld [smem:[%s7711_s0 + %s6671_s28]]   ;;  %s6675_s28 = smov 25  }
  0x1f   :  { %s6825_s12 = sld [smem:[%s7711_s0 + %s6672_s7]]   ;;  %s6676_s7 = smov 26  }
  0x20   :  { %s6835_s8 = sld [smem:[%s7711_s0 + %s6674_s22]]   ;;  %s6678_s22 = smov 28  }
  0x21   :  { %7733 = sst [smem:[#allocation44_spill]] %s6810_s24 }
  0x22   :  { %s6830_s24 = sld [smem:[%s7711_s0 + %s6673_s15]]   ;;  %s6677_s15 = smov 27  }
  0x23   :  { %s6840_s21 = sld [smem:[%s7711_s0 + %s6675_s28]]   ;;  %s6679_s28 = smov 29  }
  0x24   :  { %s6860_s17 = sld [smem:[%s7711_s0 + %s6679_s28]]  }
  0x25   :  { %7734 = sst [smem:[#allocation45_spill]] %s6825_s12 }
  0x26   :  { %7736 = sst [smem:[#allocation47_spill]] %s6835_s8 }
  0x27   :  { %s6845_s12 = sld [smem:[%s7711_s0 + %s6676_s7]]   ;;  %s6680_s7 = smov 30  }
  0x28   :  { %7735 = sst [smem:[#allocation46_spill]] %s6830_s24 }
  0x29   :  { %s6850_s24 = sld [smem:[%s7711_s0 + %s6677_s15]]   ;;  %s6681_s15 = smov 31  }
  0x2a   :  { %s6855_s8 = sld [smem:[%s7711_s0 + %s6678_s22]]  }
  0x2d   :  { %7737 = sst [smem:[#allocation48_spill]] %s6845_s12 }
  0x2e   :  { %s6865_s12 = sld [smem:[%s7711_s0 + %s6680_s7]]  }
  0x2f   :  { %7738 = sst [smem:[#allocation49_spill]] %s6850_s24 }
  0x30   :  { %s6870_s24 = sld [smem:[%s7711_s0 + %s6681_s15]]  }
  0x31   :  { %68 = vsyncpa [#allocation3], 0 }
  0x32   :  { %69 = vsyncpa [#allocation5], 0 }
  0x33   :  { %70 = vsyncpa [#allocation8], 0 }
  0x34   :  { %71 = vsyncpa [#allocation11], 0 }
  0x35   :  { %72 = vsyncpa [#allocation14], 0 }
  0x36   :  { %73 = vsyncpa [#allocation17], 0 }
  0x37   :  { %74 = vsyncpa [#allocation20], 0 }
  0x38   :  { %75 = vsyncpa [#allocation23], 0 }
  0x39   :  { %76 = vsyncpa [#allocation26], 0  ;;  %s6682_s22 = smov [#allocation4]   ;;  %s6683_s26 = smov [#allocation7]  }
  0x3a   :  { %s94_s23 = sshll.u32 %s6682_s22, 4  ;;  %s123_s28 = sshll.u32 %s6683_s26, 4  ;;  %s95_s23 = int_to_ptr.vmem [resolvable:$true] %s94_s23  ;;  %s124_s28 = int_to_ptr.vmem [resolvable:$true] %s123_s28 }
  0x3b   :  { %s6281_s0 = scalar_lea.hbm %s6720_s9, 256 }
  0x3c   :  { %p6282_p0 = scmp.ne.s32.totalorder %s6720_s9, %s6281_s0  ;;  %p6285_p1 = scmp.lt.u32.totalorder %s6281_s0, %s6720_s9 }
  0x3e   :  { %p6287_p2 = pnand %p6285_p1, %p6282_p0 }
  0x40   :  { %6290 = shalt.err (!%p6287_p2)
}
  0x41   :  { %s6291_s1 = scalar_lea.vmem %s95_s23, 256  ;;  %p6296_p4 = scmp.lt.s32.totalorder %s95_s23, %s95_s23 }
  0x42   :  { %p6292_p3 = scmp.ne.s32.totalorder %s95_s23, %s6291_s1  ;;  %p6297_p5 = scmp.lt.s32.totalorder %s6291_s1, %s6291_s1 }
  0x44   :  { %p6298_p6 = por %p6297_p5, %p6296_p4 }
  0x46   :  { %p6299_p7 = pnand %p6298_p6, %p6292_p3 }
  0x48   :  { %6302 = shalt.err (!%p6299_p7)
}
  0x49   :  { %s6684_s2 = smov 128   ;;  %s6685_s7 = smov 8  }
  0x4a   :  { %100 = dma.hbm_to_vmem [thread:$0]  %s6720_s9, 256, %s95_s23, [#allocation5], %s6684_s2, %s6684_s2, %s6685_s7  }
  0x4b   :  { %s6303_s10 = scalar_lea.hbm %s6740_s25, 64 }
  0x4c   :  { %p6304_p8 = scmp.ne.s32.totalorder %s6740_s25, %s6303_s10  ;;  %p6307_p9 = scmp.lt.u32.totalorder %s6303_s10, %s6740_s25 }
  0x4e   :  { %p6309_p10 = pnand %p6307_p9, %p6304_p8 }
  0x50   :  { %6312 = shalt.err (!%p6309_p10)
}
  0x51   :  { %s6313_s11 = scalar_lea.vmem %s124_s28, 64  ;;  %p6318_p12 = scmp.lt.s32.totalorder %s124_s28, %s124_s28 }
  0x52   :  { %p6314_p11 = scmp.ne.s32.totalorder %s124_s28, %s6313_s11  ;;  %p6319_p13 = scmp.lt.s32.totalorder %s6313_s11, %s6313_s11 }
  0x54   :  { %p6320_p0 = por %p6319_p13, %p6318_p12 }
  0x56   :  { %p6321_p1 = pnand %p6320_p0, %p6314_p11 }
  0x58   :  { %6324 = shalt.err (!%p6321_p1)
}
  0x59   :  { %126 = dma.hbm_to_vmem [thread:$0]  %s6740_s25, 64, %s124_s28, [#allocation8]  }
  0x5a   :  { %s6686_s15 = smov [#allocation10]   ;;  %s6687_s9 = smov [#allocation13]  }
  0x5b   :  { %s145_s16 = sshll.u32 %s6686_s15, 4  ;;  %s166_s18 = sshll.u32 %s6687_s9, 4  ;;  %s146_s16 = int_to_ptr.vmem [resolvable:$true] %s145_s16  ;;  %s6883_s18 = int_to_ptr.vmem [resolvable:$true] %s166_s18 }
  0x5c   :  { %s6325_s22 = scalar_lea.hbm %s6750_s3, 32 }
  0x5d   :  { %p6326_p2 = scmp.ne.s32.totalorder %s6750_s3, %s6325_s22  ;;  %p6329_p3 = scmp.lt.u32.totalorder %s6325_s22, %s6750_s3 }
  0x5f   :  { %p6331_p4 = pnand %p6329_p3, %p6326_p2 }
  0x61   :  { %6334 = shalt.err (!%p6331_p4)
}
  0x62   :  { %s6335_s23 = scalar_lea.vmem %s146_s16, 32  ;;  %p6340_p6 = scmp.lt.s32.totalorder %s146_s16, %s146_s16 }
  0x63   :  { %p6336_p5 = scmp.ne.s32.totalorder %s146_s16, %s6335_s23  ;;  %p6341_p7 = scmp.lt.s32.totalorder %s6335_s23, %s6335_s23 }
  0x65   :  { %p6342_p8 = por %p6341_p7, %p6340_p6 }
  0x67   :  { %p6343_p9 = pnand %p6342_p8, %p6336_p5 }
  0x69   :  { %6346 = shalt.err (!%p6343_p9)
}
  0x6a   :  { %148 = dma.hbm_to_vmem [thread:$0]  %s6750_s3, 32, %s146_s16, [#allocation11]  }
  0x6b   :  { %s6347_s25 = scalar_lea.hbm %s6765_s19, 12288 }
  0x6c   :  { %p6348_p10 = scmp.ne.s32.totalorder %s6765_s19, %s6347_s25  ;;  %p6351_p11 = scmp.lt.u32.totalorder %s6347_s25, %s6765_s19 }
  0x6e   :  { %p6353_p12 = pnand %p6351_p11, %p6348_p10 }
  0x70   :  { %6356 = shalt.err (!%p6353_p12)
}
  0x71   :  { %s6357_s26 = scalar_lea.vmem %s6883_s18, 12288  ;;  %p6362_p0 = scmp.lt.s32.totalorder %s6883_s18, %s6883_s18 }
  0x72   :  { %p6358_p13 = scmp.ne.s32.totalorder %s6883_s18, %s6357_s26  ;;  %p6363_p1 = scmp.lt.s32.totalorder %s6357_s26, %s6357_s26 }
  0x74   :  { %p6364_p2 = por %p6363_p1, %p6362_p0 }
  0x76   :  { %p6365_p3 = pnand %p6364_p2, %p6358_p13 }
  0x78   :  { %6368 = shalt.err (!%p6365_p3)
}
  0x79   :  { %s6688_s28 = smov 384   ;;  %s6689_s3 = smov 24  }
  0x7a   :  { %172 = dma.hbm_to_vmem [thread:$0]  %s6765_s19, 12288, %s6883_s18, [#allocation14], %s6688_s28, %s6688_s28, %s6689_s3  }
  0x7b   :  { %s6690_s0 = smov [#allocation16]   ;;  %s6691_s10 = smov [#allocation19]  }
  0x7c   :  { %s198_s1 = sshll.u32 %s6690_s0, 4  ;;  %s226_s11 = sshll.u32 %s6691_s10, 4  ;;  %s199_s1 = int_to_ptr.vmem [resolvable:$true] %s198_s1  ;;  %s6898_s11 = int_to_ptr.vmem [resolvable:$true] %s226_s11 }
  0x7d   :  { %s6369_s15 = scalar_lea.hbm %s6795_s27, 4096 }
  0x7e   :  { %p6370_p4 = scmp.ne.s32.totalorder %s6795_s27, %s6369_s15  ;;  %p6373_p5 = scmp.lt.u32.totalorder %s6369_s15, %s6795_s27 }
  0x80   :  { %p6375_p6 = pnand %p6373_p5, %p6370_p4 }
  0x82   :  { %6378 = shalt.err (!%p6375_p6)
}
  0x83   :  { %s6379_s16 = scalar_lea.vmem %s199_s1, 4096  ;;  %p6384_p8 = scmp.lt.s32.totalorder %s199_s1, %s199_s1 }
  0x84   :  { %p6380_p7 = scmp.ne.s32.totalorder %s199_s1, %s6379_s16  ;;  %p6385_p9 = scmp.lt.s32.totalorder %s6379_s16, %s6379_s16 }
  0x86   :  { %p6386_p10 = por %p6385_p9, %p6384_p8 }
  0x88   :  { %p6387_p11 = pnand %p6386_p10, %p6380_p7 }
  0x8a   :  { %6390 = shalt.err (!%p6387_p11)
}
  0x8b   :  { %204 = dma.hbm_to_vmem [thread:$0]  %s6795_s27, 4096, %s199_s1, [#allocation17], %s6684_s2, %s6684_s2, %s6685_s7  }
  0x8c   :  { %s6391_s19 = scalar_lea.hbm %s6815_s20, 2048 }
  0x8d   :  { %p6392_p12 = scmp.ne.s32.totalorder %s6815_s20, %s6391_s19  ;;  %p6395_p13 = scmp.lt.u32.totalorder %s6391_s19, %s6815_s20 }
  0x8f   :  { %p6397_p0 = pnand %p6395_p13, %p6392_p12 }
  0x91   :  { %6400 = shalt.err (!%p6397_p0)
}
  0x92   :  { %s6401_s9 = scalar_lea.vmem %s6898_s11, 2048  ;;  %p6406_p2 = scmp.lt.s32.totalorder %s6898_s11, %s6898_s11 }
  0x93   :  { %p6402_p1 = scmp.ne.s32.totalorder %s6898_s11, %s6401_s9  ;;  %p6407_p3 = scmp.lt.s32.totalorder %s6401_s9, %s6401_s9 }
  0x95   :  { %p6408_p4 = por %p6407_p3, %p6406_p2 }
  0x97   :  { %p6409_p5 = pnand %p6408_p4, %p6402_p1 }
  0x99   :  { %6412 = shalt.err (!%p6409_p5)
}
  0x9a   :  { %232 = dma.hbm_to_vmem [thread:$0]  %s6815_s20, 2048, %s6898_s11, [#allocation20], %s6684_s2, %s6684_s2, %s6685_s7  }
  0x9b   :  { %s6692_s27 = smov [#allocation22]   ;;  %s6693_s22 = smov [#allocation2]  }
  0x9c   :  { %s256_s18 = sshll.u32 %s6692_s27, 4  ;;  %s82_s23 = sshll.u32 %s6693_s22, 4  ;;  %s257_s18 = int_to_ptr.vmem [resolvable:$true] %s256_s18  ;;  %s6919_s23 = int_to_ptr.vmem [resolvable:$true] %s82_s23 }
  0x9d   :  { %s6413_s25 = scalar_lea.hbm %s6840_s21, 4096 }
  0x9e   :  { %p6414_p6 = scmp.ne.s32.totalorder %s6840_s21, %s6413_s25  ;;  %p6417_p7 = scmp.lt.u32.totalorder %s6413_s25, %s6840_s21 }
  0xa0   :  { %p6419_p8 = pnand %p6417_p7, %p6414_p6 }
  0xa2   :  { %6422 = shalt.err (!%p6419_p8)
}
  0xa3   :  { %s6423_s26 = scalar_lea.vmem %s257_s18, 4096  ;;  %p6428_p10 = scmp.lt.s32.totalorder %s257_s18, %s257_s18 }
  0xa4   :  { %p6424_p9 = scmp.ne.s32.totalorder %s257_s18, %s6423_s26  ;;  %p6429_p11 = scmp.lt.s32.totalorder %s6423_s26, %s6423_s26 }
  0xa6   :  { %p6430_p12 = por %p6429_p11, %p6428_p10 }
  0xa8   :  { %p6431_p13 = pnand %p6430_p12, %p6424_p9 }
  0xaa   :  { %6434 = shalt.err (!%p6431_p13)
}
  0xab   :  { %s6694_s20 = smov 256   ;;  %s6695_s28 = smov 16  }
  0xac   :  { %262 = dma.hbm_to_vmem [thread:$0]  %s6840_s21, 4096, %s257_s18, [#allocation23], %s6694_s20, %s6694_s20, %s6695_s28  }
  0xad   :  { %s6435_s3 = scalar_lea.hbm %s6715_s5, 256 }
  0xae   :  { %p6436_p0 = scmp.ne.s32.totalorder %s6715_s5, %s6435_s3  ;;  %p6439_p1 = scmp.lt.u32.totalorder %s6435_s3, %s6715_s5 }
  0xb0   :  { %p6441_p2 = pnand %p6439_p1, %p6436_p0 }
  0xb2   :  { %6444 = shalt.err (!%p6441_p2)
}
  0xb3   :  { %s6445_s0 = scalar_lea.vmem %s6919_s23, 256  ;;  %p6450_p4 = scmp.lt.s32.totalorder %s6919_s23, %s6919_s23 }
  0xb4   :  { %p6446_p3 = scmp.ne.s32.totalorder %s6919_s23, %s6445_s0  ;;  %p6451_p5 = scmp.lt.s32.totalorder %s6445_s0, %s6445_s0 }
  0xb6   :  { %p6452_p6 = por %p6451_p5, %p6450_p4 }
  0xb8   :  { %p6453_p7 = pnand %p6452_p6, %p6446_p3 }
  0xba   :  { %6456 = shalt.err (!%p6453_p7)
}
  0xbb   :  { %88 = dma.hbm_to_vmem [thread:$0]  %s6715_s5, 256, %s6919_s23, [#allocation3], %s6684_s2, %s6684_s2, %s6685_s7  }
  0xbc   :  { %s6696_s21 = smov [#allocation6]   ;;  %s6697_s10 = smov [#allocation9]  }
  0xbd   :  { %s106_s1 = sshll.u32 %s6696_s21, 4  ;;  %s132_s11 = sshll.u32 %s6697_s10, 4  ;;  %s107_s1 = int_to_ptr.vmem [resolvable:$true] %s106_s1  ;;  %s6940_s11 = int_to_ptr.vmem [resolvable:$true] %s132_s11 }
  0xbe   :  { %s6457_s15 = scalar_lea.hbm %s6725_s13, 4096 }
  0xbf   :  { %p6458_p8 = scmp.ne.s32.totalorder %s6725_s13, %s6457_s15  ;;  %p6461_p9 = scmp.lt.u32.totalorder %s6457_s15, %s6725_s13 }
  0xc1   :  { %p6463_p10 = pnand %p6461_p9, %p6458_p8 }
  0xc3   :  { %6466 = shalt.err (!%p6463_p10)
}
  0xc4   :  { %s6467_s16 = scalar_lea.vmem %s107_s1, 4096  ;;  %p6472_p12 = scmp.lt.s32.totalorder %s107_s1, %s107_s1 }
  0xc5   :  { %p6468_p11 = scmp.ne.s32.totalorder %s107_s1, %s6467_s16  ;;  %p6473_p13 = scmp.lt.s32.totalorder %s6467_s16, %s6467_s16 }
  0xc7   :  { %p6474_p0 = por %p6473_p13, %p6472_p12 }
  0xc9   :  { %p6475_p1 = pnand %p6474_p0, %p6468_p11 }
  0xcb   :  { %6478 = shalt.err (!%p6475_p1)
}
  0xcc   :  { %112 = dma.hbm_to_vmem [thread:$0]  %s6725_s13, 4096, %s107_s1, [#allocation5], %s6684_s2, %s6684_s2, %s6685_s7  }
  0xcd   :  { %s6479_s5 = scalar_lea.hbm %s6745_s29, 4096 }
  0xce   :  { %p6480_p2 = scmp.ne.s32.totalorder %s6745_s29, %s6479_s5  ;;  %p6483_p3 = scmp.lt.u32.totalorder %s6479_s5, %s6745_s29 }
  0xd0   :  { %p6485_p4 = pnand %p6483_p3, %p6480_p2 }
  0xd2   :  { %6488 = shalt.err (!%p6485_p4)
}
  0xd3   :  { %s6489_s19 = scalar_lea.vmem %s6940_s11, 4096  ;;  %p6494_p6 = scmp.lt.s32.totalorder %s6940_s11, %s6940_s11 }
  0xd4   :  { %p6490_p5 = scmp.ne.s32.totalorder %s6940_s11, %s6489_s19  ;;  %p6495_p7 = scmp.lt.s32.totalorder %s6489_s19, %s6489_s19 }
  0xd6   :  { %p6496_p8 = por %p6495_p7, %p6494_p6 }
  0xd8   :  { %p6497_p9 = pnand %p6496_p8, %p6490_p5 }
  0xda   :  { %6500 = shalt.err (!%p6497_p9)
}
  0xdb   :  { %138 = dma.hbm_to_vmem [thread:$0]  %s6745_s29, 4096, %s6940_s11, [#allocation8], %s6694_s20, %s6694_s20, %s6695_s28  }
  0xdc   :  { %s6698_s13 = smov [#allocation12]   ;;  %s6699_s27 = smov [#allocation15]  }
  0xdd   :  { %s157_s9 = sshll.u32 %s6698_s13, 4  ;;  %s180_s18 = sshll.u32 %s6699_s27, 4  ;;  %s158_s9 = int_to_ptr.vmem [resolvable:$true] %s157_s9  ;;  %s6961_s18 = int_to_ptr.vmem [resolvable:$true] %s180_s18 }
  0xde   :  { %s6501_s22 = scalar_lea.hbm %s6760_s14, 16 }
  0xdf   :  { %p6502_p10 = scmp.ne.s32.totalorder %s6760_s14, %s6501_s22  ;;  %p6505_p11 = scmp.lt.u32.totalorder %s6501_s22, %s6760_s14 }
  0xe1   :  { %p6507_p12 = pnand %p6505_p11, %p6502_p10 }
  0xe3   :  { %6510 = shalt.err (!%p6507_p12)
}
  0xe4   :  { %s6511_s23 = scalar_lea.vmem %s158_s9, 16  ;;  %s6515_s25 = scalar_lea.vmem %s158_s9, 32 }
  0xe5   :  { %p6512_p13 = scmp.ne.s32.totalorder %s158_s9, %s6511_s23  ;;  %p6516_p0 = scmp.lt.s32.totalorder %s158_s9, %s158_s9 }
  0xe6   :  { %p6517_p1 = scmp.lt.s32.totalorder %s6515_s25, %s6511_s23 }
  0xe8   :  { %p6518_p2 = por %p6517_p1, %p6516_p0 }
  0xea   :  { %p6519_p3 = pnand %p6518_p2, %p6512_p13 }
  0xec   :  { %6522 = shalt.err (!%p6519_p3)
}
  0xed   :  { %160 = dma.hbm_to_vmem [thread:$0]  %s6760_s14, 16, %s158_s9, [#allocation11]  }
  0xee   :  { %s6523_s29 = scalar_lea.hbm %s6775_s30, 4096 }
  0xef   :  { %p6524_p4 = scmp.ne.s32.totalorder %s6775_s30, %s6523_s29  ;;  %p6527_p5 = scmp.lt.u32.totalorder %s6523_s29, %s6775_s30 }
  0xf1   :  { %p6529_p6 = pnand %p6527_p5, %p6524_p4 }
  0xf3   :  { %6532 = shalt.err (!%p6529_p6)
}
  0xf4   :  { %s6533_s26 = scalar_lea.vmem %s6961_s18, 4096  ;;  %p6538_p8 = scmp.lt.s32.totalorder %s6961_s18, %s6961_s18 }
  0xf5   :  { %p6534_p7 = scmp.ne.s32.totalorder %s6961_s18, %s6533_s26  ;;  %p6539_p9 = scmp.lt.s32.totalorder %s6533_s26, %s6533_s26 }
  0xf7   :  { %p6540_p10 = por %p6539_p9, %p6538_p8 }
  0xf9   :  { %p6541_p11 = pnand %p6540_p10, %p6534_p7 }
  0xfb   :  { %6544 = shalt.err (!%p6541_p11)
}
  0xfc   :  { %186 = dma.hbm_to_vmem [thread:$0]  %s6775_s30, 4096, %s6961_s18, [#allocation14], %s6684_s2, %s6684_s2, %s6685_s7  }
  0xfd   :  { %s6700_s14 = smov [#allocation18]   ;;  %s6701_s28 = smov [#allocation21]  }
  0xfe   :  { %s212_s20 = sshll.u32 %s6700_s14, 4  ;;  %s238_s3 = sshll.u32 %s6701_s28, 4  ;;  %s213_s20 = int_to_ptr.vmem [resolvable:$true] %s212_s20  ;;  %s6979_s3 = int_to_ptr.vmem [resolvable:$true] %s238_s3 }
  0xff   :  { %s6545_s0 = scalar_lea.hbm %s6805_s6, 4096 }
 0x100   :  { %p6546_p12 = scmp.ne.s32.totalorder %s6805_s6, %s6545_s0  ;;  %p6549_p13 = scmp.lt.u32.totalorder %s6545_s0, %s6805_s6 }
 0x102   :  { %p6551_p0 = pnand %p6549_p13, %p6546_p12 }
 0x104   :  { %6554 = shalt.err (!%p6551_p0)
}
 0x105   :  { %s6555_s21 = scalar_lea.vmem %s213_s20, 4096  ;;  %p6560_p2 = scmp.lt.s32.totalorder %s213_s20, %s213_s20 }
 0x106   :  { %p6556_p1 = scmp.ne.s32.totalorder %s213_s20, %s6555_s21  ;;  %p6561_p3 = scmp.lt.s32.totalorder %s6555_s21, %s6555_s21 }
 0x108   :  { %p6562_p4 = por %p6561_p3, %p6560_p2 }
 0x10a   :  { %p6563_p5 = pnand %p6562_p4, %p6556_p1 }
 0x10c   :  { %6566 = shalt.err (!%p6563_p5)
}
 0x10d   :  { %218 = dma.hbm_to_vmem [thread:$0]  %s6805_s6, 4096, %s213_s20, [#allocation17], %s6684_s2, %s6684_s2, %s6685_s7  }
 0x10e   :  { %s6567_s30 = scalar_lea.hbm %s6820_s4, 4096 }
 0x10f   :  { %p6568_p6 = scmp.ne.s32.totalorder %s6820_s4, %s6567_s30  ;;  %p6571_p7 = scmp.lt.u32.totalorder %s6567_s30, %s6820_s4 }
 0x111   :  { %p6573_p8 = pnand %p6571_p7, %p6568_p6 }
 0x113   :  { %6576 = shalt.err (!%p6573_p8)
}
 0x114   :  { %s6577_s1 = scalar_lea.vmem %s6979_s3, 4096  ;;  %p6582_p10 = scmp.lt.s32.totalorder %s6979_s3, %s6979_s3 }
 0x115   :  { %p6578_p9 = scmp.ne.s32.totalorder %s6979_s3, %s6577_s1  ;;  %p6583_p11 = scmp.lt.s32.totalorder %s6577_s1, %s6577_s1 }
 0x117   :  { %p6584_p12 = por %p6583_p11, %p6582_p10 }
 0x119   :  { %p6585_p13 = pnand %p6584_p12, %p6578_p9 }
 0x11b   :  { %6588 = shalt.err (!%p6585_p13)
}
 0x11c   :  { %s7739_s6 = sld [smem:[#allocation49_spill]]  ;;  %s6702_s10 = smov [#allocation24]  }
 0x11d   :  { %244 = dma.hbm_to_vmem [thread:$0]  %s6820_s4, 4096, %s6979_s3, [#allocation20], %s6684_s2, %s6684_s2, %s6685_s7  }
 0x11e   :  { %s270_s11 = sshll.u32 %s6702_s10, 4  ;;  %s6703_s15 = smov [#allocation25]   ;;  %s271_s11 = int_to_ptr.vmem [resolvable:$true] %s270_s11 }
 0x11f   :  { %s284_s16 = sshll.u32 %s6703_s15, 4  ;;  %s7000_s16 = int_to_ptr.vmem [resolvable:$true] %s284_s16 }
 0x122   :  { %s6589_s5 = scalar_lea.hbm %s7739_s6, 2048 }
 0x123   :  { %p6590_p0 = scmp.ne.s32.totalorder %s7739_s6, %s6589_s5  ;;  %p6593_p1 = scmp.lt.u32.totalorder %s6589_s5, %s7739_s6 }
 0x125   :  { %p6595_p2 = pnand %p6593_p1, %p6590_p0 }
 0x127   :  { %6598 = shalt.err (!%p6595_p2)
}
 0x128   :  { %s6599_s19 = scalar_lea.vmem %s271_s11, 2048  ;;  %p6604_p4 = scmp.lt.s32.totalorder %s271_s11, %s271_s11 }
 0x129   :  { %p6600_p3 = scmp.ne.s32.totalorder %s271_s11, %s6599_s19  ;;  %p6605_p5 = scmp.lt.s32.totalorder %s6599_s19, %s6599_s19 }
 0x12b   :  { %p6606_p6 = por %p6605_p5, %p6604_p4 }
 0x12d   :  { %p6607_p7 = pnand %p6606_p6, %p6600_p3 }
 0x12f   :  { %6610 = shalt.err (!%p6607_p7)
}
 0x130   :  { %276 = dma.hbm_to_vmem [thread:$0]  %s7739_s6, 2048, %s271_s11, [#allocation23], %s6684_s2, %s6684_s2, %s6685_s7  }
 0x131   :  { %s6611_s4 = scalar_lea.hbm %s6860_s17, 2048 }
 0x132   :  { %p6612_p8 = scmp.ne.s32.totalorder %s6860_s17, %s6611_s4  ;;  %p6615_p9 = scmp.lt.u32.totalorder %s6611_s4, %s6860_s17 }
 0x134   :  { %p6617_p10 = pnand %p6615_p9, %p6612_p8 }
 0x136   :  { %6620 = shalt.err (!%p6617_p10)
}
 0x137   :  { %s6621_s13 = scalar_lea.vmem %s7000_s16, 2048  ;;  %p6626_p12 = scmp.lt.s32.totalorder %s7000_s16, %s7000_s16 }
 0x138   :  { %p6622_p11 = scmp.ne.s32.totalorder %s7000_s16, %s6621_s13  ;;  %p6627_p13 = scmp.lt.s32.totalorder %s6621_s13, %s6621_s13 }
 0x13a   :  { %p6628_p0 = por %p6627_p13, %p6626_p12 }
 0x13c   :  { %p6629_p1 = pnand %p6628_p0, %p6622_p11 }
 0x13e   :  { %6632 = shalt.err (!%p6629_p1)
}
 0x13f   :  { %290 = dma.hbm_to_vmem [thread:$0]  %s6860_s17, 2048, %s7000_s16, [#allocation26], %s6684_s2, %s6684_s2, %s6685_s7  }
 0x140   :  { %6633 = dma.done.wait [#allocation3], 256  }
 0x141   :  { %6634 = vsyncadd [#allocation3], 4294967040 }
 0x142   :  { %6635 = dma.done.wait [#allocation5], 4352  }
 0x143   :  { %6636 = vsyncadd [#allocation5], 4294962944 }
 0x144   :  { %6637 = dma.done.wait [#allocation8], 4160  }
 0x145   :  { %6638 = vsyncadd [#allocation8], 4294963136 }
 0x146   :  { %6639 = dma.done.wait [#allocation11], 48  }
 0x147   :  { %6640 = vsyncadd [#allocation11], 4294967248 }
 0x148   :  { %6641 = dma.done.wait [#allocation14], 16384  }
 0x149   :  { %6642 = vsyncadd [#allocation14], 4294950912 }
 0x14a   :  { %6643 = dma.done.wait [#allocation17], 8192  }
 0x14b   :  { %6644 = vsyncadd [#allocation17], 4294959104 }
 0x14c   :  { %6645 = dma.done.wait [#allocation20], 6144  }
 0x14d   :  { %6646 = vsyncadd [#allocation20], 4294961152 }
 0x14e   :  { %6647 = dma.done.wait [#allocation23], 6144  }
 0x14f   :  { %6648 = vsyncadd [#allocation23], 4294961152 }
 0x150   :  { %6649 = dma.done.wait [#allocation26], 2048  }
 0x151   :  { %6650 = vsyncadd [#allocation26], 4294965248  ;;  %s7740_s9 = sld [smem:[#allocation36_spill]]  ;;  %vm350_vm0 = vcmask 130048   ;;  %v343_v0 = vld [vmem:[#allocation4] sm:$0xff]  ;;  %v344_v1 = vld [vmem:[#allocation4 + $0x8] sm:$0xff]  ;;  %v436_v18 = vlaneseq }
 0x152   :  { %v7021_v2 = vld [vmem:[#allocation2] sm:$0xff]  ;;  %v5470_v3 = vpack.c.bf16 %v344_v1, %v343_v0  ;;  %v7025_v4 = vld [vmem:[#allocation2 + $0x8] sm:$0xff]  ;;  %v479_v14 = vld [vmem:[#allocation6 + $0x10] sm:$0xff]  ;;  %v6704_v22 = vmov 0.0   ;;  %s7741_s17 = sld [smem:[#allocation37_spill]]  ;;  %s7742_s2 = sld [smem:[#allocation38_spill]] }
 0x153   :  { %4816 = vmatprep.mubr.msk.f32.mxu0 %vm350_vm0, %v7021_v2  ;;  %v477_v12 = vld [vmem:[#allocation6] sm:$0xff]  ;;  %v478_v13 = vld [vmem:[#allocation6 + $0x8] sm:$0xff]  ;;  %v480_v16 = vld [vmem:[#allocation6 + $0x18] sm:$0xff]  ;;  %v7031_v19 = vand.u32 127, %v436_v18  ;;  %s7743_s7 = sld [smem:[#allocation41_spill]]  ;;  %s7744_s27 = sld [smem:[#allocation42_spill]] }
 0x154   :  { %5471 = vmatprep.subr.bf16.mxu0 %v5470_v3  ;;  %v5474_v15 = vpack.c.bf16 %v478_v13, %v477_v12  ;;  %v5478_v17 = vpack.c.bf16 %v480_v16, %v479_v14  ;;  %v481_v32 = vld [vmem:[#allocation6 + $0x20] sm:$0xff]  ;;  %v482_v33 = vld [vmem:[#allocation6 + $0x28] sm:$0xff]  ;;  %v483_v35 = vld [vmem:[#allocation6 + $0x30] sm:$0xff]  ;;  %s7745_s18 = sld [smem:[#allocation39_spill]]  ;;  %s7748_s22 = sld [smem:[#allocation40_spill]] }
 0x155   :  { %5473 = vmatpush3.bf16.msra.mxu0 %v5470_v3  ;;  %vm438_vm1 = vcmp.lt.s32.totalorder %v7031_v19, 32  ;;  %v5482_v34 = vpack.c.bf16 %v482_v33, %v481_v32  ;;  %v484_v36 = vld [vmem:[#allocation6 + $0x38] sm:$0xff]  ;;  %v485_v38 = vld [vmem:[#allocation6 + $0x40] sm:$0xff]  ;;  %v486_v39 = vld [vmem:[#allocation6 + $0x48] sm:$0xff]  ;;  %vm974_vm2 = vcmp.ge.s32.totalorder %v7031_v19, 4  ;;  %vm975_vm3 = vcmp.lt.s32.totalorder %v7031_v19, 8 }
 0x156   :  { %5475 = vmatprep.subr.bf16.mxu1 %v5474_v15  ;;  %v7037_v23 = vsel %vm438_vm1, 1.0, %v6704_v22  ;;  %v5486_v37 = vpack.c.bf16 %v484_v36, %v483_v35  ;;  %v5490_v40 = vpack.c.bf16 %v486_v39, %v485_v38  ;;  %v487_v41 = vld [vmem:[#allocation6 + $0x50] sm:$0xff]  ;;  %v488_v42 = vld [vmem:[#allocation6 + $0x58] sm:$0xff]  ;;  %v489_v43 = vld [vmem:[#allocation6 + $0x60] sm:$0xff]  ;;  %vm970_vm4 = vcmp.lt.s32.totalorder %v7031_v19, 4  ;;  %s7749_s23 = sld [smem:[#allocation43_spill]] }
 0x157   :  { %v4383_v5 = vld [vmem:[%s7740_s9] ss:$0 sm:$0xff]  ;;  %5477 = vmatpush3.bf16.msra.mxu1 %v5474_v15  ;;  %v5494_v44 = vpack.c.bf16 %v488_v42, %v487_v41  ;;  %v490_v45 = vld [vmem:[#allocation6 + $0x68] sm:$0xff]  ;;  %v491_v47 = vld [vmem:[#allocation6 + $0x70] sm:$0xff]  ;;  %vm979_vm5 = vcmp.ge.s32.totalorder %v7031_v19, 8  ;;  %vm980_vm6 = vcmp.lt.s32.totalorder %v7031_v19, 12 }
 0x158   :  { %4817 = vmatmul.mubr.msk.f32.vlgmr.msra.gmra.mrb[0].mxu0 %vm350_vm0, %v7025_v4  ;;  %5479 = vmatprep.subr.bf16.mxu1 %v5478_v17  ;;  %v5498_v46 = vpack.c.bf16 %v490_v45, %v489_v43  ;;  %v492_v48 = vld [vmem:[#allocation6 + $0x78] sm:$0xff]  ;;  %v4387_v57 = vld [vmem:[%s7741_s17] ss:$0 sm:$0xff]  ;;  %v4389_v3 = vld [vmem:[%s7740_s9 + $0x1] ss:$0 sm:$0xff]  ;;  %vm984_vm9 = vcmp.ge.s32.totalorder %v7031_v19, 12 }
 0x159   :  { %v5502_v49 = vpack.c.bf16 %v492_v48, %v491_v47  ;;  %v4388_v59 = vld [vmem:[#allocation7] ss:$0 sm:$0xff]  ;;  %v615_v12 = vld [vmem:[#allocation6 + $0x88] sm:$0xff]  ;;  %v616_v13 = vld [vmem:[#allocation6 + $0x90] sm:$0xff]  ;;  %vm985_vm10 = vcmp.lt.s32.totalorder %v7031_v19, 16  ;;  %vm989_vm11 = vcmp.ge.s32.totalorder %v7031_v19, 16 }
 0x15a   :  { %v617_v15 = vld [vmem:[#allocation6 + $0x98] sm:$0xff]  ;;  %v623_v38 = vld [vmem:[#allocation6 + $0xc8] sm:$0xff]  ;;  %v626_v43 = vld [vmem:[#allocation6 + $0xe0] sm:$0xff]  ;;  %vm990_vm12 = vcmp.lt.s32.totalorder %v7031_v19, 20  ;;  %vm994_vm14 = vcmp.ge.s32.totalorder %v7031_v19, 20  ;;  %s7750_s25 = sld [smem:[#allocation44_spill]] }
 0x15b   :  { %5481 = vmatpush3.bf16.msra.mxu1 %v5478_v17  ;;  %v5510_v16 = vpack.c.bf16 %v617_v15, %v616_v13  ;;  %v618_v17 = vld [vmem:[#allocation6 + $0xa0] sm:$0xff]  ;;  %v621_v35 = vld [vmem:[#allocation6 + $0xb8] sm:$0xff]  ;;  %v755_v15 = vld [vmem:[#allocation9 + $0x28] sm:$0xff]  ;;  %s7751_s29 = sld [smem:[#allocation45_spill]]  ;;  %s7752_s26 = sld [smem:[#allocation46_spill]] }
 0x15c   :  { %5483 = vmatprep.subr.bf16.mxu1 %v5482_v34  ;;  %v625_v41 = vld [vmem:[#allocation6 + $0xd8] sm:$0xff]  ;;  %vm976_vm7 = vmand %vm974_vm2, %vm975_vm3  ;;  %vm995_vm2 = vcmp.lt.s32.totalorder %v7031_v19, 24  ;;  %vm999_vm3 = vcmp.ge.s32.totalorder %v7031_v19, 24  ;;  %s7753_s14 = sld [smem:[#allocation47_spill]]  ;;  %s7754_s20 = sld [smem:[#allocation48_spill]] }
 0x15d   :  { %v629_v47 = vld [vmem:[#allocation6 + $0xf8] sm:$0xff]  ;;  %vm981_vm8 = vmand %vm979_vm5, %vm980_vm6 }
 0x15e   :  { %vm7129_vm13 = vmand %vm984_vm9, %vm985_vm10  ;;  %vm6706_vm9 = vmmov 0  }
 0x15f   :  { %5485 = vmatpush3.bf16.msra.mxu1 %v5482_v34  ;;  %v620_v34 = vld [vmem:[#allocation6 + $0xb0] sm:$0xff]  ;;  %vm991_vm15 = vmand %vm989_vm11, %vm990_vm12 }
 0x160   :  { %5487 = vmatprep.subr.bf16.mxu1 %v5486_v37  ;;  %v5518_v36 = vpack.c.bf16 %v621_v35, %v620_v34  ;;  %vm996_vm5 = vmand %vm994_vm14, %vm995_vm2 }
 0x163   :  { %5489 = vmatpush3.bf16.msra.mxu1 %v5486_v37  ;;  %v622_v37 = vld [vmem:[#allocation6 + $0xc0] sm:$0xff] }
 0x164   :  { %5491 = vmatprep.subr.bf16.mxu1 %v5490_v40  ;;  %v5522_v39 = vpack.c.bf16 %v623_v38, %v622_v37 }
 0x167   :  { %5493 = vmatpush3.bf16.msra.mxu1 %v5490_v40  ;;  %v624_v40 = vld [vmem:[#allocation6 + $0xd0] sm:$0xff] }
 0x168   :  { %5495 = vmatprep.subr.bf16.mxu1 %v5494_v44  ;;  %v5526_v42 = vpack.c.bf16 %v625_v41, %v624_v40  ;;  %v763_v41 = vld [vmem:[#allocation9 + $0x68] sm:$0xff] }
 0x16b   :  { %5497 = vmatpush3.bf16.msra.mxu1 %v5494_v44  ;;  %v627_v44 = vld [vmem:[#allocation6 + $0xe8] sm:$0xff] }
 0x16c   :  { %5499 = vmatprep.subr.bf16.mxu1 %v5498_v46  ;;  %v5530_v45 = vpack.c.bf16 %v627_v44, %v626_v43  ;;  %v762_v44 = vld [vmem:[#allocation9 + $0x60] sm:$0xff] }
 0x16f   :  { %5501 = vmatpush3.bf16.msra.mxu1 %v5498_v46  ;;  %v628_v46 = vld [vmem:[#allocation6 + $0xf0] sm:$0xff] }
 0x170   :  { %5503 = vmatprep.subr.bf16.mxu1 %v5502_v49  ;;  %v5534_v48 = vpack.c.bf16 %v629_v47, %v628_v46  ;;  %v767_v47 = vld [vmem:[#allocation9 + $0x88] sm:$0xff] }
 0x173   :  { %5505 = vmatpush3.bf16.msra.mxu1 %v5502_v49 }
 0x22b   :  { %v4818_v6 = vpop.f32.mrb[0].mxu0 }
 0x22c   :  { %v423_v7 = vpop.f32.mrb[1].mxu0  ;;  %v429_v9 = vadd.f32 %v4818_v6, %v4383_v5 }
 0x22d   :  { %v424_v8 = vadd.f32 %v4383_v5, %v423_v7 }
 0x22e   :  { %v433_v11 = vmax.f32 %v429_v9, 0.0 }
 0x22f   :  { %v432_v10 = vmax.f32 %v424_v8, 0.0 }
 0x231   :  { %441 = vadd.xlane.f32.xlu0 %v432_v10 }
 0x235   :  { %443 = vadd.xlane.f32.xlu0 %v433_v11 }
 0x2be   :  { %v442_v20 = vpop.xlane.xlu0 %441 }
 0x2bf   :  { %v445_v21 = vmul.f32 0.03125, %v442_v20  ;;  %v619_v20 = vld [vmem:[#allocation6 + $0xa8] sm:$0xff] }
 0x2c1   :  { %v447_v24 = vsub.f32 %v432_v10, %v445_v21  ;;  %v5514_v21 = vpack.c.bf16 %v619_v20, %v618_v17 }
 0x2c2   :  { %v444_v25 = vpop.xlane.xlu0 %443 }
 0x2c3   :  { %v446_v26 = vmul.f32 0.03125, %v444_v25  ;;  %v449_v27 = vmul.f32 %v7037_v23, %v447_v24 }
 0x2c5   :  { %v448_v28 = vsub.f32 %v433_v11, %v446_v26  ;;  %v451_v29 = vmul.f32 %v449_v27, %v449_v27  ;;  %v614_v11 = vld [vmem:[#allocation6 + $0x80] sm:$0xff] }
 0x2c6   :  { %v5506_v14 = vpack.c.bf16 %v615_v12, %v614_v11  ;;  %v753_v11 = vld [vmem:[#allocation9 + $0x18] sm:$0xff]  ;;  %v750_v12 = vld [vmem:[#allocation9] sm:$0xff] }
 0x2c7   :  { %453 = vadd.xlane.f32.xlu1 %v451_v29  ;;  %v450_v30 = vmul.f32 %v7037_v23, %v448_v28 }
 0x2c8   :  { %5507 = vmatprep.subr.bf16.mxu0 %v5506_v14 }
 0x2c9   :  { %v452_v31 = vmul.f32 %v450_v30, %v450_v30  ;;  %5509 = vmatpush3.bf16.msra.mxu0 %v5506_v14  ;;  %v752_v14 = vld [vmem:[#allocation9 + $0x10] sm:$0xff] }
 0x2ca   :  { %5511 = vmatprep.subr.bf16.mxu0 %v5510_v16  ;;  %v5540_v17 = vpack.c.bf16 %v752_v14, %v750_v12 }
 0x2cb   :  { %455 = vadd.xlane.f32.xlu1 %v452_v31 }
 0x2cd   :  { %5513 = vmatpush3.bf16.msra.mxu0 %v5510_v16  ;;  %v757_v16 = vld [vmem:[#allocation9 + $0x38] sm:$0xff] }
 0x2ce   :  { %5515 = vmatprep.subr.bf16.mxu0 %v5514_v21  ;;  %v5542_v20 = vpack.c.bf16 %v757_v16, %v755_v15 }
 0x2d1   :  { %5517 = vmatpush3.bf16.msra.mxu0 %v5514_v21  ;;  %v754_v21 = vld [vmem:[#allocation9 + $0x20] sm:$0xff] }
 0x2d2   :  { %5519 = vmatprep.subr.bf16.mxu0 %v5518_v36 }
 0x2d5   :  { %5521 = vmatpush3.bf16.msra.mxu0 %v5518_v36 }
 0x2d6   :  { %5523 = vmatprep.subr.bf16.mxu0 %v5522_v39 }
 0x2d9   :  { %5525 = vmatpush3.bf16.msra.mxu0 %v5522_v39 }
 0x2da   :  { %5527 = vmatprep.subr.bf16.mxu0 %v5526_v42 }
 0x2dd   :  { %5529 = vmatpush3.bf16.msra.mxu0 %v5526_v42  ;;  %v765_v42 = vld [vmem:[#allocation9 + $0x78] sm:$0xff] }
 0x2de   :  { %5531 = vmatprep.subr.bf16.mxu0 %v5530_v45  ;;  %v5550_v43 = vpack.c.bf16 %v765_v42, %v763_v41 }
 0x2e1   :  { %5533 = vmatpush3.bf16.msra.mxu0 %v5530_v45  ;;  %v764_v45 = vld [vmem:[#allocation9 + $0x70] sm:$0xff] }
 0x2e2   :  { %5535 = vmatprep.subr.bf16.mxu0 %v5534_v48  ;;  %v5552_v46 = vpack.c.bf16 %v764_v45, %v762_v44 }
 0x2e5   :  { %5537 = vmatpush3.bf16.msra.mxu0 %v5534_v48  ;;  %v769_v48 = vld [vmem:[#allocation9 + $0x98] sm:$0xff] }
 0x354   :  { %v454_v50 = vpop.xlane.xlu1 %453 }
 0x355   :  { %v457_v51 = vmul.f32 0.03125, %v454_v50 }
 0x357   :  { %v459_v52 = vadd.f32 1e-05, %v457_v51 }
 0x358   :  { %v456_v53 = vpop.xlane.xlu1 %455 }
 0x359   :  { %6105 = vrsqrt.f32 %v459_v52  ;;  %v458_v54 = vmul.f32 0.03125, %v456_v53 }
 0x35b   :  { %v460_v55 = vadd.f32 1e-05, %v458_v54 }
 0x35d   :  { %6107 = vrsqrt.f32 %v460_v55 }
 0x363   :  { %v6106_v56 = vpop.eup %6105 }
 0x364   :  { %v463_v58 = vmul.f32 %v6106_v56, %v449_v27  ;;  %v4390_v56 = vld [vmem:[%s7741_s17 + $0x1] ss:$0 sm:$0xff] }
 0x366   :  { %v469_v60 = vmul.f32 %v4387_v57, %v463_v58 }
 0x367   :  { %v6108_v61 = vpop.eup %6107 }
 0x368   :  { %v464_v62 = vmul.f32 %v6108_v61, %v450_v30  ;;  %v475_v63 = vadd.f32 %v4388_v59, %v469_v60  ;;  %v4391_v60 = vld [vmem:[#allocation7 + $0x1] ss:$0 sm:$0xff] }
 0x36a   :  { %v470_v0 = vmul.f32 %v4387_v57, %v464_v62  ;;  %4851 = vmatprep.mubr.f32.mxu1 %v475_v63 }
 0x36c   :  { %v476_v1 = vadd.f32 %v4388_v59, %v470_v0 }
 0x36e   :  { %4852 = vmatmul.mubr.f32.vlgmr.msra.gmra.mrb[0].mxu1 %v476_v1  ;;  %v4392_v1 = vld [vmem:[%s7740_s9 + $0x2] ss:$0 sm:$0xff] }
 0x36f   :  { %858 = vmatprep.mubr.f32.mxu1 %v6704_v22 }
 0x441   :  { %v4853_v5 = vpop.f32.mrb[0].mxu1 }
 0x442   :  { %v570_v6 = vadd.f32 %v4853_v5, %v4389_v3  ;;  %v564_v7 = vpop.f32.mrb[1].mxu1 }
 0x443   :  { %v565_v8 = vadd.f32 %v4389_v3, %v564_v7 }
 0x444   :  { %v574_v9 = vmax.f32 %v570_v6, 0.0 }
 0x445   :  { %v573_v10 = vmax.f32 %v565_v8, 0.0 }
 0x446   :  { %579 = vadd.xlane.f32.xlu1 %v574_v9 }
 0x447   :  { %577 = vadd.xlane.f32.xlu0 %v573_v10 }
 0x4d3   :  { %v580_v24 = vpop.xlane.xlu1 %579 }
 0x4d4   :  { %v582_v25 = vmul.f32 0.03125, %v580_v24  ;;  %v578_v26 = vpop.xlane.xlu0 %577  ;;  %v759_v24 = vld [vmem:[#allocation9 + $0x48] sm:$0xff] }
 0x4d5   :  { %v581_v27 = vmul.f32 0.03125, %v578_v26 }
 0x4d6   :  { %v584_v28 = vsub.f32 %v574_v9, %v582_v25  ;;  %v761_v25 = vld [vmem:[#allocation9 + $0x58] sm:$0xff] }
 0x4d7   :  { %v583_v29 = vsub.f32 %v573_v10, %v581_v27  ;;  %v751_v10 = vld [vmem:[#allocation9 + $0x8] sm:$0xff]  ;;  %v5546_v27 = vpack.c.bf16 %v761_v25, %v759_v24 }
 0x4d8   :  { %v586_v30 = vmul.f32 %v7037_v23, %v584_v28  ;;  %v5538_v13 = vpack.c.bf16 %v753_v11, %v751_v10  ;;  %v758_v28 = vld [vmem:[#allocation9 + $0x40] sm:$0xff] }
 0x4d9   :  { %v585_v31 = vmul.f32 %v7037_v23, %v583_v29  ;;  %v760_v29 = vld [vmem:[#allocation9 + $0x50] sm:$0xff]  ;;  %v882_v10 = vld [vmem:[%s7742_s2 + $0x8] sm:$0xff] }
 0x4da   :  { %v588_v32 = vmul.f32 %v586_v30, %v586_v30  ;;  %5539 = vmatprep.subr.bf16.mxu1 %v5538_v13 }
 0x4db   :  { %v587_v33 = vmul.f32 %v585_v31, %v585_v31  ;;  %5541 = vmatpush1.bf16.msra.mxu1 %v5540_v17 }
 0x4dc   :  { %591 = vadd.xlane.f32.xlu1 %v588_v32  ;;  %5543 = vmatprep.subr.bf16.mxu1 %v5542_v20 }
 0x4dd   :  { %589 = vadd.xlane.f32.xlu0 %v587_v33 }
 0x569   :  { %v592_v49 = vpop.xlane.xlu1 %591 }
 0x56a   :  { %v594_v50 = vmul.f32 0.03125, %v592_v49  ;;  %v590_v51 = vpop.xlane.xlu0 %589  ;;  %v5554_v49 = vpack.c.bf16 %v769_v48, %v767_v47 }
 0x56b   :  { %v593_v52 = vmul.f32 0.03125, %v590_v51  ;;  %v768_v51 = vld [vmem:[#allocation9 + $0x90] sm:$0xff] }
 0x56c   :  { %v596_v53 = vadd.f32 1e-05, %v594_v50  ;;  %v766_v50 = vld [vmem:[#allocation9 + $0x80] sm:$0xff] }
 0x56d   :  { %v595_v54 = vadd.f32 1e-05, %v593_v52  ;;  %v5556_v52 = vpack.c.bf16 %v768_v51, %v766_v50  ;;  %v4395_v51 = vld [vmem:[#allocation12] ss:$0 sm:$0xff] }
 0x56e   :  { %6109 = vrsqrt.f32 %v596_v53  ;;  %v771_v53 = vld [vmem:[#allocation9 + $0xa8] sm:$0xff] }
 0x56f   :  { %6111 = vrsqrt.f32 %v595_v54  ;;  %v773_v54 = vld [vmem:[#allocation9 + $0xb8] sm:$0xff] }
 0x578   :  { %v6110_v55 = vpop.eup %6109 }
 0x579   :  { %v6112_v57 = vpop.eup %6111  ;;  %v600_v58 = vmul.f32 %v6110_v55, %v586_v30  ;;  %v5548_v30 = vpack.c.bf16 %v760_v29, %v758_v28  ;;  %v770_v55 = vld [vmem:[#allocation9 + $0xa0] sm:$0xff] }
 0x57a   :  { %v599_v59 = vmul.f32 %v6112_v57, %v585_v31  ;;  %v772_v57 = vld [vmem:[#allocation9 + $0xb0] sm:$0xff] }
 0x57b   :  { %v606_v61 = vmul.f32 %v4390_v56, %v600_v58  ;;  %v775_v58 = vld [vmem:[#allocation9 + $0xc8] sm:$0xff] }
 0x57c   :  { %v605_v62 = vmul.f32 %v4390_v56, %v599_v59  ;;  %v5558_v56 = vpack.c.bf16 %v773_v54, %v771_v53  ;;  %v777_v59 = vld [vmem:[#allocation9 + $0xd8] sm:$0xff] }
 0x57d   :  { %v612_v0 = vadd.f32 %v4391_v60, %v606_v61  ;;  %v5562_v61 = vpack.c.bf16 %v777_v59, %v775_v58 }
 0x57e   :  { %v611_v63 = vadd.f32 %v4391_v60, %v605_v62  ;;  %v5560_v60 = vpack.c.bf16 %v772_v57, %v770_v55  ;;  %v774_v62 = vld [vmem:[#allocation9 + $0xc0] sm:$0xff] }
 0x580   :  { %4886 = vmatprep.mubr.f32.mxu0 %v611_v63  ;;  %v776_v63 = vld [vmem:[#allocation9 + $0xd0] sm:$0xff] }
 0x581   :  { %4887 = vmatmul.mubr.f32.vlgmr.msra.gmra.mrb[2].mxu0 %v612_v0  ;;  %v779_v0 = vld [vmem:[#allocation9 + $0xe8] sm:$0xff] }
 0x582   :  { %4893 = vmatprep.mubr.msk.f32.mxu0 %vm350_vm0, %v7021_v2  ;;  %v756_v2 = vld [vmem:[#allocation9 + $0x30] sm:$0xff] }
 0x583   :  { %v5544_v26 = vpack.c.bf16 %v756_v2, %v754_v21  ;;  %v4393_v2 = vld [vmem:[%s7741_s17 + $0x2] ss:$0 sm:$0xff] }
 0x585   :  { %5545 = vmatpush1.bf16.msra.mxu1 %v5544_v26  ;;  %v4394_v26 = vld [vmem:[#allocation7 + $0x2] ss:$0 sm:$0xff] }
 0x586   :  { %5547 = vmatprep.subr.bf16.mxu1 %v5546_v27 }
 0x589   :  { %5549 = vmatpush1.bf16.msra.mxu1 %v5548_v30 }
 0x58a   :  { %5551 = vmatprep.subr.bf16.mxu1 %v5550_v43 }
 0x58d   :  { %5553 = vmatpush1.bf16.msra.mxu1 %v5552_v46 }
 0x58e   :  { %5555 = vmatprep.subr.bf16.mxu1 %v5554_v49 }
 0x591   :  { %5557 = vmatpush1.bf16.msra.mxu1 %v5556_v52 }
 0x592   :  { %5559 = vmatprep.subr.bf16.mxu1 %v5558_v56 }
 0x595   :  { %5561 = vmatpush1.bf16.msra.mxu1 %v5560_v60 }
 0x596   :  { %5563 = vmatprep.subr.bf16.mxu1 %v5562_v61 }
 0x654   :  { %v4888_v3 = vpop.f32.mrb[2].mxu0 }
 0x655   :  { %v707_v5 = vadd.f32 %v4888_v3, %v4392_v1  ;;  %v701_v6 = vpop.f32.mrb[3].mxu0  ;;  %v5564_v3 = vpack.c.bf16 %v776_v63, %v774_v62  ;;  %v1009_v62 = vld [vmem:[#allocation13 + $0x8] sm:$0xff]  ;;  %v1012_v63 = vld [vmem:[#allocation13 + $0x20] sm:$0xff] }
 0x656   :  { %v702_v7 = vadd.f32 %v4392_v1, %v701_v6  ;;  %v781_v1 = vld [vmem:[#allocation9 + $0xf8] sm:$0xff]  ;;  %v778_v6 = vld [vmem:[#allocation9 + $0xe0] sm:$0xff] }
 0x657   :  { %v711_v8 = vmax.f32 %v707_v5, 0.0  ;;  %v5566_v5 = vpack.c.bf16 %v781_v1, %v779_v0  ;;  %5565 = vmatpush1.bf16.msra.mxu1 %v5564_v3  ;;  %v1008_v0 = vld [vmem:[#allocation13] sm:$0xff]  ;;  %v5574_v1 = vpack.c.bf16 %v1012_v63, %v1009_v62  ;;  %v1011_v3 = vld [vmem:[#allocation13 + $0x18] sm:$0xff]  ;;  %v1037_v62 = vld [vmem:[#allocation13 + $0xe8] sm:$0xff] }
 0x658   :  { %v710_v9 = vmax.f32 %v702_v7, 0.0  ;;  %v780_v7 = vld [vmem:[#allocation9 + $0xf0] sm:$0xff] }
 0x659   :  { %716 = vadd.xlane.f32.xlu1 %v711_v8  ;;  %5567 = vmatprep.subr.bf16.mxu1 %v5566_v5  ;;  %v1015_v5 = vld [vmem:[#allocation13 + $0x38] sm:$0xff]  ;;  %v1038_v63 = vld [vmem:[#allocation13 + $0xf0] sm:$0xff] }
 0x65a   :  { %714 = vadd.xlane.f32.xlu0 %v710_v9 }
 0x6e6   :  { %v717_v31 = vpop.xlane.xlu1 %716 }
 0x6e7   :  { %v719_v32 = vmul.f32 0.03125, %v717_v31  ;;  %v715_v33 = vpop.xlane.xlu0 %714 }
 0x6e8   :  { %v718_v34 = vmul.f32 0.03125, %v715_v33 }
 0x6e9   :  { %v721_v35 = vsub.f32 %v711_v8, %v719_v32  ;;  %v5568_v8 = vpack.c.bf16 %v780_v7, %v778_v6  ;;  %v7070_v32 = vshrl.u32 %v436_v18, 7  ;;  %v1018_v6 = vld [vmem:[#allocation13 + $0x50] sm:$0xff]  ;;  %v5576_v7 = vpack.c.bf16 %v1011_v3, %v1008_v0  ;;  %v1041_v0 = vld [vmem:[#allocation13 + $0x108] sm:$0xff] }
 0x6ea   :  { %v720_v36 = vsub.f32 %v710_v9, %v718_v34  ;;  %v881_v9 = vld [vmem:[%s7742_s2] sm:$0xff]  ;;  %v5596_v3 = vpack.c.bf16 %v1041_v0, %v1038_v63  ;;  %v7127_v0 = vsel %vm981_vm8, 1.0, %v6704_v22 }
 0x6eb   :  { %v7051_v37 = vmul.f32 %v7037_v23, %v721_v35  ;;  %5569 = vmatpush1.bf16.msra.mxu1 %v5568_v8  ;;  %v5570_v11 = vpack.c.bf16 %v882_v10, %v881_v9  ;;  %v7073_v33 = vsub.s32 0, %v7070_v32  ;;  %v782_v34 = vld [vmem:[#allocation10] sm:$0x3]  ;;  %v7077_v48 = vsub.s32 1, %v7070_v32  ;;  %v1010_v9 = vld [vmem:[#allocation13 + $0x10] sm:$0xff]  ;;  %v1013_v10 = vld [vmem:[#allocation13 + $0x28] sm:$0xff] }
 0x6ec   :  { %v7054_v38 = vmul.f32 %v7037_v23, %v720_v36  ;;  %v5578_v8 = vpack.c.bf16 %v1018_v6, %v1015_v5  ;;  %v1045_v5 = vld [vmem:[#allocation13 + $0x128] sm:$0xff]  ;;  %v1048_v6 = vld [vmem:[#allocation13 + $0x140] sm:$0xff] }
 0x6ed   :  { %v725_v39 = vmul.f32 %v7051_v37, %v7051_v37  ;;  %5571 = vmatprep.subr.bf16.mxu0 %v5570_v11  ;;  %v787_v35 = vrot.slane %v782_v34, %v7073_v33  ;;  %v791_v50 = vrot.slane %v782_v34, %v7077_v48 }
 0x6ee   :  { %v724_v40 = vmul.f32 %v7054_v38, %v7054_v38  ;;  %5573 = vmatpush3.bf16.msra.mxu0 %v5570_v11  ;;  %v1014_v11 = vld [vmem:[#allocation13 + $0x30] sm:$0xff] }
 0x6ef   :  { %728 = vadd.xlane.f32.xlu1 %v725_v39  ;;  %5575 = vmatprep.subr.bf16.mxu0 %v5574_v1 }
 0x6f0   :  { %726 = vadd.xlane.f32.xlu0 %v724_v40 }
 0x6f1   :  { %4894 = vmatmul.mubr.msk.f32.vlgmr.msra.gmra.mrb[4].mxu0 %vm350_vm0, %v7025_v4 }
 0x6f2   :  { %1226 = vmatprep.mubr.f32.mxu0 %v6704_v22  ;;  %5577 = vmatpush1.bf16.msra.mxu0 %v5576_v7  ;;  %v1040_v7 = vld [vmem:[#allocation13 + $0x100] sm:$0xff] }
 0x6f3   :  { %5579 = vmatprep.subr.bf16.mxu0 %v5578_v8  ;;  %v5598_v8 = vpack.c.bf16 %v1048_v6, %v1045_v5 }
 0x77c   :  { %v729_v12 = vpop.xlane.xlu1 %728 }
 0x77d   :  { %v731_v13 = vmul.f32 0.03125, %v729_v12  ;;  %v727_v14 = vpop.xlane.xlu0 %726  ;;  %v5606_v12 = vpack.c.bf16 %v1013_v10, %v1010_v9  ;;  %v1043_v9 = vld [vmem:[#allocation13 + $0x118] sm:$0xff]  ;;  %v1044_v10 = vld [vmem:[#allocation13 + $0x120] sm:$0xff] }
 0x77e   :  { %v730_v15 = vmul.f32 0.03125, %v727_v14  ;;  %v1021_v14 = vld [vmem:[#allocation13 + $0x68] sm:$0xff] }
 0x77f   :  { %v733_v16 = vadd.f32 1e-05, %v731_v13  ;;  %v1017_v13 = vld [vmem:[#allocation13 + $0x48] sm:$0xff]  ;;  %5607 = vmatprep.subr.bf16.mxu1 %v5606_v12 }
 0x780   :  { %v732_v17 = vadd.f32 1e-05, %v730_v15  ;;  %v1024_v15 = vld [vmem:[#allocation13 + $0x80] sm:$0xff] }
 0x781   :  { %6113 = vrsqrt.f32 %v733_v16  ;;  %v5580_v16 = vpack.c.bf16 %v1017_v13, %v1014_v11  ;;  %v1047_v11 = vld [vmem:[#allocation13 + $0x138] sm:$0xff] }
 0x782   :  { %6115 = vrsqrt.f32 %v732_v17  ;;  %v1016_v17 = vld [vmem:[#allocation13 + $0x40] sm:$0xff]  ;;  %v5600_v13 = vpack.c.bf16 %v1047_v11, %v1044_v10 }
 0x783   :  { %5581 = vmatpush1.bf16.msra.mxu0 %v5580_v16  ;;  %v1046_v16 = vld [vmem:[#allocation13 + $0x130] sm:$0xff] }
 0x78b   :  { %v6114_v20 = vpop.eup %6113 }
 0x78c   :  { %v6116_v21 = vpop.eup %6115  ;;  %v737_v25 = vmul.f32 %v6114_v20, %v7051_v37  ;;  %v1019_v20 = vld [vmem:[#allocation13 + $0x58] sm:$0xff] }
 0x78d   :  { %v736_v24 = vmul.f32 %v6116_v21, %v7054_v38  ;;  %v5582_v21 = vpack.c.bf16 %v1024_v15, %v1021_v14  ;;  %v1051_v14 = vld [vmem:[#allocation13 + $0x158] sm:$0xff]  ;;  %v1054_v15 = vld [vmem:[#allocation13 + $0x170] sm:$0xff] }
 0x78e   :  { %v743_v28 = vmul.f32 %v4393_v2, %v737_v25  ;;  %v1023_v25 = vld [vmem:[#allocation13 + $0x78] sm:$0xff] }
 0x78f   :  { %v742_v27 = vmul.f32 %v4393_v2, %v736_v24  ;;  %v5610_v2 = vpack.c.bf16 %v1019_v20, %v1016_v17  ;;  %v1020_v24 = vld [vmem:[#allocation13 + $0x60] sm:$0xff]  ;;  %5583 = vmatprep.subr.bf16.mxu0 %v5582_v21  ;;  %v5602_v17 = vpack.c.bf16 %v1054_v15, %v1051_v14  ;;  %v1049_v20 = vld [vmem:[#allocation13 + $0x148] sm:$0xff]  ;;  %v1050_v21 = vld [vmem:[#allocation13 + $0x150] sm:$0xff]  ;;  %v7148_v14 = vsel %vm991_vm15, 1.0, %v6704_v22 }
 0x790   :  { %v749_v29 = vadd.f32 %v4394_v26, %v743_v28 }
 0x791   :  { %v748_v4 = vadd.f32 %v4394_v26, %v742_v27  ;;  %v5584_v26 = vpack.c.bf16 %v1023_v25, %v1020_v24  ;;  %v5630_v24 = vpack.c.bf16 %v1049_v20, %v1046_v16 }
 0x793   :  { %859 = vmatmul.mubr.f32.vlgmr.msra.gmra.mrb[2].mxu1 %v748_v4  ;;  %5585 = vmatpush1.bf16.msra.mxu0 %v5584_v26  ;;  %v1052_v26 = vld [vmem:[#allocation13 + $0x160] sm:$0xff] }
 0x794   :  { %864 = vmatprep.mubr.f32.mxu1 %v6704_v22  ;;  %5609 = vmatpush3.bf16.msra.mxu1 %v5606_v12  ;;  %v5626_v12 = vpack.c.bf16 %v1043_v9, %v1040_v7 }
 0x795   :  { %5611 = vmatprep.subr.bf16.mxu1 %v5610_v2 }
 0x797   :  { %865 = vmatmul.mubr.f32.gmra.mrb[4].mxu1 %v749_v29 }
 0x798   :  { %5613 = vmatpush3.bf16.msra.mxu1 %v5610_v2  ;;  %v1053_v2 = vld [vmem:[#allocation13 + $0x168] sm:$0xff] }
 0x799   :  { %v5604_v25 = vpack.c.bf16 %v1053_v2, %v1050_v21  ;;  %v7163_v2 = vsel %vm996_vm5, 1.0, %v6704_v22 }
 0x7c4   :  { %v4895_v30 = vpop.f32.mrb[4].mxu0 }
 0x7c5   :  { %v956_v31 = vpop.f32.mrb[5].mxu0  ;;  %v962_v60 = vadd.f32 %v4895_v30, %v4395_v51 }
 0x7c6   :  { %v957_v53 = vadd.f32 %v4395_v51, %v956_v31  ;;  %v1031_v51 = vld [vmem:[#allocation13 + $0xb8] sm:$0xff] }
 0x866   :  { %v860_v36 = vpop.f32.mrb[2].mxu1 }
 0x867   :  { %v861_v37 = vadd.f32 %v860_v36, %v787_v35  ;;  %v862_v38 = vpop.f32.mrb[3].mxu1 }
 0x868   :  { %v863_v52 = vadd.f32 %v862_v38, %v791_v50  ;;  %v1027_v38 = vld [vmem:[#allocation13 + $0x98] sm:$0xff] }
 0x869   :  { %v871_v39 = vsub.f32 0.0, %v861_v37 }
 0x86a   :  { %v866_v40 = vpop.f32.mrb[4].mxu1 }
 0x86b   :  { %v873_v41 = vmul.f32 1.442695, %v871_v39  ;;  %v867_v42 = vadd.f32 %v866_v40, %v787_v35  ;;  %v868_v43 = vpop.f32.mrb[5].mxu1  ;;  %v1030_v39 = vld [vmem:[#allocation13 + $0xb0] sm:$0xff] }
 0x86c   :  { %v869_v56 = vadd.f32 %v868_v43, %v791_v50  ;;  %v1022_v40 = vld [vmem:[#allocation13 + $0x70] sm:$0xff] }
 0x86d   :  { %6117 = vpow2.f32 %v873_v41  ;;  %v872_v44 = vsub.f32 0.0, %v867_v42  ;;  %v5586_v41 = vpack.c.bf16 %v1030_v39, %v1027_v38  ;;  %v1025_v42 = vld [vmem:[#allocation13 + $0x88] sm:$0xff]  ;;  %v1026_v43 = vld [vmem:[#allocation13 + $0x90] sm:$0xff]  ;;  %v1074_v38 = vld [vmem:[%s7743_s7] sm:$0x3] }
 0x86e   :  { %v1075_v39 = vld [vmem:[%s7744_s27] sm:$0x3] }
 0x86f   :  { %v875_v45 = vmul.f32 1.442695, %v872_v44  ;;  %v1029_v44 = vld [vmem:[#allocation13 + $0xa8] sm:$0xff]  ;;  %5587 = vmatprep.subr.bf16.mxu0 %v5586_v41 }
 0x871   :  { %6119 = vpow2.f32 %v875_v45  ;;  %v5614_v45 = vpack.c.bf16 %v1025_v42, %v1022_v40  ;;  %v1137_v40 = vrot.slane %v1074_v38, %v7073_v33 }
 0x873   :  { %5615 = vmatprep.subr.bf16.mxu1 %v5614_v45 }
 0x874   :  { %5617 = vmatpush3.bf16.msra.mxu1 %v5614_v45 }
 0x877   :  { %v6118_v18 = vpop.eup %6117 }
 0x878   :  { %v877_v46 = vadd.f32 1.0, %v6118_v18  ;;  %v5588_v18 = vpack.c.bf16 %v1029_v44, %v1026_v43  ;;  %v1143_v43 = vrot.slane %v1075_v39, %v7073_v33 }
 0x87a   :  { %6121 = vrcp.f32 %v877_v46  ;;  %5589 = vmatpush1.bf16.msra.mxu0 %v5588_v18  ;;  %v1033_v46 = vld [vmem:[#allocation13 + $0xc8] sm:$0xff] }
 0x87b   :  { %v6120_v47 = vpop.eup %6119 }
 0x87c   :  { %v878_v49 = vadd.f32 1.0, %v6120_v47  ;;  %v1036_v47 = vld [vmem:[#allocation13 + $0xe0] sm:$0xff] }
 0x87d   :  { %v5590_v50 = vpack.c.bf16 %v1036_v47, %v1033_v46 }
 0x87e   :  { %6123 = vrcp.f32 %v878_v49  ;;  %v1028_v49 = vld [vmem:[#allocation13 + $0xa0] sm:$0xff] }
 0x87f   :  { %5591 = vmatprep.subr.bf16.mxu0 %v5590_v50  ;;  %v1056_v50 = vld [vmem:[%s7745_s18] sm:$0x7] }
 0x884   :  { %v6122_v54 = vpop.eup %6121 }
 0x885   :  { %v965_v55 = vmul.f32 %v6122_v54, %v863_v52  ;;  %v1032_v52 = vld [vmem:[#allocation13 + $0xc0] sm:$0xff]  ;;  %v5618_v54 = vpack.c.bf16 %v1031_v51, %v1028_v49  ;;  %v1157_v51 = vsub.s32 2, %v7070_v32 }
 0x887   :  { %v7080_v57 = vadd.f32 %v965_v55, %v957_v53  ;;  %v1035_v53 = vld [vmem:[#allocation13 + $0xd8] sm:$0xff]  ;;  %5619 = vmatprep.subr.bf16.mxu1 %v5618_v54 }
 0x888   :  { %v6124_v58 = vpop.eup %6123  ;;  %v5592_v55 = vpack.c.bf16 %v1035_v53, %v1032_v52  ;;  %5621 = vmatpush3.bf16.msra.mxu1 %v5618_v54  ;;  %v1154_v52 = vrot.slane %v1056_v50, %v7077_v48  ;;  %v1158_v53 = vrot.slane %v1056_v50, %v1157_v51 }
 0x889   :  { %v966_v59 = vmul.f32 %v6124_v58, %v869_v56  ;;  %1110 = vadd.xlane.f32.xlu0 %v7080_v57  ;;  %v1039_v56 = vld [vmem:[#allocation13 + $0xf8] sm:$0xff]  ;;  %v1042_v58 = vld [vmem:[#allocation13 + $0x110] sm:$0xff] }
 0x88a   :  { %5593 = vmatpush1.bf16.msra.mxu0 %v5592_v55 }
 0x88b   :  { %v7083_v61 = vadd.f32 %v966_v59, %v962_v60  ;;  %v1034_v59 = vld [vmem:[#allocation13 + $0xd0] sm:$0xff]  ;;  %v5594_v60 = vpack.c.bf16 %v1042_v58, %v1039_v56  ;;  %v7117_v56 = vsel %vm970_vm4, 1.0, %v6704_v22  ;;  %vm1000_vm4 = vcmp.lt.s32.totalorder %v7031_v19, 28 }
 0x88c   :  { %v5622_v1 = vpack.c.bf16 %v1037_v62, %v1034_v59  ;;  %v7122_v59 = vsel %vm976_vm7, 1.0, %v6704_v22  ;;  %vm1001_vm6 = vmand %vm999_vm3, %vm1000_vm4  ;;  %vm1004_vm7 = vcmp.ge.s32.totalorder %v7031_v19, 28 }
 0x88d   :  { %1112 = vadd.xlane.f32.xlu1 %v7083_v61  ;;  %5595 = vmatprep.subr.bf16.mxu0 %v5594_v60  ;;  %vm1005_vm8 = vmand %vm1004_vm7, %vm438_vm1  ;;  %vm1429_vm1 = vcmask 64512  }
 0x88e   :  { %5623 = vmatprep.subr.bf16.mxu1 %v5622_v1  ;;  %5597 = vmatpush1.bf16.msra.mxu0 %v5596_v3 }
 0x88f   :  { %5625 = vmatpush3.bf16.msra.mxu1 %v5622_v1  ;;  %5599 = vmatprep.subr.bf16.mxu0 %v5598_v8 }
 0x890   :  { %5627 = vmatprep.subr.bf16.mxu1 %v5626_v12 }
 0x892   :  { %5601 = vmatpush1.bf16.msra.mxu0 %v5600_v13  ;;  %v7145_v13 = vsel %vm7129_vm13, 1.0, %v6704_v22 }
 0x893   :  { %5629 = vmatpush3.bf16.msra.mxu1 %v5626_v12  ;;  %5603 = vmatprep.subr.bf16.mxu0 %v5602_v17 }
 0x894   :  { %5631 = vmatprep.subr.bf16.mxu1 %v5630_v24 }
 0x896   :  { %5605 = vmatpush1.bf16.msra.mxu0 %v5604_v25  ;;  %v7167_v25 = vsel %vm1001_vm6, 1.0, %v6704_v22 }
 0x897   :  { %5633 = vmatpush3.bf16.msra.mxu1 %v5630_v24 }
 0x916   :  { %v1111_v27 = vpop.xlane.xlu0 %1110 }
 0x917   :  { %v1114_v4 = vmul.f32 0.03125, %v1111_v27  ;;  %v1055_v27 = vld [vmem:[#allocation13 + $0x178] sm:$0xff] }
 0x919   :  { %v1116_v28 = vsub.f32 %v7080_v57, %v1114_v4  ;;  %v5634_v4 = vpack.c.bf16 %v1055_v27, %v1052_v26 }
 0x91a   :  { %v1113_v29 = vpop.xlane.xlu1 %1112 }
 0x91b   :  { %v1115_v30 = vmul.f32 0.03125, %v1113_v29  ;;  %v7088_v31 = vmul.f32 %v7037_v23, %v1116_v28  ;;  %5635 = vmatprep.subr.bf16.mxu1 %v5634_v4 }
 0x91c   :  { %5637 = vmatpush3.bf16.msra.mxu1 %v5634_v4 }
 0x91d   :  { %v1117_v34 = vsub.f32 %v7083_v61, %v1115_v30  ;;  %v1120_v35 = vmul.f32 %v7088_v31, %v7088_v31 }
 0x91f   :  { %1122 = vadd.xlane.f32.xlu0 %v1120_v35  ;;  %v7094_v36 = vmul.f32 %v7037_v23, %v1117_v34 }
 0x921   :  { %v1121_v37 = vmul.f32 %v7094_v36, %v7094_v36 }
 0x923   :  { %1124 = vadd.xlane.f32.xlu1 %v1121_v37 }
 0x9ac   :  { %v1123_v28 = vpop.xlane.xlu0 %1122 }
 0x9ad   :  { %v1126_v29 = vmul.f32 0.03125, %v1123_v28  ;;  %v7175_v28 = vsel %vm1005_vm8, 1.0, %v6704_v22 }
 0x9af   :  { %v1128_v30 = vadd.f32 1e-05, %v1126_v29 }
 0x9b0   :  { %v1125_v34 = vpop.xlane.xlu1 %1124 }
 0x9b1   :  { %6125 = vrsqrt.f32 %v1128_v30  ;;  %v1127_v35 = vmul.f32 0.03125, %v1125_v34 }
 0x9b3   :  { %v1129_v37 = vadd.f32 1e-05, %v1127_v35 }
 0x9b5   :  { %6127 = vrsqrt.f32 %v1129_v37 }
 0x9bb   :  { %v6126_v41 = vpop.eup %6125 }
 0x9bc   :  { %v1132_v42 = vmul.f32 %v6126_v41, %v7088_v31  ;;  %v1150_v31 = vrot.slane %v1056_v50, %v7073_v33 }
 0x9be   :  { %v1138_v44 = vmul.f32 %v1137_v40, %v1132_v42 }
 0x9bf   :  { %v6128_v45 = vpop.eup %6127 }
 0x9c0   :  { %v1144_v18 = vadd.f32 %v1143_v43, %v1138_v44  ;;  %v1133_v46 = vmul.f32 %v6128_v45, %v7094_v36 }
 0x9c2   :  { %1227 = vmatmul.mubr.f32.vlgmr.msra.gmra.mrb[6].mxu0 %v1144_v18  ;;  %4928 = vmatprep.mubr.f32.mxu1 %v1144_v18  ;;  %v1139_v47 = vmul.f32 %v1137_v40, %v1133_v46 }
 0x9c3   :  { %1232 = vmatprep.mubr.f32.mxu0 %v6704_v22 }
 0x9c4   :  { %v1145_v49 = vadd.f32 %v1143_v43, %v1139_v47 }
 0x9c6   :  { %1233 = vmatmul.mubr.f32.gmra.mrb[8].mxu0 %v1145_v49  ;;  %4929 = vmatmul.mubr.f32.vlgmr.msra.gmra.mrb[6].mxu1 %v1145_v49 }
 0xa95   :  { %v1228_v36 = vpop.f32.mrb[6].mxu0 }
 0xa96   :  { %v1229_v54 = vadd.f32 %v1228_v36, %v1150_v31  ;;  %v1230_v55 = vpop.f32.mrb[7].mxu0 }
 0xa97   :  { %v1231_v58 = vadd.f32 %v1230_v55, %v1154_v52 }
 0xa98   :  { %v1314_v60 = vmul.f32 0.5, %v1229_v54 }
 0xa99   :  { %v1234_v62 = vpop.f32.mrb[8].mxu0  ;;  %v4930_v63 = vpop.f32.mrb[6].mxu1  ;;  %4931 = vmatprep.subr.mxu0 %v1231_v58 }
 0xa9a   :  { %v1235_v3 = vadd.f32 %v1234_v62, %v1150_v31  ;;  %v1236_v5 = vpop.f32.mrb[9].mxu0  ;;  %v1305_v6 = vpop.f32.mrb[7].mxu1  ;;  %4932 = vmatpush3.xpose.msra.mxu0 %v1231_v58  ;;  %v1316_v7 = vmul.f32 %v7117_v56, %v1314_v60  ;;  %v1317_v8 = vmul.f32 %v7122_v59, %v1314_v60  ;;  %v1318_v12 = vmul.f32 %v7127_v0, %v1314_v60 }
 0xa9b   :  { %v1237_v9 = vadd.f32 %v1236_v5, %v1154_v52  ;;  %v1306_v10 = vadd.f32 %v1305_v6, %v1158_v53  ;;  %v7152_v15 = vadd.f32 %v4930_v63, %v1158_v53  ;;  %v1319_v20 = vmul.f32 %v7145_v13, %v1314_v60 }
 0xa9c   :  { %v1315_v11 = vmul.f32 0.5, %v1235_v3  ;;  %4933 = vmatprep.mubr.f32.mxu0 %v1316_v7  ;;  %v1320_v21 = vmul.f32 %v7148_v14, %v1314_v60  ;;  %v1321_v26 = vmul.f32 %v7163_v2, %v1314_v60  ;;  %v1322_v4 = vmul.f32 %v7167_v25, %v1314_v60 }
 0xa9d   :  { %4934 = vmatmul.mubr.f32.vlgmr.msra.gmra.mrb[10].mxu0 %v1317_v8  ;;  %4945 = vmatprep.subr.mxu0 %v1306_v10  ;;  %v1323_v30 = vmul.f32 %v7175_v28, %v1314_v60 }
 0xa9e   :  { %4959 = vmatprep.subr.mxu1 %v1237_v9  ;;  %4936 = vmatprep.mubr.f32.mxu0 %v1318_v12  ;;  %v1662_v16 = vmul.f32 %v7117_v56, %v1315_v11  ;;  %v1663_v17 = vmul.f32 %v7122_v59, %v1315_v11  ;;  %v1664_v24 = vmul.f32 %v7127_v0, %v1315_v11 }
 0xa9f   :  { %4946 = vmatpush3.msra.mxu0 %v1306_v10  ;;  %4960 = vmatpush3.xpose.msra.mxu1 %v1237_v9  ;;  %v1665_v27 = vmul.f32 %v7145_v13, %v1315_v11  ;;  %v1666_v29 = vmul.f32 %v7148_v14, %v1315_v11  ;;  %v1667_v34 = vmul.f32 %v7163_v2, %v1315_v11 }
 0xaa0   :  { %4973 = vmatprep.subr.mxu0 %v7152_v15  ;;  %4961 = vmatprep.mubr.f32.mxu1 %v1662_v16  ;;  %v1668_v35 = vmul.f32 %v7167_v25, %v1315_v11  ;;  %v1669_v37 = vmul.f32 %v7175_v28, %v1315_v11 }
 0xaa1   :  { %4937 = vmatmul.mubr.f32.gmra.mrb[12].mxu0 %v1319_v20 }
 0xaa2   :  { %4962 = vmatmul.mubr.f32.vlgmr.msra.gmra.mrb[8].mxu1 %v1663_v17  ;;  %4939 = vmatprep.mubr.f32.mxu0 %v1320_v21 }
 0xaa3   :  { %4964 = vmatprep.mubr.f32.mxu1 %v1664_v24 }
 0xaa5   :  { %4940 = vmatmul.mubr.f32.gmra.mrb[14].mxu0 %v1321_v26 }
 0xaa6   :  { %4965 = vmatmul.mubr.f32.gmra.mrb[10].mxu1 %v1665_v27  ;;  %4942 = vmatprep.mubr.f32.mxu0 %v1322_v4 }
 0xaa7   :  { %4967 = vmatprep.mubr.f32.mxu1 %v1666_v29 }
 0xaa9   :  { %4943 = vmatmul.mubr.f32.gmra.mrb[16].mxu0 %v1323_v30 }
 0xaaa   :  { %4968 = vmatmul.mubr.f32.gmra.mrb[12].mxu1 %v1667_v34 }
 0xaab   :  { %4970 = vmatprep.mubr.f32.mxu1 %v1668_v35 }
 0xaae   :  { %4971 = vmatmul.mubr.f32.gmra.mrb[14].mxu1 %v1669_v37 }
 0xb70   :  { %v4935_v38 = vpop.f32.mrb[10].mxu0 }
 0xb71   :  { %v1390_v39 = vpop.f32.mrb[11].mxu0  ;;  %v1433_v40 = vsel %vm1429_vm1, %v4935_v38, -inf }
 0xb72   :  { %1434 = vmax.xlane.f32.xlu1 %v1433_v40  ;;  %v1430_v41 = vsel %vm1429_vm1, %v1390_v39, -inf }
 0xb73   :  { %1431 = vmax.xlane.f32.xlu0 %v1430_v41 }
 0xb74   :  { %v4938_v42 = vpop.f32.mrb[12].mxu0 }
 0xb75   :  { %v7184_v43 = vpop.f32.mrb[8].mxu1  ;;  %v1400_v44 = vpop.f32.mrb[13].mxu0  ;;  %v1439_v45 = vsel %vm1429_vm1, %v4938_v42, -inf }
 0xb76   :  { %v7187_v18 = vpop.f32.mrb[9].mxu1  ;;  %1440 = vmax.xlane.f32.xlu1 %v1439_v45  ;;  %v1436_v46 = vsel %vm1429_vm1, %v1400_v44, -inf  ;;  %v1778_v1 = vsel %vm1429_vm1, %v7184_v43, -inf }
 0xb77   :  { %1437 = vmax.xlane.f32.xlu0 %v1436_v46  ;;  %v1775_v5 = vsel %vm1429_vm1, %v7187_v18, -inf }
 0xb78   :  { %v4941_v47 = vpop.f32.mrb[14].mxu0 }
 0xb79   :  { %v7190_v49 = vpop.f32.mrb[10].mxu1  ;;  %v1410_v50 = vpop.f32.mrb[15].mxu0  ;;  %v1445_v31 = vsel %vm1429_vm1, %v4941_v47, -inf }
 0xb7a   :  { %v7193_v52 = vpop.f32.mrb[11].mxu1  ;;  %1446 = vmax.xlane.f32.xlu1 %v1445_v31  ;;  %v1442_v36 = vsel %vm1429_vm1, %v1410_v50, -inf  ;;  %v1784_v6 = vsel %vm1429_vm1, %v7190_v49, -inf }
 0xb7b   :  { %1443 = vmax.xlane.f32.xlu0 %v1442_v36  ;;  %v1781_v7 = vsel %vm1429_vm1, %v7193_v52, -inf }
 0xb7c   :  { %v4944_v53 = vpop.f32.mrb[16].mxu0 }
 0xb7d   :  { %v7196_v54 = vpop.f32.mrb[12].mxu1  ;;  %v1420_v55 = vpop.f32.mrb[17].mxu0  ;;  %v1451_v58 = vsel %vm1429_vm1, %v4944_v53, -inf }
 0xb7e   :  { %v7199_v60 = vpop.f32.mrb[13].mxu1  ;;  %1452 = vmax.xlane.f32.xlu1 %v1451_v58  ;;  %v1448_v62 = vsel %vm1429_vm1, %v1420_v55, -inf  ;;  %v1790_v8 = vsel %vm1429_vm1, %v7196_v54, -inf }
 0xb7f   :  { %1449 = vmax.xlane.f32.xlu0 %v1448_v62  ;;  %v1787_v9 = vsel %vm1429_vm1, %v7199_v60, -inf }
 0xb81   :  { %v7202_v63 = vpop.f32.mrb[14].mxu1 }
 0xb82   :  { %v7206_v3 = vpop.f32.mrb[15].mxu1  ;;  %1779 = vmax.xlane.f32.xlu1 %v1778_v1  ;;  %v1796_v10 = vsel %vm1429_vm1, %v7202_v63, -inf }
 0xb83   :  { %1776 = vmax.xlane.f32.xlu0 %v1775_v5  ;;  %v1793_v11 = vsel %vm1429_vm1, %v7206_v3, -inf }
 0xb86   :  { %1785 = vmax.xlane.f32.xlu1 %v1784_v6 }
 0xb87   :  { %1782 = vmax.xlane.f32.xlu0 %v1781_v7 }
 0xb8a   :  { %1791 = vmax.xlane.f32.xlu1 %v1790_v8 }
 0xb8b   :  { %1788 = vmax.xlane.f32.xlu0 %v1787_v9 }
 0xb8e   :  { %1797 = vmax.xlane.f32.xlu1 %v1796_v10 }
 0xb8f   :  { %1794 = vmax.xlane.f32.xlu0 %v1793_v11 }
 0xbff   :  { %v1435_v12 = vpop.xlane.xlu1 %1434 }
 0xc00   :  { %v1455_v16 = vsub.f32 %v4935_v38, %v1435_v12  ;;  %v1432_v17 = vpop.xlane.xlu0 %1431 }
 0xc01   :  { %v1454_v20 = vsub.f32 %v1390_v39, %v1432_v17 }
 0xc02   :  { %v1464_v21 = vmul.f32 1.442695, %v1455_v16 }
 0xc03   :  { %v1462_v24 = vmul.f32 1.442695, %v1454_v20  ;;  %v1441_v26 = vpop.xlane.xlu1 %1440 }
 0xc04   :  { %6129 = vpow2.f32 %v1464_v21  ;;  %v1457_v27 = vsub.f32 %v4938_v42, %v1441_v26  ;;  %v1438_v4 = vpop.xlane.xlu0 %1437 }
 0xc05   :  { %6131 = vpow2.f32 %v1462_v24  ;;  %v1456_v29 = vsub.f32 %v1400_v44, %v1438_v4 }
 0xc06   :  { %v1468_v30 = vmul.f32 1.442695, %v1457_v27 }
 0xc07   :  { %v1466_v34 = vmul.f32 1.442695, %v1456_v29  ;;  %v1447_v35 = vpop.xlane.xlu1 %1446 }
 0xc08   :  { %6133 = vpow2.f32 %v1468_v30  ;;  %v1459_v37 = vsub.f32 %v4941_v47, %v1447_v35  ;;  %v1444_v40 = vpop.xlane.xlu0 %1443 }
 0xc09   :  { %6135 = vpow2.f32 %v1466_v34  ;;  %v1458_v41 = vsub.f32 %v1410_v50, %v1444_v40 }
 0xc0a   :  { %v1472_v45 = vmul.f32 1.442695, %v1459_v37 }
 0xc0b   :  { %v1470_v38 = vmul.f32 1.442695, %v1458_v41  ;;  %v1453_v46 = vpop.xlane.xlu1 %1452 }
 0xc0c   :  { %6137 = vpow2.f32 %v1472_v45  ;;  %v1461_v39 = vsub.f32 %v4944_v53, %v1453_v46  ;;  %v1450_v31 = vpop.xlane.xlu0 %1449 }
 0xc0d   :  { %6139 = vpow2.f32 %v1470_v38  ;;  %v1460_v36 = vsub.f32 %v1420_v55, %v1450_v31 }
 0xc0e   :  { %v7222_v42 = vpop.eup %6129  ;;  %v1476_v58 = vmul.f32 1.442695, %v1461_v39 }
 0xc0f   :  { %v7224_v44 = vpop.eup %6131  ;;  %v1474_v62 = vmul.f32 1.442695, %v1460_v36  ;;  %v1780_v1 = vpop.xlane.xlu1 %1779  ;;  %v1481_v47 = vsel %vm1429_vm1, %v7222_v42, 0.0 }
 0xc10   :  { %6141 = vpow2.f32 %v1476_v58  ;;  %v1800_v50 = vsub.f32 %v7184_v43, %v1780_v1  ;;  %1482 = vadd.xlane.f32.xlu1 %v1481_v47  ;;  %v1777_v5 = vpop.xlane.xlu0 %1776  ;;  %v1478_v53 = vsel %vm1429_vm1, %v7224_v44, 0.0 }
 0xc11   :  { %6143 = vpow2.f32 %v1474_v62  ;;  %v1799_v55 = vsub.f32 %v7187_v18, %v1777_v5  ;;  %1479 = vadd.xlane.f32.xlu0 %v1478_v53 }
 0xc12   :  { %v7232_v6 = vpop.eup %6133  ;;  %v1809_v7 = vmul.f32 1.442695, %v1800_v50 }
 0xc13   :  { %v7234_v8 = vpop.eup %6135  ;;  %v1807_v9 = vmul.f32 1.442695, %v1799_v55  ;;  %v1786_v10 = vpop.xlane.xlu1 %1785  ;;  %v1487_v11 = vsel %vm1429_vm1, %v7232_v6, 0.0 }
 0xc14   :  { %6145 = vpow2.f32 %v1809_v7  ;;  %v1802_v43 = vsub.f32 %v7190_v49, %v1786_v10  ;;  %1488 = vadd.xlane.f32.xlu1 %v1487_v11  ;;  %v1783_v12 = vpop.xlane.xlu0 %1782  ;;  %v1484_v16 = vsel %vm1429_vm1, %v7234_v8, 0.0 }
 0xc15   :  { %6147 = vpow2.f32 %v1807_v9  ;;  %v1801_v18 = vsub.f32 %v7193_v52, %v1783_v12  ;;  %1485 = vadd.xlane.f32.xlu0 %v1484_v16 }
 0xc16   :  { %v7242_v17 = vpop.eup %6137  ;;  %v1813_v20 = vmul.f32 1.442695, %v1802_v43 }
 0xc17   :  { %v7244_v21 = vpop.eup %6139  ;;  %v1811_v24 = vmul.f32 1.442695, %v1801_v18  ;;  %v1792_v26 = vpop.xlane.xlu1 %1791  ;;  %v1493_v27 = vsel %vm1429_vm1, %v7242_v17, 0.0 }
 0xc18   :  { %6149 = vpow2.f32 %v1813_v20  ;;  %v1804_v49 = vsub.f32 %v7196_v54, %v1792_v26  ;;  %1494 = vadd.xlane.f32.xlu1 %v1493_v27  ;;  %v1789_v4 = vpop.xlane.xlu0 %1788  ;;  %v1490_v29 = vsel %vm1429_vm1, %v7244_v21, 0.0 }
 0xc19   :  { %6151 = vpow2.f32 %v1811_v24  ;;  %v1803_v52 = vsub.f32 %v7199_v60, %v1789_v4  ;;  %1491 = vadd.xlane.f32.xlu0 %v1490_v29 }
 0xc1a   :  { %v7252_v30 = vpop.eup %6141  ;;  %v1817_v34 = vmul.f32 1.442695, %v1804_v49 }
 0xc1b   :  { %v7254_v35 = vpop.eup %6143  ;;  %v1815_v37 = vmul.f32 1.442695, %v1803_v52  ;;  %v1798_v40 = vpop.xlane.xlu1 %1797  ;;  %v1499_v41 = vsel %vm1429_vm1, %v7252_v30, 0.0 }
 0xc1c   :  { %6153 = vpow2.f32 %v1817_v34  ;;  %v1806_v54 = vsub.f32 %v7202_v63, %v1798_v40  ;;  %1500 = vadd.xlane.f32.xlu1 %v1499_v41  ;;  %v1795_v45 = vpop.xlane.xlu0 %1794  ;;  %v1496_v38 = vsel %vm1429_vm1, %v7254_v35, 0.0 }
 0xc1d   :  { %6155 = vpow2.f32 %v1815_v37  ;;  %v1805_v60 = vsub.f32 %v7206_v3, %v1795_v45  ;;  %1497 = vadd.xlane.f32.xlu0 %v1496_v38 }
 0xc1e   :  { %v7262_v46 = vpop.eup %6145  ;;  %v1821_v39 = vmul.f32 1.442695, %v1806_v54 }
 0xc1f   :  { %v7264_v31 = vpop.eup %6147  ;;  %v1819_v36 = vmul.f32 1.442695, %v1805_v60  ;;  %v1826_v58 = vsel %vm1429_vm1, %v7262_v46, 0.0 }
 0xc20   :  { %6157 = vpow2.f32 %v1821_v39  ;;  %1827 = vadd.xlane.f32.xlu1 %v1826_v58  ;;  %v1823_v63 = vsel %vm1429_vm1, %v7264_v31, 0.0 }
 0xc21   :  { %6159 = vpow2.f32 %v1819_v36  ;;  %1824 = vadd.xlane.f32.xlu0 %v1823_v63 }
 0xc22   :  { %v7270_v62 = vpop.eup %6149 }
 0xc23   :  { %v7272_v3 = vpop.eup %6151  ;;  %v1832_v1 = vsel %vm1429_vm1, %v7270_v62, 0.0 }
 0xc24   :  { %1833 = vadd.xlane.f32.xlu1 %v1832_v1  ;;  %v1829_v47 = vsel %vm1429_vm1, %v7272_v3, 0.0 }
 0xc25   :  { %1830 = vadd.xlane.f32.xlu0 %v1829_v47 }
 0xc26   :  { %v7278_v50 = vpop.eup %6153 }
 0xc27   :  { %v7280_v5 = vpop.eup %6155  ;;  %v1838_v53 = vsel %vm1429_vm1, %v7278_v50, 0.0 }
 0xc28   :  { %1839 = vadd.xlane.f32.xlu1 %v1838_v53  ;;  %v1835_v55 = vsel %vm1429_vm1, %v7280_v5, 0.0 }
 0xc29   :  { %1836 = vadd.xlane.f32.xlu0 %v1835_v55 }
 0xc2a   :  { %v7286_v7 = vpop.eup %6157 }
 0xc2b   :  { %v7288_v9 = vpop.eup %6159  ;;  %v1844_v10 = vsel %vm1429_vm1, %v7286_v7, 0.0 }
 0xc2c   :  { %1845 = vadd.xlane.f32.xlu1 %v1844_v10  ;;  %v1841_v11 = vsel %vm1429_vm1, %v7288_v9, 0.0 }
 0xc2d   :  { %1842 = vadd.xlane.f32.xlu0 %v1841_v11 }
 0xc9d   :  { %v1483_v43 = vpop.xlane.xlu1 %1482 }
 0xc9e   :  { %6161 = vrcp.f32 %v1483_v43  ;;  %v1480_v12 = vpop.xlane.xlu0 %1479 }
 0xc9f   :  { %6163 = vrcp.f32 %v1480_v12 }
 0xca1   :  { %v1489_v16 = vpop.xlane.xlu1 %1488 }
 0xca2   :  { %6165 = vrcp.f32 %v1489_v16  ;;  %v1486_v18 = vpop.xlane.xlu0 %1485 }
 0xca3   :  { %6167 = vrcp.f32 %v1486_v18 }
 0xca5   :  { %v1495_v20 = vpop.xlane.xlu1 %1494 }
 0xca6   :  { %6169 = vrcp.f32 %v1495_v20  ;;  %v1492_v24 = vpop.xlane.xlu0 %1491 }
 0xca7   :  { %6171 = vrcp.f32 %v1492_v24  ;;  %v1057_v24 = vld [vmem:[#allocation15] sm:$0xff] }
 0xca8   :  { %v6162_v26 = vpop.eup %6161 }
 0xca9   :  { %v6164_v27 = vpop.eup %6163  ;;  %v1501_v49 = vpop.xlane.xlu1 %1500  ;;  %v1511_v52 = vmul.f32 %v6162_v26, %v7222_v42  ;;  %v1058_v26 = vld [vmem:[#allocation15 + $0x8] sm:$0xff] }
 0xcaa   :  { %6173 = vrcp.f32 %v1501_v49  ;;  %v1498_v4 = vpop.xlane.xlu0 %1497  ;;  %v1510_v29 = vmul.f32 %v6164_v27, %v7224_v44  ;;  %v5638_v27 = vpack.c.bf16 %v1058_v26, %v1057_v24 }
 0xcab   :  { %6175 = vrcp.f32 %v1498_v4  ;;  %v1061_v4 = vld [vmem:[#allocation15 + $0x20] sm:$0xff] }
 0xcac   :  { %v6166_v34 = vpop.eup %6165  ;;  %4947 = vmatprep.mubr.msk.f32.mxu0 %vm1429_vm1, %v1510_v29  ;;  %5639 = vmatprep.subr.bf16.mxu1 %v5638_v27  ;;  %v1062_v29 = vld [vmem:[#allocation15 + $0x28] sm:$0xff] }
 0xcad   :  { %v6168_v37 = vpop.eup %6167  ;;  %v1828_v40 = vpop.xlane.xlu1 %1827  ;;  %4948 = vmatmul.mubr.msk.f32.vlgmr.msra.gmra.mrb[18].mxu0 %vm1429_vm1, %v1511_v52  ;;  %v1513_v45 = vmul.f32 %v6166_v34, %v7232_v6  ;;  %5641 = vmatpush3.bf16.msra.mxu1 %v5638_v27  ;;  %v5646_v52 = vpack.c.bf16 %v1062_v29, %v1061_v4 }
 0xcae   :  { %6177 = vrcp.f32 %v1828_v40  ;;  %4974 = vmatpush3.msra.mxu0 %v7152_v15  ;;  %v1825_v41 = vpop.xlane.xlu0 %1824  ;;  %v1512_v54 = vmul.f32 %v6168_v37, %v7234_v8  ;;  %v1065_v37 = vld [vmem:[#allocation15 + $0x40] sm:$0xff]  ;;  %v1066_v40 = vld [vmem:[#allocation15 + $0x48] sm:$0xff] }
 0xcaf   :  { %6179 = vrcp.f32 %v1825_v41  ;;  %v5654_v41 = vpack.c.bf16 %v1066_v40, %v1065_v37 }
 0xcb0   :  { %v6170_v44 = vpop.eup %6169  ;;  %4950 = vmatprep.mubr.msk.f32.mxu0 %vm1429_vm1, %v1512_v54  ;;  %v1067_v54 = vld [vmem:[#allocation15 + $0x50] sm:$0xff] }
 0xcb1   :  { %v6172_v42 = vpop.eup %6171  ;;  %v1834_v38 = vpop.xlane.xlu1 %1833  ;;  %4951 = vmatmul.mubr.msk.f32.gmra.mrb[20].mxu0 %vm1429_vm1, %v1513_v45  ;;  %v1515_v15 = vmul.f32 %v6170_v44, %v7242_v17  ;;  %v1068_v45 = vld [vmem:[#allocation15 + $0x58] sm:$0xff] }
 0xcb2   :  { %6181 = vrcp.f32 %v1834_v38  ;;  %v1831_v60 = vpop.xlane.xlu0 %1830  ;;  %v1514_v39 = vmul.f32 %v6172_v42, %v7244_v21  ;;  %v5658_v44 = vpack.c.bf16 %v1068_v45, %v1067_v54  ;;  %v1069_v42 = vld [vmem:[#allocation15 + $0x60] sm:$0xff]  ;;  %v1070_v38 = vld [vmem:[#allocation15 + $0x68] sm:$0xff] }
 0xcb3   :  { %6183 = vrcp.f32 %v1831_v60  ;;  %v5662_v60 = vpack.c.bf16 %v1070_v38, %v1069_v42 }
 0xcb4   :  { %v6174_v36 = vpop.eup %6173  ;;  %4953 = vmatprep.mubr.msk.f32.mxu0 %vm1429_vm1, %v1514_v39  ;;  %v1071_v39 = vld [vmem:[#allocation15 + $0x70] sm:$0xff] }
 0xcb5   :  { %v6176_v8 = vpop.eup %6175  ;;  %v1840_v58 = vpop.xlane.xlu1 %1839  ;;  %4954 = vmatmul.mubr.msk.f32.gmra.mrb[22].mxu0 %vm1429_vm1, %v1515_v15  ;;  %v1517_v1 = vmul.f32 %v6174_v36, %v7252_v30  ;;  %v1072_v15 = vld [vmem:[#allocation15 + $0x78] sm:$0xff] }
 0xcb6   :  { %6185 = vrcp.f32 %v1840_v58  ;;  %v1837_v6 = vpop.xlane.xlu0 %1836  ;;  %v1516_v63 = vmul.f32 %v6176_v8, %v7254_v35  ;;  %v5666_v36 = vpack.c.bf16 %v1072_v15, %v1071_v39 }
 0xcb7   :  { %6187 = vrcp.f32 %v1837_v6 }
 0xcb8   :  { %v6178_v47 = vpop.eup %6177  ;;  %4956 = vmatprep.mubr.msk.f32.mxu0 %vm1429_vm1, %v1516_v63 }
 0xcb9   :  { %v6180_v21 = vpop.eup %6179  ;;  %v1846_v53 = vpop.xlane.xlu1 %1845  ;;  %4957 = vmatmul.mubr.msk.f32.gmra.mrb[24].mxu0 %vm1429_vm1, %v1517_v1  ;;  %v1856_v10 = vmul.f32 %v6178_v47, %v7262_v46 }
 0xcba   :  { %6189 = vrcp.f32 %v1846_v53  ;;  %v1843_v17 = vpop.xlane.xlu0 %1842  ;;  %v1855_v55 = vmul.f32 %v6180_v21, %v7264_v31 }
 0xcbb   :  { %6191 = vrcp.f32 %v1843_v17 }
 0xcbc   :  { %v6182_v11 = vpop.eup %6181  ;;  %4975 = vmatprep.mubr.msk.f32.mxu0 %vm1429_vm1, %v1855_v55 }
 0xcbd   :  { %v6184_v35 = vpop.eup %6183  ;;  %4976 = vmatmul.mubr.msk.f32.vlgmr.msra.gmra.mrb[26].mxu0 %vm1429_vm1, %v1856_v10  ;;  %v1858_v43 = vmul.f32 %v6182_v11, %v7270_v62 }
 0xcbe   :  { %v1857_v30 = vmul.f32 %v6184_v35, %v7272_v3 }
 0xcc0   :  { %v6186_v12 = vpop.eup %6185  ;;  %4978 = vmatprep.mubr.msk.f32.mxu0 %vm1429_vm1, %v1857_v30 }
 0xcc1   :  { %v6188_v16 = vpop.eup %6187  ;;  %4979 = vmatmul.mubr.msk.f32.gmra.mrb[28].mxu0 %vm1429_vm1, %v1858_v43  ;;  %v1860_v46 = vmul.f32 %v6186_v12, %v7278_v50  ;;  %v1059_v50 = vld [vmem:[#allocation15 + $0x10] sm:$0xff] }
 0xcc2   :  { %v1859_v31 = vmul.f32 %v6188_v16, %v7280_v5  ;;  %v1060_v5 = vld [vmem:[#allocation15 + $0x18] sm:$0xff] }
 0xcc3   :  { %v5642_v49 = vpack.c.bf16 %v1060_v5, %v1059_v50 }
 0xcc4   :  { %v6190_v18 = vpop.eup %6189  ;;  %4981 = vmatprep.mubr.msk.f32.mxu0 %vm1429_vm1, %v1859_v31 }
 0xcc5   :  { %v6192_v20 = vpop.eup %6191  ;;  %4982 = vmatmul.mubr.msk.f32.gmra.mrb[30].mxu0 %vm1429_vm1, %v1860_v46  ;;  %v1862_v62 = vmul.f32 %v6190_v18, %v7286_v7  ;;  %5643 = vmatprep.subr.bf16.mxu1 %v5642_v49  ;;  %v1063_v7 = vld [vmem:[#allocation15 + $0x30] sm:$0xff] }
 0xcc6   :  { %v1861_v3 = vmul.f32 %v6192_v20, %v7288_v9  ;;  %5645 = vmatpush3.bf16.msra.mxu1 %v5642_v49  ;;  %v1064_v9 = vld [vmem:[#allocation15 + $0x38] sm:$0xff] }
 0xcc7   :  { %5647 = vmatprep.subr.bf16.mxu1 %v5646_v52  ;;  %v5650_v34 = vpack.c.bf16 %v1064_v9, %v1063_v7 }
 0xcc8   :  { %4984 = vmatprep.mubr.msk.f32.mxu0 %vm1429_vm1, %v1861_v3 }
 0xcc9   :  { %4985 = vmatmul.mubr.msk.f32.gmra.mrb[32].mxu0 %vm1429_vm1, %v1862_v62 }
 0xcca   :  { %5649 = vmatpush3.bf16.msra.mxu1 %v5646_v52 }
 0xccb   :  { %5651 = vmatprep.subr.bf16.mxu1 %v5650_v34 }
 0xcce   :  { %5653 = vmatpush3.bf16.msra.mxu1 %v5650_v34 }
 0xccf   :  { %5655 = vmatprep.subr.bf16.mxu1 %v5654_v41 }
 0xcd2   :  { %5657 = vmatpush3.bf16.msra.mxu1 %v5654_v41 }
 0xcd3   :  { %5659 = vmatprep.subr.bf16.mxu1 %v5658_v44 }
 0xcd6   :  { %5661 = vmatpush3.bf16.msra.mxu1 %v5658_v44 }
 0xcd7   :  { %5663 = vmatprep.subr.bf16.mxu1 %v5662_v60 }
 0xcda   :  { %5665 = vmatpush3.bf16.msra.mxu1 %v5662_v60 }
 0xcdb   :  { %5667 = vmatprep.subr.bf16.mxu1 %v5666_v36 }
 0xcde   :  { %5669 = vmatpush3.bf16.msra.mxu1 %v5666_v36  ;;  %v4422_v36 = vld [vmem:[%s7748_s22] ss:$0 sm:$0xff] }
 0xd80   :  { %v4949_v8 = vpop.f32.mrb[18].mxu0 }
 0xd81   :  { %v1648_v58 = vmul.f32 %v4949_v8, %v7122_v59  ;;  %v1608_v6 = vpop.f32.mrb[19].mxu0 }
 0xd82   :  { %v1647_v63 = vmul.f32 %v7117_v56, %v1608_v6 }
 0xd84   :  { %v1655_v1 = vadd.f32 %v1648_v58, %v1647_v63  ;;  %v4952_v47 = vpop.f32.mrb[20].mxu0 }
 0xd85   :  { %v1618_v21 = vpop.f32.mrb[21].mxu0  ;;  %v1650_v17 = vmul.f32 %v4952_v47, %v7145_v13 }
 0xd86   :  { %v1649_v53 = vmul.f32 %v7127_v0, %v1618_v21  ;;  %v1076_v21 = vld [vmem:[#allocation16] sm:$0xff] }
 0xd88   :  { %v1656_v55 = vadd.f32 %v1655_v1, %v1649_v53  ;;  %v4955_v10 = vpop.f32.mrb[22].mxu0  ;;  %v1077_v53 = vld [vmem:[#allocation16 + $0x8] sm:$0xff] }
 0xd89   :  { %v1628_v11 = vpop.f32.mrb[23].mxu0  ;;  %v1652_v43 = vmul.f32 %v4955_v10, %v7163_v2  ;;  %v1079_v10 = vld [vmem:[#allocation16 + $0x18] sm:$0xff] }
 0xd8a   :  { %v1651_v35 = vmul.f32 %v7148_v14, %v1628_v11  ;;  %v1657_v30 = vadd.f32 %v1656_v55, %v1650_v17  ;;  %v1078_v17 = vld [vmem:[#allocation16 + $0x10] sm:$0xff]  ;;  %v5670_v55 = vpack.c.bf16 %v1077_v53, %v1076_v21  ;;  %v1102_v21 = vld [vmem:[#allocation18 + $0x48] sm:$0xff] }
 0xd8b   :  { %v5674_v11 = vpack.c.bf16 %v1079_v10, %v1078_v17  ;;  %v1103_v17 = vld [vmem:[#allocation18 + $0x50] sm:$0xff] }
 0xd8c   :  { %v1658_v12 = vadd.f32 %v1657_v30, %v1651_v35  ;;  %v4958_v16 = vpop.f32.mrb[24].mxu0  ;;  %v1080_v35 = vld [vmem:[#allocation16 + $0x20] sm:$0xff]  ;;  %v1081_v30 = vld [vmem:[#allocation16 + $0x28] sm:$0xff]  ;;  %5671 = vmatprep.subr.bf16.mxu0 %v5670_v55 }
 0xd8d   :  { %v1638_v31 = vpop.f32.mrb[25].mxu0  ;;  %v1654_v20 = vmul.f32 %v4958_v16, %v7175_v28  ;;  %5673 = vmatpush3.bf16.msra.mxu0 %v5670_v55  ;;  %v1104_v55 = vld [vmem:[#allocation18 + $0x58] sm:$0xff] }
 0xd8e   :  { %v1653_v46 = vmul.f32 %v7167_v25, %v1638_v31  ;;  %v1659_v18 = vadd.f32 %v1658_v12, %v1652_v43  ;;  %5675 = vmatprep.subr.bf16.mxu0 %v5674_v11  ;;  %v5722_v10 = vpack.c.bf16 %v1104_v55, %v1103_v17  ;;  %v2302_v17 = vld [vmem:[#allocation13 + $0x1a8] sm:$0xff] }
 0xd90   :  { %v1660_v3 = vadd.f32 %v1659_v18, %v1653_v46  ;;  %v4977_v62 = vpop.f32.mrb[26].mxu0 }
 0xd91   :  { %v1993_v24 = vmul.f32 %v4977_v62, %v7122_v59  ;;  %v1953_v26 = vpop.f32.mrb[27].mxu0  ;;  %5677 = vmatpush3.bf16.msra.mxu0 %v5674_v11  ;;  %v1105_v11 = vld [vmem:[#allocation18 + $0x60] sm:$0xff] }
 0xd92   :  { %v1992_v27 = vmul.f32 %v7117_v56, %v1953_v26  ;;  %v1661_v50 = vadd.f32 %v1660_v3, %v1654_v20  ;;  %v1083_v26 = vld [vmem:[#allocation16 + $0x38] sm:$0xff] }
 0xd94   :  { %v2000_v5 = vadd.f32 %v1993_v24, %v1992_v27  ;;  %v4980_v49 = vpop.f32.mrb[28].mxu0  ;;  %5019 = vmatprep.mubr.f32.mxu1 %v1661_v50  ;;  %v1082_v24 = vld [vmem:[#allocation16 + $0x30] sm:$0xff]  ;;  %v1084_v50 = vld [vmem:[#allocation16 + $0x40] sm:$0xff] }
 0xd95   :  { %v1963_v4 = vpop.f32.mrb[29].mxu0  ;;  %v1995_v52 = vmul.f32 %v4980_v49, %v7145_v13  ;;  %v5682_v27 = vpack.c.bf16 %v1083_v26, %v1082_v24  ;;  %v1086_v49 = vld [vmem:[#allocation16 + $0x50] sm:$0xff] }
 0xd96   :  { %v1994_v29 = vmul.f32 %v7127_v0, %v1963_v4 }
 0xd98   :  { %v2001_v7 = vadd.f32 %v2000_v5, %v1994_v29  ;;  %v4983_v9 = vpop.f32.mrb[30].mxu0  ;;  %v1085_v5 = vld [vmem:[#allocation16 + $0x48] sm:$0xff]  ;;  %v1087_v29 = vld [vmem:[#allocation16 + $0x58] sm:$0xff] }
 0xd99   :  { %v1973_v34 = vpop.f32.mrb[31].mxu0  ;;  %v1997_v41 = vmul.f32 %v4983_v9, %v7163_v2  ;;  %v5686_v4 = vpack.c.bf16 %v1085_v5, %v1084_v50  ;;  %v1089_v9 = vld [vmem:[#allocation16 + $0x68] sm:$0xff]  ;;  %v6280_v50 = vld [vmem:[%s7744_s27] sm:$0x3] }
 0xd9a   :  { %v1996_v37 = vmul.f32 %v7148_v14, %v1973_v34  ;;  %v2002_v40 = vadd.f32 %v2001_v7, %v1995_v52  ;;  %v5690_v52 = vpack.c.bf16 %v1087_v29, %v1086_v49  ;;  %v1088_v7 = vld [vmem:[#allocation16 + $0x60] sm:$0xff]  ;;  %v2125_v5 = vrot.slane %v6280_v50, %v7077_v48 }
 0xd9b   :  { %v5694_v34 = vpack.c.bf16 %v1089_v9, %v1088_v7  ;;  %v1107_v7 = vld [vmem:[#allocation18 + $0x70] sm:$0xff]  ;;  %v1108_v9 = vld [vmem:[#allocation18 + $0x78] sm:$0xff] }
 0xd9c   :  { %v2003_v54 = vadd.f32 %v2002_v40, %v1996_v37  ;;  %v4986_v45 = vpop.f32.mrb[32].mxu0  ;;  %v1090_v37 = vld [vmem:[#allocation16 + $0x70] sm:$0xff]  ;;  %v1091_v40 = vld [vmem:[#allocation16 + $0x78] sm:$0xff] }
 0xd9d   :  { %v1983_v44 = vpop.f32.mrb[33].mxu0  ;;  %v1999_v60 = vmul.f32 %v4986_v45, %v7175_v28  ;;  %v1094_v45 = vld [vmem:[#allocation18 + $0x8] sm:$0xff] }
 0xd9e   :  { %v1998_v42 = vmul.f32 %v7167_v25, %v1983_v44  ;;  %v2004_v38 = vadd.f32 %v2003_v54, %v1997_v41  ;;  %v5698_v41 = vpack.c.bf16 %v1091_v40, %v1090_v37  ;;  %v1093_v54 = vld [vmem:[#allocation18] sm:$0xff]  ;;  %v1095_v44 = vld [vmem:[#allocation18 + $0x10] sm:$0xff] }
 0xda0   :  { %v2005_v39 = vadd.f32 %v2004_v38, %v1998_v42  ;;  %v5702_v42 = vpack.c.bf16 %v1094_v45, %v1093_v54  ;;  %v1096_v38 = vld [vmem:[#allocation18 + $0x18] sm:$0xff] }
 0xda2   :  { %v2006_v15 = vadd.f32 %v2005_v39, %v1999_v60  ;;  %v5706_v60 = vpack.c.bf16 %v1096_v38, %v1095_v44  ;;  %v1097_v39 = vld [vmem:[#allocation18 + $0x20] sm:$0xff]  ;;  %5703 = vmatprep.subr.bf16.mxu1 %v5702_v42  ;;  %v4424_v44 = vld [vmem:[%s7750_s25] ss:$0 sm:$0xff] }
 0xda4   :  { %5020 = vmatmul.mubr.f32.vlgmr.msra.gmra.mrb[16].mxu1 %v2006_v15  ;;  %v1098_v15 = vld [vmem:[#allocation18 + $0x28] sm:$0xff] }
 0xda5   :  { %5705 = vmatpush3.bf16.msra.mxu1 %v5702_v42 }
 0xda6   :  { %5707 = vmatprep.subr.bf16.mxu1 %v5706_v60 }
 0xda9   :  { %5709 = vmatpush3.bf16.msra.mxu1 %v5706_v60 }
 0xe77   :  { %v5021_v8 = vpop.f32.mrb[16].mxu1 }
 0xe78   :  { %v2083_v58 = vadd.f32 %v5021_v8, %v7083_v61  ;;  %v2073_v6 = vpop.f32.mrb[17].mxu1  ;;  %v1099_v8 = vld [vmem:[#allocation18 + $0x30] sm:$0xff] }
 0xe79   :  { %v2082_v63 = vadd.f32 %v2073_v6, %v7080_v57  ;;  %v5678_v57 = vpack.c.bf16 %v1081_v30, %v1080_v35  ;;  %v1106_v35 = vld [vmem:[#allocation18 + $0x68] sm:$0xff] }
 0xe7a   :  { %v7346_v1 = vadd.f32 %v4422_v36, %v2083_v58  ;;  %v1100_v58 = vld [vmem:[#allocation18 + $0x38] sm:$0xff]  ;;  %v5726_v30 = vpack.c.bf16 %v1106_v35, %v1105_v11  ;;  %v2307_v11 = vld [vmem:[#allocation13 + $0x1d0] sm:$0xff] }
 0xe7b   :  { %v7348_v47 = vadd.f32 %v4422_v36, %v2082_v63  ;;  %5679 = vmatprep.subr.bf16.mxu0 %v5678_v57  ;;  %v5710_v36 = vpack.c.bf16 %v1098_v15, %v1097_v39  ;;  %v5714_v6 = vpack.c.bf16 %v1100_v58, %v1099_v8  ;;  %v1101_v63 = vld [vmem:[#allocation18 + $0x40] sm:$0xff]  ;;  %v2298_v8 = vld [vmem:[#allocation13 + $0x188] sm:$0xff] }
 0xe7c   :  { %2094 = vadd.xlane.f32.xlu1 %v7346_v1  ;;  %5681 = vmatpush3.bf16.msra.mxu0 %v5678_v57  ;;  %v5718_v53 = vpack.c.bf16 %v1102_v21, %v1101_v63  ;;  %v2301_v58 = vld [vmem:[#allocation13 + $0x1a0] sm:$0xff]  ;;  %v2300_v21 = vld [vmem:[#allocation13 + $0x198] sm:$0xff] }
 0xe7d   :  { %2092 = vadd.xlane.f32.xlu0 %v7348_v47  ;;  %5683 = vmatprep.subr.bf16.mxu0 %v5682_v27  ;;  %v5734_v63 = vpack.c.bf16 %v2301_v58, %v2298_v8  ;;  %v2325_v8 = vld [vmem:[#allocation13 + $0x260] sm:$0xff] }
 0xe7e   :  { %5711 = vmatprep.subr.bf16.mxu1 %v5710_v36  ;;  %v2321_v58 = vld [vmem:[#allocation13 + $0x240] sm:$0xff] }
 0xe7f   :  { %5713 = vmatpush3.bf16.msra.mxu1 %v5710_v36 }
 0xe80   :  { %5685 = vmatpush3.bf16.msra.mxu0 %v5682_v27  ;;  %5715 = vmatprep.subr.bf16.mxu1 %v5714_v6 }
 0xe81   :  { %5687 = vmatprep.subr.bf16.mxu0 %v5686_v4 }
 0xe83   :  { %5717 = vmatpush3.bf16.msra.mxu1 %v5714_v6  ;;  %v2297_v6 = vld [vmem:[#allocation13 + $0x180] sm:$0xff] }
 0xe84   :  { %5689 = vmatpush3.bf16.msra.mxu0 %v5686_v4  ;;  %5719 = vmatprep.subr.bf16.mxu1 %v5718_v53  ;;  %v5736_v55 = vpack.c.bf16 %v2300_v21, %v2297_v6  ;;  %v2323_v21 = vld [vmem:[#allocation13 + $0x250] sm:$0xff] }
 0xe85   :  { %5691 = vmatprep.subr.bf16.mxu0 %v5690_v52 }
 0xe87   :  { %5721 = vmatpush3.bf16.msra.mxu1 %v5718_v53  ;;  %v2299_v53 = vld [vmem:[#allocation13 + $0x190] sm:$0xff] }
 0xe88   :  { %5693 = vmatpush3.bf16.msra.mxu0 %v5690_v52  ;;  %5723 = vmatprep.subr.bf16.mxu1 %v5722_v10 }
 0xe89   :  { %5695 = vmatprep.subr.bf16.mxu0 %v5694_v34 }
 0xe8b   :  { %5725 = vmatpush3.bf16.msra.mxu1 %v5722_v10  ;;  %v2304_v10 = vld [vmem:[#allocation13 + $0x1b8] sm:$0xff] }
 0xe8c   :  { %5697 = vmatpush3.bf16.msra.mxu0 %v5694_v34  ;;  %5727 = vmatprep.subr.bf16.mxu1 %v5726_v30  ;;  %v5730_v34 = vpack.c.bf16 %v1108_v9, %v1107_v7  ;;  %v5738_v35 = vpack.c.bf16 %v2307_v11, %v2304_v10  ;;  %v2331_v10 = vld [vmem:[#allocation13 + $0x290] sm:$0xff] }
 0xe8d   :  { %5699 = vmatprep.subr.bf16.mxu0 %v5698_v41  ;;  %v2327_v11 = vld [vmem:[#allocation13 + $0x270] sm:$0xff] }
 0xe8f   :  { %5729 = vmatpush3.bf16.msra.mxu1 %v5726_v30  ;;  %v2306_v30 = vld [vmem:[#allocation13 + $0x1c8] sm:$0xff] }
 0xe90   :  { %5701 = vmatpush3.bf16.msra.mxu0 %v5698_v41  ;;  %5731 = vmatprep.subr.bf16.mxu1 %v5730_v34 }
 0xe91   :  { %5735 = vmatprep.subr.bf16.mxu0 %v5734_v63  ;;  %v2324_v63 = vld [vmem:[#allocation13 + $0x258] sm:$0xff] }
 0xe93   :  { %5733 = vmatpush3.bf16.msra.mxu1 %v5730_v34 }
 0xf09   :  { %v2095_v61 = vpop.xlane.xlu1 %2094 }
 0xf0a   :  { %v2097_v43 = vmul.f32 0.03125, %v2095_v61  ;;  %v2093_v12 = vpop.xlane.xlu0 %2092 }
 0xf0b   :  { %v2096_v16 = vmul.f32 0.03125, %v2093_v12 }
 0xf0c   :  { %v2099_v31 = vsub.f32 %v7346_v1, %v2097_v43 }
 0xf0d   :  { %v2098_v46 = vsub.f32 %v7348_v47, %v2096_v16 }
 0xf0e   :  { %v7355_v18 = vmul.f32 %v7037_v23, %v2099_v31 }
 0xf0f   :  { %v7358_v20 = vmul.f32 %v7037_v23, %v2098_v46  ;;  %v6279_v46 = vld [vmem:[%s7743_s7] sm:$0x3] }
 0xf10   :  { %v2103_v3 = vmul.f32 %v7355_v18, %v7355_v18 }
 0xf11   :  { %v2102_v62 = vmul.f32 %v7358_v20, %v7358_v20 }
 0xf12   :  { %2106 = vadd.xlane.f32.xlu1 %v2103_v3  ;;  %v2119_v3 = vrot.slane %v6279_v46, %v7077_v48  ;;  %v2309_v46 = vld [vmem:[#allocation13 + $0x1e0] sm:$0xff] }
 0xf13   :  { %2104 = vadd.xlane.f32.xlu0 %v2102_v62 }
 0xf9f   :  { %v2107_v57 = vpop.xlane.xlu1 %2106 }
 0xfa0   :  { %v2109_v61 = vmul.f32 0.03125, %v2107_v57  ;;  %v2105_v43 = vpop.xlane.xlu0 %2104  ;;  %v2305_v57 = vld [vmem:[#allocation13 + $0x1c0] sm:$0xff] }
 0xfa1   :  { %v2108_v12 = vmul.f32 0.03125, %v2105_v43 }
 0xfa2   :  { %v2111_v16 = vadd.f32 1e-05, %v2109_v61  ;;  %v2308_v61 = vld [vmem:[#allocation13 + $0x1d8] sm:$0xff] }
 0xfa3   :  { %v2110_v31 = vadd.f32 1e-05, %v2108_v12  ;;  %v5770_v12 = vpack.c.bf16 %v2308_v61, %v2305_v57  ;;  %v2332_v57 = vld [vmem:[#allocation13 + $0x298] sm:$0xff] }
 0xfa4   :  { %6193 = vrsqrt.f32 %v2111_v16  ;;  %v2310_v16 = vld [vmem:[#allocation13 + $0x1e8] sm:$0xff] }
 0xfa5   :  { %6195 = vrsqrt.f32 %v2110_v31  ;;  %v2313_v31 = vld [vmem:[#allocation13 + $0x200] sm:$0xff] }
 0xfae   :  { %v6194_v62 = vpop.eup %6193 }
 0xfaf   :  { %v6196_v24 = vpop.eup %6195  ;;  %v2115_v26 = vmul.f32 %v6194_v62, %v7355_v18  ;;  %v4423_v18 = vld [vmem:[%s7749_s23] ss:$0 sm:$0xff] }
 0xfb0   :  { %v2114_v27 = vmul.f32 %v6196_v24, %v7358_v20  ;;  %v2312_v62 = vld [vmem:[#allocation13 + $0x1f8] sm:$0xff]  ;;  %v2311_v24 = vld [vmem:[#allocation13 + $0x1f0] sm:$0xff] }
 0xfb1   :  { %v2121_v49 = vmul.f32 %v2119_v3, %v2115_v26  ;;  %v2314_v26 = vld [vmem:[#allocation13 + $0x208] sm:$0xff]  ;;  %v5744_v50 = vpack.c.bf16 %v2312_v62, %v2309_v46  ;;  %v2333_v62 = vld [vmem:[#allocation13 + $0x2a0] sm:$0xff] }
 0xfb2   :  { %v2120_v4 = vmul.f32 %v2119_v3, %v2114_v27  ;;  %v5742_v3 = vpack.c.bf16 %v2313_v31, %v2310_v16  ;;  %v5774_v27 = vpack.c.bf16 %v2314_v26, %v2311_v24  ;;  %v2335_v31 = vld [vmem:[#allocation13 + $0x2b0] sm:$0xff]  ;;  %v2338_v46 = vld [vmem:[#allocation13 + $0x2c8] sm:$0xff]  ;;  %v2336_v24 = vld [vmem:[#allocation13 + $0x2b8] sm:$0xff] }
 0xfb3   :  { %v2127_v52 = vadd.f32 %v2125_v5, %v2121_v49  ;;  %v2340_v26 = vld [vmem:[#allocation13 + $0x2d8] sm:$0xff] }
 0xfb4   :  { %v2126_v29 = vadd.f32 %v2125_v5, %v2120_v4 }
 0xfb6   :  { %5054 = vmatprep.mubr.f32.mxu0 %v2126_v29 }
 0xfb7   :  { %5055 = vmatmul.mubr.f32.vlgmr.msra.gmra.mrb[34].mxu0 %v2127_v52 }
 0xfb8   :  { %2524 = vmatprep.mubr.f32.mxu0 %v6704_v22  ;;  %5737 = vmatpush1.bf16.msra.mxu0 %v5736_v55 }
 0xfb9   :  { %5739 = vmatprep.subr.bf16.mxu0 %v5738_v35  ;;  %v2330_v35 = vld [vmem:[#allocation13 + $0x288] sm:$0xff] }
 0xfba   :  { %v5756_v16 = vpack.c.bf16 %v2330_v35, %v2327_v11 }
0x108a   :  { %v5056_v37 = vpop.f32.mrb[34].mxu0 }
0x108b   :  { %v2206_v20 = vadd.f32 %v5056_v37, %v4423_v18  ;;  %v2200_v40 = vpop.f32.mrb[35].mxu0 }
0x108c   :  { %v2201_v41 = vadd.f32 %v4423_v18, %v2200_v40  ;;  %v2319_v40 = vld [vmem:[#allocation13 + $0x230] sm:$0xff] }
0x108d   :  { %v2210_v45 = vmax.f32 %v2206_v20, 0.0  ;;  %v2316_v20 = vld [vmem:[#allocation13 + $0x218] sm:$0xff] }
0x108e   :  { %v2209_v54 = vmax.f32 %v2201_v41, 0.0  ;;  %v5746_v41 = vpack.c.bf16 %v2319_v40, %v2316_v20 }
0x1090   :  { %5089 = vmatprep.mubr.f32.mxu1 %v2209_v54  ;;  %v2315_v54 = vld [vmem:[#allocation13 + $0x210] sm:$0xff] }
0x1091   :  { %5090 = vmatmul.mubr.f32.vlgmr.msra.gmra.mrb[18].mxu1 %v2210_v45  ;;  %v2318_v45 = vld [vmem:[#allocation13 + $0x228] sm:$0xff] }
0x1164   :  { %v5091_v42 = vpop.f32.mrb[18].mxu1 }
0x1165   :  { %v2287_v38 = vadd.f32 %v5091_v42, %v7346_v1  ;;  %v2277_v60 = vpop.f32.mrb[19].mxu1  ;;  %v5766_v1 = vpack.c.bf16 %v2302_v17, %v2299_v53  ;;  %v5748_v42 = vpack.c.bf16 %v2318_v45, %v2315_v54  ;;  %v2326_v53 = vld [vmem:[#allocation13 + $0x268] sm:$0xff]  ;;  %v5752_v17 = vpack.c.bf16 %v2324_v63, %v2321_v58 }
0x1166   :  { %v2286_v39 = vadd.f32 %v2277_v60, %v7348_v47  ;;  %v2303_v47 = vld [vmem:[#allocation13 + $0x1b0] sm:$0xff]  ;;  %v5782_v55 = vpack.c.bf16 %v2326_v53, %v2323_v21 }
0x1167   :  { %v7375_v15 = vadd.f32 %v4424_v44, %v2287_v38  ;;  %5767 = vmatprep.subr.bf16.mxu1 %v5766_v1  ;;  %v5740_v43 = vpack.c.bf16 %v2306_v30, %v2303_v47  ;;  %v2320_v38 = vld [vmem:[#allocation13 + $0x238] sm:$0xff]  ;;  %v2329_v30 = vld [vmem:[#allocation13 + $0x280] sm:$0xff] }
0x1168   :  { %v7377_v36 = vadd.f32 %v4424_v44, %v2286_v39  ;;  %5769 = vmatpush3.bf16.msra.mxu1 %v5766_v1  ;;  %v2317_v44 = vld [vmem:[#allocation13 + $0x220] sm:$0xff]  ;;  %v2322_v39 = vld [vmem:[#allocation13 + $0x248] sm:$0xff]  ;;  %v2328_v1 = vld [vmem:[#allocation13 + $0x278] sm:$0xff]  ;;  %v5786_v61 = vpack.c.bf16 %v2332_v57, %v2329_v30 }
0x1169   :  { %2410 = vadd.xlane.f32.xlu1 %v7375_v15  ;;  %5771 = vmatprep.subr.bf16.mxu1 %v5770_v12  ;;  %v5778_v60 = vpack.c.bf16 %v2320_v38, %v2317_v44  ;;  %v5750_v6 = vpack.c.bf16 %v2325_v8, %v2322_v39  ;;  %v5754_v47 = vpack.c.bf16 %v2331_v10, %v2328_v1  ;;  %v7397_v38 = vld [vmem:[%s7744_s27 + $0x2] sm:$0x3] }
0x116a   :  { %2408 = vadd.xlane.f32.xlu0 %v7377_v36  ;;  %5741 = vmatpush1.bf16.msra.mxu0 %v5740_v43  ;;  %v2334_v43 = vld [vmem:[#allocation13 + $0x2a8] sm:$0xff]  ;;  %v2441_v63 = vrot.slane %v7397_v38, %v7073_v33  ;;  %v4425_v1 = vld [vmem:[%s7745_s18 + $0x3] sm:$0x7] }
0x116b   :  { %5743 = vmatprep.subr.bf16.mxu0 %v5742_v3  ;;  %v2448_v10 = vrot.slane %v4425_v1, %v7073_v33 }
0x116c   :  { %5773 = vmatpush3.bf16.msra.mxu1 %v5770_v12  ;;  %v2337_v12 = vld [vmem:[#allocation13 + $0x2c0] sm:$0xff] }
0x116d   :  { %5775 = vmatprep.subr.bf16.mxu1 %v5774_v27  ;;  %v5758_v3 = vpack.c.bf16 %v2337_v12, %v2334_v43 }
0x116e   :  { %5745 = vmatpush1.bf16.msra.mxu0 %v5744_v50  ;;  %v5790_v50 = vpack.c.bf16 %v2338_v46, %v2335_v31 }
0x116f   :  { %5747 = vmatprep.subr.bf16.mxu0 %v5746_v41 }
0x1170   :  { %5777 = vmatpush3.bf16.msra.mxu1 %v5774_v27  ;;  %v2343_v27 = vld [vmem:[#allocation13 + $0x2f0] sm:$0xff] }
0x1171   :  { %5779 = vmatprep.subr.bf16.mxu1 %v5778_v60 }
0x1172   :  { %5749 = vmatpush1.bf16.msra.mxu0 %v5748_v42  ;;  %v7394_v42 = vld [vmem:[%s7743_s7 + $0x2] sm:$0x3] }
0x1173   :  { %5751 = vmatprep.subr.bf16.mxu0 %v5750_v6 }
0x1174   :  { %5781 = vmatpush3.bf16.msra.mxu1 %v5778_v60  ;;  %v2435_v60 = vrot.slane %v7394_v42, %v7073_v33 }
0x1175   :  { %5783 = vmatprep.subr.bf16.mxu1 %v5782_v55 }
0x1176   :  { %5753 = vmatpush1.bf16.msra.mxu0 %v5752_v17 }
0x1177   :  { %5755 = vmatprep.subr.bf16.mxu0 %v5754_v47 }
0x1178   :  { %5785 = vmatpush3.bf16.msra.mxu1 %v5782_v55 }
0x1179   :  { %5787 = vmatprep.subr.bf16.mxu1 %v5786_v61 }
0x117a   :  { %5757 = vmatpush1.bf16.msra.mxu0 %v5756_v16 }
0x117b   :  { %5759 = vmatprep.subr.bf16.mxu0 %v5758_v3 }
0x117c   :  { %5789 = vmatpush3.bf16.msra.mxu1 %v5786_v61 }
0x117d   :  { %5791 = vmatprep.subr.bf16.mxu1 %v5790_v50 }
0x1180   :  { %5793 = vmatpush3.bf16.msra.mxu1 %v5790_v50 }
0x11f6   :  { %v2411_v5 = vpop.xlane.xlu1 %2410 }
0x11f7   :  { %v2413_v49 = vmul.f32 0.03125, %v2411_v5  ;;  %v2409_v4 = vpop.xlane.xlu0 %2408  ;;  %v5760_v5 = vpack.c.bf16 %v2336_v24, %v2333_v62 }
0x11f8   :  { %v2412_v29 = vmul.f32 0.03125, %v2409_v4  ;;  %v2344_v4 = vld [vmem:[#allocation13 + $0x2f8] sm:$0xff] }
0x11f9   :  { %v2415_v52 = vsub.f32 %v7375_v15, %v2413_v49  ;;  %v2341_v49 = vld [vmem:[#allocation13 + $0x2e0] sm:$0xff]  ;;  %5761 = vmatpush1.bf16.msra.mxu0 %v5760_v5 }
0x11fa   :  { %v2414_v7 = vsub.f32 %v7377_v36, %v2412_v29  ;;  %v5762_v29 = vpack.c.bf16 %v2343_v27, %v2340_v26 }
0x11fb   :  { %v7384_v9 = vmul.f32 %v7037_v23, %v2415_v52  ;;  %v2339_v52 = vld [vmem:[#allocation13 + $0x2d0] sm:$0xff] }
0x11fc   :  { %v7387_v34 = vmul.f32 %v7037_v23, %v2414_v7  ;;  %v2342_v7 = vld [vmem:[#allocation13 + $0x2e8] sm:$0xff]  ;;  %5763 = vmatprep.subr.bf16.mxu0 %v5762_v29 }
0x11fd   :  { %v2419_v18 = vmul.f32 %v7384_v9, %v7384_v9 }
0x11fe   :  { %v2418_v37 = vmul.f32 %v7387_v34, %v7387_v34 }
0x11ff   :  { %2422 = vadd.xlane.f32.xlu1 %v2419_v18  ;;  %v5794_v18 = vpack.c.bf16 %v2344_v4, %v2341_v49 }
0x1200   :  { %2420 = vadd.xlane.f32.xlu0 %v2418_v37  ;;  %v5764_v37 = vpack.c.bf16 %v2342_v7, %v2339_v52 }
0x1201   :  { %5795 = vmatprep.subr.bf16.mxu1 %v5794_v18 }
0x1202   :  { %5765 = vmatpush1.bf16.msra.mxu0 %v5764_v37  ;;  %5797 = vmatpush3.bf16.msra.mxu1 %v5794_v18 }
0x128c   :  { %v2423_v20 = vpop.xlane.xlu1 %2422 }
0x128d   :  { %v2425_v40 = vmul.f32 0.03125, %v2423_v20  ;;  %v2421_v41 = vpop.xlane.xlu0 %2420 }
0x128e   :  { %v2424_v54 = vmul.f32 0.03125, %v2421_v41 }
0x128f   :  { %v2427_v45 = vadd.f32 1e-05, %v2425_v40 }
0x1290   :  { %v2426_v44 = vadd.f32 1e-05, %v2424_v54 }
0x1291   :  { %6197 = vrsqrt.f32 %v2427_v45 }
0x1292   :  { %6199 = vrsqrt.f32 %v2426_v44 }
0x129b   :  { %v6198_v39 = vpop.eup %6197 }
0x129c   :  { %v6200_v8 = vpop.eup %6199  ;;  %v2431_v58 = vmul.f32 %v6198_v39, %v7384_v9  ;;  %v2452_v9 = vrot.slane %v4425_v1, %v7077_v48 }
0x129d   :  { %v2430_v6 = vmul.f32 %v6200_v8, %v7387_v34  ;;  %v2456_v34 = vrot.slane %v4425_v1, %v1157_v51 }
0x129e   :  { %v2437_v21 = vmul.f32 %v2435_v60, %v2431_v58 }
0x129f   :  { %v2436_v53 = vmul.f32 %v2435_v60, %v2430_v6 }
0x12a0   :  { %v2443_v55 = vadd.f32 %v2441_v63, %v2437_v21 }
0x12a1   :  { %v2442_v17 = vadd.f32 %v2441_v63, %v2436_v53 }
0x12a3   :  { %2525 = vmatmul.mubr.f32.vlgmr.msra.gmra.mrb[36].mxu0 %v2442_v17  ;;  %5124 = vmatprep.mubr.f32.mxu1 %v2442_v17 }
0x12a4   :  { %5125 = vmatmul.mubr.f32.vlgmr.msra.gmra.mrb[20].mxu1 %v2443_v55  ;;  %2530 = vmatprep.mubr.f32.mxu0 %v6704_v22 }
0x12a7   :  { %2531 = vmatmul.mubr.f32.gmra.mrb[38].mxu0 %v2443_v55 }
0x1376   :  { %v2526_v11 = vpop.f32.mrb[36].mxu0 }
0x1377   :  { %v2527_v47 = vadd.f32 %v2526_v11, %v2448_v10  ;;  %v2528_v35 = vpop.f32.mrb[37].mxu0  ;;  %v5126_v30 = vpop.f32.mrb[20].mxu1 }
0x1378   :  { %v2529_v57 = vadd.f32 %v2528_v35, %v2452_v9  ;;  %v2603_v61 = vpop.f32.mrb[21].mxu1  ;;  %v7414_v27 = vadd.f32 %v5126_v30, %v2456_v34 }
0x1379   :  { %v2612_v43 = vmul.f32 0.5, %v2527_v47  ;;  %v2604_v12 = vadd.f32 %v2603_v61, %v2456_v34 }
0x137a   :  { %v2532_v16 = vpop.f32.mrb[38].mxu0  ;;  %5127 = vmatprep.subr.mxu0 %v2529_v57 }
0x137b   :  { %v2533_v31 = vadd.f32 %v2532_v16, %v2448_v10  ;;  %v2534_v46 = vpop.f32.mrb[39].mxu0  ;;  %5128 = vmatpush3.xpose.msra.mxu0 %v2529_v57  ;;  %v2614_v3 = vmul.f32 %v7117_v56, %v2612_v43  ;;  %v2615_v62 = vmul.f32 %v7122_v59, %v2612_v43  ;;  %v2616_v26 = vmul.f32 %v7127_v0, %v2612_v43 }
0x137c   :  { %v2535_v24 = vadd.f32 %v2534_v46, %v2452_v9  ;;  %5141 = vmatprep.subr.mxu0 %v2604_v12  ;;  %v2617_v49 = vmul.f32 %v7145_v13, %v2612_v43  ;;  %v2618_v4 = vmul.f32 %v7148_v14, %v2612_v43  ;;  %v2619_v52 = vmul.f32 %v7163_v2, %v2612_v43 }
0x137d   :  { %v2613_v51 = vmul.f32 0.5, %v2533_v31  ;;  %5129 = vmatprep.mubr.f32.mxu0 %v2614_v3  ;;  %v2620_v18 = vmul.f32 %v7167_v25, %v2612_v43  ;;  %v2621_v20 = vmul.f32 %v7175_v28, %v2612_v43 }
0x137e   :  { %5130 = vmatmul.mubr.f32.vlgmr.msra.gmra.mrb[40].mxu0 %v2615_v62  ;;  %5155 = vmatprep.subr.mxu1 %v2535_v24 }
0x137f   :  { %5132 = vmatprep.mubr.f32.mxu0 %v2616_v26  ;;  %5142 = vmatpush3.msra.mxu0 %v2604_v12  ;;  %v2959_v50 = vmul.f32 %v7117_v56, %v2613_v51  ;;  %v2960_v5 = vmul.f32 %v7122_v59, %v2613_v51  ;;  %v2961_v29 = vmul.f32 %v7127_v0, %v2613_v51 }
0x1380   :  { %5156 = vmatpush3.xpose.msra.mxu1 %v2535_v24  ;;  %5169 = vmatprep.subr.mxu0 %v7414_v27  ;;  %v2962_v7 = vmul.f32 %v7145_v13, %v2613_v51  ;;  %v2963_v37 = vmul.f32 %v7148_v14, %v2613_v51  ;;  %v2964_v40 = vmul.f32 %v7163_v2, %v2613_v51 }
0x1381   :  { %5157 = vmatprep.mubr.f32.mxu1 %v2959_v50  ;;  %v2965_v41 = vmul.f32 %v7167_v25, %v2613_v51  ;;  %v2966_v54 = vmul.f32 %v7175_v28, %v2613_v51 }
0x1382   :  { %5133 = vmatmul.mubr.f32.gmra.mrb[42].mxu0 %v2617_v49 }
0x1383   :  { %5158 = vmatmul.mubr.f32.vlgmr.msra.gmra.mrb[22].mxu1 %v2960_v5  ;;  %5135 = vmatprep.mubr.f32.mxu0 %v2618_v4 }
0x1384   :  { %5160 = vmatprep.mubr.f32.mxu1 %v2961_v29 }
0x1386   :  { %5136 = vmatmul.mubr.f32.gmra.mrb[44].mxu0 %v2619_v52 }
0x1387   :  { %5161 = vmatmul.mubr.f32.gmra.mrb[24].mxu1 %v2962_v7  ;;  %5138 = vmatprep.mubr.f32.mxu0 %v2620_v18 }
0x1388   :  { %5163 = vmatprep.mubr.f32.mxu1 %v2963_v37 }
0x138a   :  { %5139 = vmatmul.mubr.f32.gmra.mrb[46].mxu0 %v2621_v20 }
0x138b   :  { %5164 = vmatmul.mubr.f32.gmra.mrb[26].mxu1 %v2964_v40 }
0x138c   :  { %5166 = vmatprep.mubr.f32.mxu1 %v2965_v41 }
0x138f   :  { %5167 = vmatmul.mubr.f32.gmra.mrb[28].mxu1 %v2966_v54 }
0x1451   :  { %v5131_v45 = vpop.f32.mrb[40].mxu0 }
0x1452   :  { %v2688_v44 = vpop.f32.mrb[41].mxu0  ;;  %v2730_v60 = vsel %vm1429_vm1, %v5131_v45, -inf }
0x1453   :  { %2731 = vmax.xlane.f32.xlu1 %v2730_v60  ;;  %v2727_v39 = vsel %vm1429_vm1, %v2688_v44, -inf }
0x1454   :  { %2728 = vmax.xlane.f32.xlu0 %v2727_v39 }
0x1455   :  { %v5134_v8 = vpop.f32.mrb[42].mxu0 }
0x1456   :  { %v7432_v58 = vpop.f32.mrb[22].mxu1  ;;  %v2698_v6 = vpop.f32.mrb[43].mxu0  ;;  %v2736_v63 = vsel %vm1429_vm1, %v5134_v8, -inf }
0x1457   :  { %v7435_v21 = vpop.f32.mrb[23].mxu1  ;;  %2737 = vmax.xlane.f32.xlu1 %v2736_v63  ;;  %v2733_v53 = vsel %vm1429_vm1, %v2698_v6, -inf  ;;  %v3075_v12 = vsel %vm1429_vm1, %v7432_v58, -inf }
0x1458   :  { %2734 = vmax.xlane.f32.xlu0 %v2733_v53  ;;  %v3072_v31 = vsel %vm1429_vm1, %v7435_v21, -inf }
0x1459   :  { %v5137_v17 = vpop.f32.mrb[44].mxu0 }
0x145a   :  { %v7438_v55 = vpop.f32.mrb[24].mxu1  ;;  %v2708_v1 = vpop.f32.mrb[45].mxu0  ;;  %v2742_v10 = vsel %vm1429_vm1, %v5137_v17, -inf }
0x145b   :  { %v7441_v9 = vpop.f32.mrb[25].mxu1  ;;  %2743 = vmax.xlane.f32.xlu1 %v2742_v10  ;;  %v2739_v34 = vsel %vm1429_vm1, %v2708_v1, -inf  ;;  %v3081_v46 = vsel %vm1429_vm1, %v7438_v55, -inf }
0x145c   :  { %2740 = vmax.xlane.f32.xlu0 %v2739_v34  ;;  %v3078_v3 = vsel %vm1429_vm1, %v7441_v9, -inf }
0x145d   :  { %v5140_v11 = vpop.f32.mrb[46].mxu0 }
0x145e   :  { %v7444_v47 = vpop.f32.mrb[26].mxu1  ;;  %v2718_v35 = vpop.f32.mrb[47].mxu0  ;;  %v2748_v30 = vsel %vm1429_vm1, %v5140_v11, -inf }
0x145f   :  { %v7447_v57 = vpop.f32.mrb[27].mxu1  ;;  %2749 = vmax.xlane.f32.xlu1 %v2748_v30  ;;  %v2745_v61 = vsel %vm1429_vm1, %v2718_v35, -inf  ;;  %v3087_v62 = vsel %vm1429_vm1, %v7444_v47, -inf }
0x1460   :  { %2746 = vmax.xlane.f32.xlu0 %v2745_v61  ;;  %v3084_v24 = vsel %vm1429_vm1, %v7447_v57, -inf }
0x1462   :  { %v7450_v43 = vpop.f32.mrb[28].mxu1 }
0x1463   :  { %v7454_v16 = vpop.f32.mrb[29].mxu1  ;;  %3076 = vmax.xlane.f32.xlu1 %v3075_v12  ;;  %v3093_v51 = vsel %vm1429_vm1, %v7450_v43, -inf }
0x1464   :  { %3073 = vmax.xlane.f32.xlu0 %v3072_v31  ;;  %v3090_v26 = vsel %vm1429_vm1, %v7454_v16, -inf }
0x1467   :  { %3082 = vmax.xlane.f32.xlu1 %v3081_v46 }
0x1468   :  { %3079 = vmax.xlane.f32.xlu0 %v3078_v3 }
0x146b   :  { %3088 = vmax.xlane.f32.xlu1 %v3087_v62 }
0x146c   :  { %3085 = vmax.xlane.f32.xlu0 %v3084_v24 }
0x146f   :  { %3094 = vmax.xlane.f32.xlu1 %v3093_v51 }
0x1470   :  { %3091 = vmax.xlane.f32.xlu0 %v3090_v26 }
0x14e0   :  { %v2732_v50 = vpop.xlane.xlu1 %2731 }
0x14e1   :  { %v2752_v5 = vsub.f32 %v5131_v45, %v2732_v50  ;;  %v2729_v49 = vpop.xlane.xlu0 %2728 }
0x14e2   :  { %v2751_v4 = vsub.f32 %v2688_v44, %v2729_v49 }
0x14e3   :  { %v2761_v29 = vmul.f32 1.442695, %v2752_v5 }
0x14e4   :  { %v2759_v52 = vmul.f32 1.442695, %v2751_v4  ;;  %v2738_v7 = vpop.xlane.xlu1 %2737 }
0x14e5   :  { %6201 = vpow2.f32 %v2761_v29  ;;  %v2754_v18 = vsub.f32 %v5134_v8, %v2738_v7  ;;  %v2735_v37 = vpop.xlane.xlu0 %2734 }
0x14e6   :  { %6203 = vpow2.f32 %v2759_v52  ;;  %v2753_v20 = vsub.f32 %v2698_v6, %v2735_v37 }
0x14e7   :  { %v2765_v40 = vmul.f32 1.442695, %v2754_v18 }
0x14e8   :  { %v2763_v41 = vmul.f32 1.442695, %v2753_v20  ;;  %v2744_v54 = vpop.xlane.xlu1 %2743 }
0x14e9   :  { %6205 = vpow2.f32 %v2765_v40  ;;  %v2756_v60 = vsub.f32 %v5137_v17, %v2744_v54  ;;  %v2741_v39 = vpop.xlane.xlu0 %2740 }
0x14ea   :  { %6207 = vpow2.f32 %v2763_v41  ;;  %v2755_v63 = vsub.f32 %v2708_v1, %v2741_v39 }
0x14eb   :  { %v2769_v53 = vmul.f32 1.442695, %v2756_v60 }
0x14ec   :  { %v2767_v45 = vmul.f32 1.442695, %v2755_v63  ;;  %v2750_v10 = vpop.xlane.xlu1 %2749 }
0x14ed   :  { %6209 = vpow2.f32 %v2769_v53  ;;  %v2758_v44 = vsub.f32 %v5140_v11, %v2750_v10  ;;  %v2747_v34 = vpop.xlane.xlu0 %2746 }
0x14ee   :  { %6211 = vpow2.f32 %v2767_v45  ;;  %v2757_v30 = vsub.f32 %v2718_v35, %v2747_v34 }
0x14ef   :  { %v7470_v8 = vpop.eup %6201  ;;  %v2773_v61 = vmul.f32 1.442695, %v2758_v44 }
0x14f0   :  { %v7472_v6 = vpop.eup %6203  ;;  %v2771_v12 = vmul.f32 1.442695, %v2757_v30  ;;  %v3077_v31 = vpop.xlane.xlu1 %3076  ;;  %v2778_v17 = vsel %vm1429_vm1, %v7470_v8, 0.0 }
0x14f1   :  { %6213 = vpow2.f32 %v2773_v61  ;;  %v3097_v1 = vsub.f32 %v7432_v58, %v3077_v31  ;;  %2779 = vadd.xlane.f32.xlu1 %v2778_v17  ;;  %v3074_v46 = vpop.xlane.xlu0 %3073  ;;  %v2775_v11 = vsel %vm1429_vm1, %v7472_v6, 0.0 }
0x14f2   :  { %6215 = vpow2.f32 %v2771_v12  ;;  %v3096_v35 = vsub.f32 %v7435_v21, %v3074_v46  ;;  %2776 = vadd.xlane.f32.xlu0 %v2775_v11 }
0x14f3   :  { %v7480_v3 = vpop.eup %6205  ;;  %v3106_v62 = vmul.f32 1.442695, %v3097_v1 }
0x14f4   :  { %v7482_v24 = vpop.eup %6207  ;;  %v3104_v51 = vmul.f32 1.442695, %v3096_v35  ;;  %v3083_v26 = vpop.xlane.xlu1 %3082  ;;  %v2784_v50 = vsel %vm1429_vm1, %v7480_v3, 0.0 }
0x14f5   :  { %6217 = vpow2.f32 %v3106_v62  ;;  %v3099_v58 = vsub.f32 %v7438_v55, %v3083_v26  ;;  %2785 = vadd.xlane.f32.xlu1 %v2784_v50  ;;  %v3080_v5 = vpop.xlane.xlu0 %3079  ;;  %v2781_v49 = vsel %vm1429_vm1, %v7482_v24, 0.0 }
0x14f6   :  { %6219 = vpow2.f32 %v3104_v51  ;;  %v3098_v21 = vsub.f32 %v7441_v9, %v3080_v5  ;;  %2782 = vadd.xlane.f32.xlu0 %v2781_v49 }
0x14f7   :  { %v7490_v4 = vpop.eup %6209  ;;  %v3110_v29 = vmul.f32 1.442695, %v3099_v58 }
0x14f8   :  { %v7492_v52 = vpop.eup %6211  ;;  %v3108_v7 = vmul.f32 1.442695, %v3098_v21  ;;  %v3089_v18 = vpop.xlane.xlu1 %3088  ;;  %v2790_v37 = vsel %vm1429_vm1, %v7490_v4, 0.0 }
0x14f9   :  { %6221 = vpow2.f32 %v3110_v29  ;;  %v3101_v55 = vsub.f32 %v7444_v47, %v3089_v18  ;;  %2791 = vadd.xlane.f32.xlu1 %v2790_v37  ;;  %v3086_v20 = vpop.xlane.xlu0 %3085  ;;  %v2787_v40 = vsel %vm1429_vm1, %v7492_v52, 0.0 }
0x14fa   :  { %6223 = vpow2.f32 %v3108_v7  ;;  %v3100_v9 = vsub.f32 %v7447_v57, %v3086_v20  ;;  %2788 = vadd.xlane.f32.xlu0 %v2787_v40 }
0x14fb   :  { %v7500_v41 = vpop.eup %6213  ;;  %v3114_v54 = vmul.f32 1.442695, %v3101_v55 }
0x14fc   :  { %v7502_v60 = vpop.eup %6215  ;;  %v3112_v39 = vmul.f32 1.442695, %v3100_v9  ;;  %v3095_v63 = vpop.xlane.xlu1 %3094  ;;  %v2796_v53 = vsel %vm1429_vm1, %v7500_v41, 0.0 }
0x14fd   :  { %6225 = vpow2.f32 %v3114_v54  ;;  %v3103_v47 = vsub.f32 %v7450_v43, %v3095_v63  ;;  %2797 = vadd.xlane.f32.xlu1 %v2796_v53  ;;  %v3092_v45 = vpop.xlane.xlu0 %3091  ;;  %v2793_v10 = vsel %vm1429_vm1, %v7502_v60, 0.0 }
0x14fe   :  { %6227 = vpow2.f32 %v3112_v39  ;;  %v3102_v57 = vsub.f32 %v7454_v16, %v3092_v45  ;;  %2794 = vadd.xlane.f32.xlu0 %v2793_v10 }
0x14ff   :  { %v7510_v44 = vpop.eup %6217  ;;  %v3118_v34 = vmul.f32 1.442695, %v3103_v47 }
0x1500   :  { %v7512_v30 = vpop.eup %6219  ;;  %v3116_v61 = vmul.f32 1.442695, %v3102_v57  ;;  %v3123_v12 = vsel %vm1429_vm1, %v7510_v44, 0.0 }
0x1501   :  { %6229 = vpow2.f32 %v3118_v34  ;;  %3124 = vadd.xlane.f32.xlu1 %v3123_v12  ;;  %v3120_v43 = vsel %vm1429_vm1, %v7512_v30, 0.0 }
0x1502   :  { %6231 = vpow2.f32 %v3116_v61  ;;  %3121 = vadd.xlane.f32.xlu0 %v3120_v43 }
0x1503   :  { %v7518_v31 = vpop.eup %6221 }
0x1504   :  { %v7520_v16 = vpop.eup %6223  ;;  %v3129_v17 = vsel %vm1429_vm1, %v7518_v31, 0.0 }
0x1505   :  { %3130 = vadd.xlane.f32.xlu1 %v3129_v17  ;;  %v3126_v1 = vsel %vm1429_vm1, %v7520_v16, 0.0 }
0x1506   :  { %3127 = vadd.xlane.f32.xlu0 %v3126_v1 }
0x1507   :  { %v7526_v46 = vpop.eup %6225 }
0x1508   :  { %v7528_v11 = vpop.eup %6227  ;;  %v3135_v35 = vsel %vm1429_vm1, %v7526_v46, 0.0 }
0x1509   :  { %3136 = vadd.xlane.f32.xlu1 %v3135_v35  ;;  %v3132_v62 = vsel %vm1429_vm1, %v7528_v11, 0.0 }
0x150a   :  { %3133 = vadd.xlane.f32.xlu0 %v3132_v62 }
0x150b   :  { %v7534_v51 = vpop.eup %6229 }
0x150c   :  { %v7536_v26 = vpop.eup %6231  ;;  %v3141_v50 = vsel %vm1429_vm1, %v7534_v51, 0.0 }
0x150d   :  { %3142 = vadd.xlane.f32.xlu1 %v3141_v50  ;;  %v3138_v58 = vsel %vm1429_vm1, %v7536_v26, 0.0 }
0x150e   :  { %3139 = vadd.xlane.f32.xlu0 %v3138_v58 }
0x157e   :  { %v2780_v5 = vpop.xlane.xlu1 %2779 }
0x157f   :  { %6233 = vrcp.f32 %v2780_v5  ;;  %v2777_v49 = vpop.xlane.xlu0 %2776 }
0x1580   :  { %6235 = vrcp.f32 %v2777_v49 }
0x1582   :  { %v2786_v21 = vpop.xlane.xlu1 %2785 }
0x1583   :  { %6237 = vrcp.f32 %v2786_v21  ;;  %v2783_v29 = vpop.xlane.xlu0 %2782 }
0x1584   :  { %6239 = vrcp.f32 %v2783_v29 }
0x1586   :  { %v2792_v7 = vpop.xlane.xlu1 %2791 }
0x1587   :  { %6241 = vrcp.f32 %v2792_v7  ;;  %v2789_v18 = vpop.xlane.xlu0 %2788 }
0x1588   :  { %6243 = vrcp.f32 %v2789_v18 }
0x1589   :  { %v6234_v37 = vpop.eup %6233 }
0x158a   :  { %v6236_v55 = vpop.eup %6235  ;;  %v2798_v20 = vpop.xlane.xlu1 %2797  ;;  %v2808_v54 = vmul.f32 %v6234_v37, %v7470_v8  ;;  %v2348_v37 = vld [vmem:[#allocation15 + $0x80] sm:$0xff] }
0x158b   :  { %6245 = vrcp.f32 %v2798_v20  ;;  %v2795_v40 = vpop.xlane.xlu0 %2794  ;;  %v2807_v9 = vmul.f32 %v6236_v55, %v7472_v6  ;;  %v2349_v55 = vld [vmem:[#allocation15 + $0x88] sm:$0xff] }
0x158c   :  { %6247 = vrcp.f32 %v2795_v40  ;;  %v5798_v20 = vpack.c.bf16 %v2349_v55, %v2348_v37 }
0x158d   :  { %v6238_v39 = vpop.eup %6237  ;;  %5143 = vmatprep.mubr.msk.f32.mxu0 %vm1429_vm1, %v2807_v9  ;;  %v2352_v9 = vld [vmem:[#allocation15 + $0xa0] sm:$0xff] }
0x158e   :  { %v6240_v63 = vpop.eup %6239  ;;  %v3125_v53 = vpop.xlane.xlu1 %3124  ;;  %5144 = vmatmul.mubr.msk.f32.vlgmr.msra.gmra.mrb[48].mxu0 %vm1429_vm1, %v2808_v54  ;;  %v2810_v10 = vmul.f32 %v6238_v39, %v7480_v3  ;;  %5799 = vmatprep.subr.bf16.mxu1 %v5798_v20  ;;  %v2353_v54 = vld [vmem:[#allocation15 + $0xa8] sm:$0xff] }
0x158f   :  { %6249 = vrcp.f32 %v3125_v53  ;;  %5170 = vmatpush3.msra.mxu0 %v7414_v27  ;;  %v3122_v47 = vpop.xlane.xlu0 %3121  ;;  %v2809_v45 = vmul.f32 %v6240_v63, %v7482_v24  ;;  %5801 = vmatpush3.bf16.msra.mxu1 %v5798_v20  ;;  %v5806_v39 = vpack.c.bf16 %v2353_v54, %v2352_v9  ;;  %v2356_v53 = vld [vmem:[#allocation15 + $0xc0] sm:$0xff] }
0x1590   :  { %6251 = vrcp.f32 %v3122_v47  ;;  %v2357_v47 = vld [vmem:[#allocation15 + $0xc8] sm:$0xff] }
0x1591   :  { %v6242_v6 = vpop.eup %6241  ;;  %5146 = vmatprep.mubr.msk.f32.mxu0 %vm1429_vm1, %v2809_v45  ;;  %v5814_v45 = vpack.c.bf16 %v2357_v47, %v2356_v53 }
0x1592   :  { %v6244_v8 = vpop.eup %6243  ;;  %v3131_v57 = vpop.xlane.xlu1 %3130  ;;  %5147 = vmatmul.mubr.msk.f32.gmra.mrb[50].mxu0 %vm1429_vm1, %v2810_v10  ;;  %v2812_v27 = vmul.f32 %v6242_v6, %v7490_v4  ;;  %v2358_v10 = vld [vmem:[#allocation15 + $0xd0] sm:$0xff]  ;;  %v2359_v6 = vld [vmem:[#allocation15 + $0xd8] sm:$0xff] }
0x1593   :  { %6253 = vrcp.f32 %v3131_v57  ;;  %v3128_v34 = vpop.xlane.xlu0 %3127  ;;  %v2811_v61 = vmul.f32 %v6244_v8, %v7492_v52  ;;  %v5818_v8 = vpack.c.bf16 %v2359_v6, %v2358_v10  ;;  %v2360_v57 = vld [vmem:[#allocation15 + $0xe0] sm:$0xff] }
0x1594   :  { %6255 = vrcp.f32 %v3128_v34  ;;  %v2361_v34 = vld [vmem:[#allocation15 + $0xe8] sm:$0xff] }
0x1595   :  { %v6246_v12 = vpop.eup %6245  ;;  %5149 = vmatprep.mubr.msk.f32.mxu0 %vm1429_vm1, %v2811_v61  ;;  %v5822_v61 = vpack.c.bf16 %v2361_v34, %v2360_v57 }
0x1596   :  { %v6248_v24 = vpop.eup %6247  ;;  %v3137_v43 = vpop.xlane.xlu1 %3136  ;;  %5150 = vmatmul.mubr.msk.f32.gmra.mrb[52].mxu0 %vm1429_vm1, %v2812_v27  ;;  %v2814_v1 = vmul.f32 %v6246_v12, %v7500_v41  ;;  %v2362_v27 = vld [vmem:[#allocation15 + $0xf0] sm:$0xff]  ;;  %v2363_v12 = vld [vmem:[#allocation15 + $0xf8] sm:$0xff] }
0x1597   :  { %6257 = vrcp.f32 %v3137_v43  ;;  %v3134_v3 = vpop.xlane.xlu0 %3133  ;;  %v2813_v17 = vmul.f32 %v6248_v24, %v7502_v60  ;;  %v5826_v24 = vpack.c.bf16 %v2363_v12, %v2362_v27 }
0x1598   :  { %6259 = vrcp.f32 %v3134_v3 }
0x1599   :  { %v6250_v35 = vpop.eup %6249  ;;  %5152 = vmatprep.mubr.msk.f32.mxu0 %vm1429_vm1, %v2813_v17 }
0x159a   :  { %v6252_v52 = vpop.eup %6251  ;;  %v3143_v62 = vpop.xlane.xlu1 %3142  ;;  %5153 = vmatmul.mubr.msk.f32.gmra.mrb[54].mxu0 %vm1429_vm1, %v2814_v1  ;;  %v3153_v58 = vmul.f32 %v6250_v35, %v7510_v44 }
0x159b   :  { %6261 = vrcp.f32 %v3143_v62  ;;  %v3140_v4 = vpop.xlane.xlu0 %3139  ;;  %v3152_v50 = vmul.f32 %v6252_v52, %v7512_v30 }
0x159c   :  { %6263 = vrcp.f32 %v3140_v4 }
0x159d   :  { %v6254_v5 = vpop.eup %6253  ;;  %5171 = vmatprep.mubr.msk.f32.mxu0 %vm1429_vm1, %v3152_v50 }
0x159e   :  { %v6256_v60 = vpop.eup %6255  ;;  %5172 = vmatmul.mubr.msk.f32.vlgmr.msra.gmra.mrb[56].mxu0 %vm1429_vm1, %v3153_v58  ;;  %v3155_v49 = vmul.f32 %v6254_v5, %v7518_v31 }
0x159f   :  { %v3154_v41 = vmul.f32 %v6256_v60, %v7520_v16 }
0x15a1   :  { %v6258_v21 = vpop.eup %6257  ;;  %5174 = vmatprep.mubr.msk.f32.mxu0 %vm1429_vm1, %v3154_v41 }
0x15a2   :  { %v6260_v29 = vpop.eup %6259  ;;  %5175 = vmatmul.mubr.msk.f32.gmra.mrb[58].mxu0 %vm1429_vm1, %v3155_v49  ;;  %v3157_v44 = vmul.f32 %v6258_v21, %v7526_v46  ;;  %v2350_v46 = vld [vmem:[#allocation15 + $0x90] sm:$0xff] }
0x15a3   :  { %v3156_v30 = vmul.f32 %v6260_v29, %v7528_v11  ;;  %v2351_v11 = vld [vmem:[#allocation15 + $0x98] sm:$0xff] }
0x15a4   :  { %v5802_v40 = vpack.c.bf16 %v2351_v11, %v2350_v46 }
0x15a5   :  { %v6262_v7 = vpop.eup %6261  ;;  %5177 = vmatprep.mubr.msk.f32.mxu0 %vm1429_vm1, %v3156_v30 }
0x15a6   :  { %v6264_v18 = vpop.eup %6263  ;;  %5178 = vmatmul.mubr.msk.f32.gmra.mrb[60].mxu0 %vm1429_vm1, %v3157_v44  ;;  %v3159_v31 = vmul.f32 %v6262_v7, %v7534_v51  ;;  %5803 = vmatprep.subr.bf16.mxu1 %v5802_v40  ;;  %v2354_v51 = vld [vmem:[#allocation15 + $0xb0] sm:$0xff] }
0x15a7   :  { %v3158_v16 = vmul.f32 %v6264_v18, %v7536_v26  ;;  %5805 = vmatpush3.bf16.msra.mxu1 %v5802_v40  ;;  %v2355_v26 = vld [vmem:[#allocation15 + $0xb8] sm:$0xff] }
0x15a8   :  { %5807 = vmatprep.subr.bf16.mxu1 %v5806_v39  ;;  %v5810_v63 = vpack.c.bf16 %v2355_v26, %v2354_v51 }
0x15a9   :  { %5180 = vmatprep.mubr.msk.f32.mxu0 %vm1429_vm1, %v3158_v16 }
0x15aa   :  { %5181 = vmatmul.mubr.msk.f32.gmra.mrb[62].mxu0 %vm1429_vm1, %v3159_v31 }
0x15ab   :  { %5809 = vmatpush3.bf16.msra.mxu1 %v5806_v39 }
0x15ac   :  { %5811 = vmatprep.subr.bf16.mxu1 %v5810_v63 }
0x15af   :  { %5813 = vmatpush3.bf16.msra.mxu1 %v5810_v63 }
0x15b0   :  { %5815 = vmatprep.subr.bf16.mxu1 %v5814_v45 }
0x15b3   :  { %5817 = vmatpush3.bf16.msra.mxu1 %v5814_v45 }
0x15b4   :  { %5819 = vmatprep.subr.bf16.mxu1 %v5818_v8 }
0x15b7   :  { %5821 = vmatpush3.bf16.msra.mxu1 %v5818_v8 }
0x15b8   :  { %5823 = vmatprep.subr.bf16.mxu1 %v5822_v61 }
0x15bb   :  { %5825 = vmatpush3.bf16.msra.mxu1 %v5822_v61 }
0x15bc   :  { %5827 = vmatprep.subr.bf16.mxu1 %v5826_v24 }
0x15bf   :  { %5829 = vmatpush3.bf16.msra.mxu1 %v5826_v24 }
0x1661   :  { %v5145_v43 = vpop.f32.mrb[48].mxu0 }
0x1662   :  { %v2945_v3 = vmul.f32 %v5145_v43, %v7122_v59  ;;  %v2905_v17 = vpop.f32.mrb[49].mxu0 }
0x1663   :  { %v2944_v1 = vmul.f32 %v7117_v56, %v2905_v17 }
0x1665   :  { %v2952_v35 = vadd.f32 %v2945_v3, %v2944_v1  ;;  %v5148_v52 = vpop.f32.mrb[50].mxu0  ;;  %v2373_v3 = vld [vmem:[#allocation16 + $0x90] sm:$0xff]  ;;  %v2374_v1 = vld [vmem:[#allocation16 + $0x98] sm:$0xff] }
0x1666   :  { %v2915_v62 = vpop.f32.mrb[51].mxu0  ;;  %v2947_v50 = vmul.f32 %v5148_v52, %v7145_v13  ;;  %v2375_v52 = vld [vmem:[#allocation16 + $0xa0] sm:$0xff] }
0x1667   :  { %v2946_v4 = vmul.f32 %v7127_v0, %v2915_v62  ;;  %v2376_v62 = vld [vmem:[#allocation16 + $0xa8] sm:$0xff] }
0x1669   :  { %v2953_v58 = vadd.f32 %v2952_v35, %v2946_v4  ;;  %v5151_v5 = vpop.f32.mrb[52].mxu0  ;;  %v5834_v35 = vpack.c.bf16 %v2374_v1, %v2373_v3 }
0x166a   :  { %v2925_v60 = vpop.f32.mrb[53].mxu0  ;;  %v2949_v21 = vmul.f32 %v5151_v5, %v7163_v2 }
0x166b   :  { %v2948_v41 = vmul.f32 %v7148_v14, %v2925_v60  ;;  %v2954_v49 = vadd.f32 %v2953_v58, %v2947_v50 }
0x166d   :  { %v2955_v29 = vadd.f32 %v2954_v49, %v2948_v41  ;;  %v5154_v30 = vpop.f32.mrb[54].mxu0 }
0x166e   :  { %v2935_v44 = vpop.f32.mrb[55].mxu0  ;;  %v2951_v16 = vmul.f32 %v5154_v30, %v7175_v28  ;;  %v2377_v30 = vld [vmem:[#allocation16 + $0xb0] sm:$0xff] }
0x166f   :  { %v2950_v7 = vmul.f32 %v7167_v25, %v2935_v44  ;;  %v2956_v18 = vadd.f32 %v2955_v29, %v2949_v21  ;;  %v2378_v44 = vld [vmem:[#allocation16 + $0xb8] sm:$0xff] }
0x1671   :  { %v2957_v31 = vadd.f32 %v2956_v18, %v2950_v7  ;;  %v5173_v37 = vpop.f32.mrb[56].mxu0  ;;  %v5842_v7 = vpack.c.bf16 %v2378_v44, %v2377_v30  ;;  %v2379_v18 = vld [vmem:[#allocation16 + $0xc0] sm:$0xff]  ;;  %v2404_v30 = vld [vmem:[#allocation18 + $0xf0] sm:$0xff]  ;;  %v2405_v44 = vld [vmem:[#allocation18 + $0xf8] sm:$0xff] }
0x1672   :  { %v3290_v55 = vmul.f32 %v5173_v37, %v7122_v59  ;;  %v3250_v20 = vpop.f32.mrb[57].mxu0 }
0x1673   :  { %v3289_v46 = vmul.f32 %v7117_v56, %v3250_v20  ;;  %v2958_v11 = vadd.f32 %v2957_v31, %v2951_v16  ;;  %v2380_v16 = vld [vmem:[#allocation16 + $0xc8] sm:$0xff]  ;;  %v2381_v31 = vld [vmem:[#allocation16 + $0xd0] sm:$0xff] }
0x1674   :  { %v5846_v37 = vpack.c.bf16 %v2380_v16, %v2379_v18 }
0x1675   :  { %v3297_v40 = vadd.f32 %v3290_v55, %v3289_v46  ;;  %v5176_v9 = vpop.f32.mrb[58].mxu0  ;;  %5215 = vmatprep.mubr.f32.mxu1 %v2958_v11  ;;  %v2382_v55 = vld [vmem:[#allocation16 + $0xd8] sm:$0xff]  ;;  %v2383_v46 = vld [vmem:[#allocation16 + $0xe0] sm:$0xff]  ;;  %v2384_v11 = vld [vmem:[#allocation16 + $0xe8] sm:$0xff] }
0x1676   :  { %v3260_v54 = vpop.f32.mrb[59].mxu0  ;;  %v3292_v51 = vmul.f32 %v5176_v9, %v7145_v13  ;;  %v4447_v13 = vld [vmem:[%s7748_s22 + $0x1] ss:$0 sm:$0xff]  ;;  %v5850_v20 = vpack.c.bf16 %v2382_v55, %v2381_v31  ;;  %v2385_v9 = vld [vmem:[#allocation16 + $0xf0] sm:$0xff]  ;;  %v3595_v55 = vadd.s32 1, %v7070_v32 }
0x1677   :  { %v3291_v39 = vmul.f32 %v7127_v0, %v3260_v54  ;;  %v2386_v54 = vld [vmem:[#allocation16 + $0xf8] sm:$0xff] }
0x1679   :  { %v3298_v26 = vadd.f32 %v3297_v40, %v3291_v39  ;;  %v5179_v63 = vpop.f32.mrb[60].mxu0  ;;  %v5854_v40 = vpack.c.bf16 %v2384_v11, %v2383_v46  ;;  %v5858_v39 = vpack.c.bf16 %v2386_v54, %v2385_v9  ;;  %v4449_v46 = vld [vmem:[%s7750_s25 + $0x1] ss:$0 sm:$0xff] }
0x167a   :  { %v3270_v53 = vpop.f32.mrb[61].mxu0  ;;  %v3294_v59 = vmul.f32 %v5179_v63, %v7163_v2  ;;  %v2392_v63 = vld [vmem:[#allocation18 + $0x90] sm:$0xff] }
0x167b   :  { %v3293_v47 = vmul.f32 %v7148_v14, %v3270_v53  ;;  %v3299_v45 = vadd.f32 %v3298_v26, %v3292_v51  ;;  %v2390_v51 = vld [vmem:[#allocation18 + $0x80] sm:$0xff]  ;;  %v2391_v26 = vld [vmem:[#allocation18 + $0x88] sm:$0xff] }
0x167c   :  { %v5862_v53 = vpack.c.bf16 %v2391_v26, %v2390_v51 }
0x167d   :  { %v3300_v10 = vadd.f32 %v3299_v45, %v3293_v47  ;;  %v5182_v56 = vpop.f32.mrb[62].mxu0  ;;  %v2393_v47 = vld [vmem:[#allocation18 + $0x98] sm:$0xff] }
0x167e   :  { %v3280_v6 = vpop.f32.mrb[63].mxu0  ;;  %v3296_v34 = vmul.f32 %v5182_v56, %v7175_v28  ;;  %v2372_v28 = vld [vmem:[#allocation16 + $0x88] sm:$0xff]  ;;  %v5866_v45 = vpack.c.bf16 %v2393_v47, %v2392_v63  ;;  %5863 = vmatprep.subr.bf16.mxu1 %v5862_v53  ;;  %v3674_v63 = vld [vmem:[#allocation19] sm:$0xff] }
0x167f   :  { %v3295_v8 = vmul.f32 %v7167_v25, %v3280_v6  ;;  %v3301_v57 = vadd.f32 %v3300_v10, %v3294_v59  ;;  %v2371_v25 = vld [vmem:[#allocation16 + $0x80] sm:$0xff]  ;;  %v2395_v10 = vld [vmem:[#allocation18 + $0xa8] sm:$0xff]  ;;  %v2396_v6 = vld [vmem:[#allocation18 + $0xb0] sm:$0xff] }
0x1680   :  { %v5830_v17 = vpack.c.bf16 %v2372_v28, %v2371_v25  ;;  %v2394_v59 = vld [vmem:[#allocation18 + $0xa0] sm:$0xff] }
0x1681   :  { %v3302_v0 = vadd.f32 %v3301_v57, %v3295_v8  ;;  %v5870_v56 = vpack.c.bf16 %v2395_v10, %v2394_v59  ;;  %v2397_v8 = vld [vmem:[#allocation18 + $0xb8] sm:$0xff]  ;;  %v3676_v59 = vld [vmem:[#allocation19 + $0x10] sm:$0xff] }
0x1682   :  { %5831 = vmatprep.subr.bf16.mxu0 %v5830_v17  ;;  %v5874_v57 = vpack.c.bf16 %v2397_v8, %v2396_v6  ;;  %v3677_v10 = vld [vmem:[#allocation19 + $0x18] sm:$0xff]  ;;  %v3680_v6 = vld [vmem:[#allocation19 + $0x30] sm:$0xff] }
0x1683   :  { %v3303_v61 = vadd.f32 %v3302_v0, %v3296_v34  ;;  %5833 = vmatpush3.bf16.msra.mxu0 %v5830_v17  ;;  %v2398_v34 = vld [vmem:[#allocation18 + $0xc0] sm:$0xff]  ;;  %v2399_v0 = vld [vmem:[#allocation18 + $0xc8] sm:$0xff]  ;;  %v3681_v8 = vld [vmem:[#allocation19 + $0x38] sm:$0xff] }
0x1684   :  { %5835 = vmatprep.subr.bf16.mxu0 %v5834_v35 }
0x1685   :  { %5216 = vmatmul.mubr.f32.vlgmr.msra.gmra.mrb[30].mxu1 %v3303_v61  ;;  %v5878_v61 = vpack.c.bf16 %v2399_v0, %v2398_v34  ;;  %v3682_v34 = vld [vmem:[#allocation19 + $0x40] sm:$0xff]  ;;  %v3683_v0 = vld [vmem:[#allocation19 + $0x48] sm:$0xff] }
0x1686   :  { %5865 = vmatpush3.bf16.msra.mxu1 %v5862_v53  ;;  %v3675_v53 = vld [vmem:[#allocation19 + $0x8] sm:$0xff] }
0x1687   :  { %5837 = vmatpush3.bf16.msra.mxu0 %v5834_v35  ;;  %5867 = vmatprep.subr.bf16.mxu1 %v5866_v45  ;;  %v5898_v32 = vpack.c.bf16 %v3675_v53, %v3674_v63  ;;  %v3806_v63 = vld [vmem:[#allocation21 + $0x68] sm:$0xff] }
0x168a   :  { %5869 = vmatpush3.bf16.msra.mxu1 %v5866_v45 }
0x168b   :  { %5871 = vmatprep.subr.bf16.mxu1 %v5870_v56 }
0x168e   :  { %5873 = vmatpush3.bf16.msra.mxu1 %v5870_v56 }
0x168f   :  { %5875 = vmatprep.subr.bf16.mxu1 %v5874_v57 }
0x1692   :  { %5877 = vmatpush3.bf16.msra.mxu1 %v5874_v57  ;;  %v5907_v57 = vpack.c.bf16 %v3681_v8, %v3680_v6  ;;  %v4455_v6 = vld [vmem:[%s7753_s14] ss:$0 sm:$0xff] }
0x1693   :  { %5879 = vmatprep.subr.bf16.mxu1 %v5878_v61 }
0x1696   :  { %5881 = vmatpush3.bf16.msra.mxu1 %v5878_v61  ;;  %v5910_v61 = vpack.c.bf16 %v3683_v0, %v3682_v34  ;;  %v4456_v34 = vld [vmem:[%s7751_s29 + $0x1] ss:$0 sm:$0xff] }
0x1758   :  { %v5217_v27 = vpop.f32.mrb[30].mxu1 }
0x1759   :  { %v3380_v12 = vadd.f32 %v5217_v27, %v7375_v15  ;;  %v3370_v24 = vpop.f32.mrb[31].mxu1  ;;  %v5838_v15 = vpack.c.bf16 %v2376_v62, %v2375_v52  ;;  %v2401_v27 = vld [vmem:[#allocation18 + $0xd8] sm:$0xff]  ;;  %v3416_v62 = vrot.slane %v7394_v42, %v7077_v48 }
0x175a   :  { %v3379_v14 = vadd.f32 %v3370_v24, %v7377_v36  ;;  %v2402_v24 = vld [vmem:[#allocation18 + $0xe0] sm:$0xff]  ;;  %v4448_v42 = vld [vmem:[%s7749_s23 + $0x1] ss:$0 sm:$0xff] }
0x175b   :  { %v7594_v43 = vadd.f32 %v4447_v13, %v3380_v12  ;;  %5839 = vmatprep.subr.bf16.mxu0 %v5838_v15 }
0x175c   :  { %v7596_v2 = vadd.f32 %v4447_v13, %v3379_v14  ;;  %5841 = vmatpush3.bf16.msra.mxu0 %v5838_v15  ;;  %v2400_v13 = vld [vmem:[#allocation18 + $0xd0] sm:$0xff]  ;;  %v2403_v14 = vld [vmem:[#allocation18 + $0xe8] sm:$0xff] }
0x175d   :  { %3391 = vadd.xlane.f32.xlu1 %v7594_v43  ;;  %5843 = vmatprep.subr.bf16.mxu0 %v5842_v7  ;;  %v5882_v12 = vpack.c.bf16 %v2401_v27, %v2400_v13  ;;  %v5886_v25 = vpack.c.bf16 %v2403_v14, %v2402_v24  ;;  %v3684_v13 = vld [vmem:[#allocation19 + $0x50] sm:$0xff]  ;;  %v3685_v27 = vld [vmem:[#allocation19 + $0x58] sm:$0xff]  ;;  %v3686_v24 = vld [vmem:[#allocation19 + $0x60] sm:$0xff] }
0x175e   :  { %3389 = vadd.xlane.f32.xlu0 %v7596_v2  ;;  %v3687_v14 = vld [vmem:[#allocation19 + $0x68] sm:$0xff] }
0x175f   :  { %5883 = vmatprep.subr.bf16.mxu1 %v5882_v12 }
0x1760   :  { %5845 = vmatpush3.bf16.msra.mxu0 %v5842_v7  ;;  %5885 = vmatpush3.bf16.msra.mxu1 %v5882_v12  ;;  %v5890_v7 = vpack.c.bf16 %v2405_v44, %v2404_v30  ;;  %v5913_v12 = vpack.c.bf16 %v3685_v27, %v3684_v13  ;;  %v3797_v44 = vld [vmem:[#allocation21 + $0x20] sm:$0xff] }
0x1761   :  { %5847 = vmatprep.subr.bf16.mxu0 %v5846_v37  ;;  %5887 = vmatprep.subr.bf16.mxu1 %v5886_v25 }
0x1764   :  { %5849 = vmatpush3.bf16.msra.mxu0 %v5846_v37  ;;  %5889 = vmatpush3.bf16.msra.mxu1 %v5886_v25  ;;  %v5916_v25 = vpack.c.bf16 %v3687_v14, %v3686_v24  ;;  %v3912_v24 = vld [vmem:[#allocation21 + $0x80] sm:$0xff]  ;;  %v3913_v14 = vld [vmem:[#allocation21 + $0x88] sm:$0xff] }
0x1765   :  { %5851 = vmatprep.subr.bf16.mxu0 %v5850_v20  ;;  %5891 = vmatprep.subr.bf16.mxu1 %v5890_v7 }
0x1768   :  { %5853 = vmatpush3.bf16.msra.mxu0 %v5850_v20  ;;  %5893 = vmatpush3.bf16.msra.mxu1 %v5890_v7  ;;  %v3596_v20 = vmul.u32 8, %v3595_v55  ;;  %v3798_v7 = vld [vmem:[#allocation21 + $0x28] sm:$0xff]  ;;  %v3799_v55 = vld [vmem:[#allocation21 + $0x30] sm:$0xff] }
0x1769   :  { %5855 = vmatprep.subr.bf16.mxu0 %v5854_v40 }
0x176a   :  { %v4450_v54 = vadd.s32 4294967295, %v3596_v20  ;;  %v3800_v20 = vld [vmem:[#allocation21 + $0x38] sm:$0xff] }
0x176c   :  { %5857 = vmatpush3.bf16.msra.mxu0 %v5854_v40  ;;  %vm3598_vm10 = vcmp.eq.s32.totalorder %v7031_v19, %v4450_v54  ;;  %v3678_v19 = vld [vmem:[#allocation19 + $0x20] sm:$0xff]  ;;  %v3803_v54 = vld [vmem:[#allocation21 + $0x50] sm:$0xff] }
0x176d   :  { %5859 = vmatprep.subr.bf16.mxu0 %v5858_v39  ;;  %v4451_v45 = vsel %vm3598_vm10, 1.0, %v6704_v22 }
0x1770   :  { %5861 = vmatpush3.bf16.msra.mxu0 %v5858_v39 }
0x17ea   :  { %v3392_v36 = vpop.xlane.xlu1 %3391 }
0x17eb   :  { %v3394_v4 = vmul.f32 0.03125, %v3392_v36  ;;  %v3390_v50 = vpop.xlane.xlu0 %3389 }
0x17ec   :  { %v3393_v58 = vmul.f32 0.03125, %v3390_v50 }
0x17ed   :  { %v3396_v5 = vsub.f32 %v7594_v43, %v3394_v4 }
0x17ee   :  { %v3395_v60 = vsub.f32 %v7596_v2, %v3393_v58  ;;  %v3422_v58 = vrot.slane %v7397_v38, %v7077_v48  ;;  %v6705_v38 = vmov 0.0|0.0  }
0x17ef   :  { %v7603_v41 = vmul.f32 %v7037_v23, %v3396_v5  ;;  %5894 = vmatprep.subr.bf16.mxu0 %v6705_v38  ;;  %5921 = vmatprep.subr.bf16.mxu1 %v6705_v38 }
0x17f0   :  { %v7606_v49 = vmul.f32 %v7037_v23, %v3395_v60 }
0x17f1   :  { %v3400_v21 = vmul.f32 %v7603_v41, %v7603_v41 }
0x17f2   :  { %v3399_v29 = vmul.f32 %v7606_v49, %v7606_v49 }
0x17f3   :  { %3403 = vadd.xlane.f32.xlu1 %v3400_v21 }
0x17f4   :  { %3401 = vadd.xlane.f32.xlu0 %v3399_v29 }
0x1880   :  { %v3404_v28 = vpop.xlane.xlu1 %3403 }
0x1881   :  { %v3406_v3 = vmul.f32 0.03125, %v3404_v28  ;;  %v3402_v17 = vpop.xlane.xlu0 %3401  ;;  %v3688_v28 = vld [vmem:[#allocation19 + $0x70] sm:$0xff] }
0x1882   :  { %v3405_v1 = vmul.f32 0.03125, %v3402_v17 }
0x1883   :  { %v3408_v35 = vadd.f32 1e-05, %v3406_v3  ;;  %v3689_v3 = vld [vmem:[#allocation19 + $0x78] sm:$0xff] }
0x1884   :  { %v3407_v52 = vadd.f32 1e-05, %v3405_v1  ;;  %v5919_v17 = vpack.c.bf16 %v3689_v3, %v3688_v28  ;;  %v5946_v28 = vpack.c.bf16 %v3913_v14, %v3912_v24  ;;  %v3915_v3 = vld [vmem:[#allocation21 + $0x98] sm:$0xff]  ;;  %v4163_v24 = vld [vmem:[#allocation24 + $0x68] sm:$0xff] }
0x1885   :  { %6265 = vrsqrt.f32 %v3408_v35 }
0x1886   :  { %6267 = vrsqrt.f32 %v3407_v52  ;;  %v4453_v52 = vld [vmem:[%s7751_s29] ss:$0 sm:$0xff] }
0x188f   :  { %v6266_v15 = vpop.eup %6265 }
0x1890   :  { %v6268_v36 = vpop.eup %6267  ;;  %v3412_v4 = vmul.f32 %v6266_v15, %v7603_v41 }
0x1891   :  { %v3411_v50 = vmul.f32 %v6268_v36, %v7606_v49 }
0x1892   :  { %v3418_v5 = vmul.f32 %v3416_v62, %v3412_v4 }
0x1893   :  { %v3417_v60 = vmul.f32 %v3416_v62, %v3411_v50 }
0x1894   :  { %v3424_v29 = vadd.f32 %v3422_v58, %v3418_v5  ;;  %v3794_v5 = vld [vmem:[#allocation21 + $0x8] sm:$0xff] }
0x1895   :  { %v3423_v21 = vadd.f32 %v3422_v58, %v3417_v60  ;;  %v3793_v58 = vld [vmem:[#allocation21] sm:$0xff]  ;;  %v3795_v60 = vld [vmem:[#allocation21 + $0x10] sm:$0xff] }
0x1897   :  { %5250 = vmatprep.mubr.f32.mxu0 %v3423_v21  ;;  %v5922_v21 = vpack.c.bf16 %v3794_v5, %v3793_v58 }
0x1898   :  { %5251 = vmatmul.mubr.f32.vlgmr.msra.gmra.mrb[64].mxu0 %v3424_v29  ;;  %v3796_v29 = vld [vmem:[#allocation21 + $0x18] sm:$0xff] }
0x1899   :  { %5292 = vmatprep.mubr.msk.f32.mxu0 %vm6706_vm9, %v6704_v22  ;;  %v5925_v30 = vpack.c.bf16 %v3796_v29, %v3795_v60  ;;  %v3918_v60 = vld [vmem:[#allocation21 + $0xb0] sm:$0xff] }
0x196b   :  { %v5252_v18 = vpop.f32.mrb[64].mxu0 }
0x196c   :  { %v3503_v41 = vadd.f32 %v5252_v18, %v4448_v42  ;;  %v3497_v16 = vpop.f32.mrb[65].mxu0 }
0x196d   :  { %v3498_v49 = vadd.f32 %v4448_v42, %v3497_v16  ;;  %v5928_v42 = vpack.c.bf16 %v3798_v7, %v3797_v44  ;;  %v3921_v44 = vld [vmem:[#allocation21 + $0xc8] sm:$0xff] }
0x196e   :  { %v3507_v37 = vmax.f32 %v3503_v41, 0.0 }
0x196f   :  { %v3506_v31 = vmax.f32 %v3498_v49, 0.0 }
0x1971   :  { %5285 = vmatprep.mubr.f32.mxu1 %v3506_v31 }
0x1972   :  { %5286 = vmatmul.mubr.f32.vlgmr.msra.gmra.mrb[32].mxu1 %v3507_v37 }
0x1973   :  { %5362 = vmatprep.mubr.msk.f32.mxu1 %vm6706_vm9, %v6704_v22  ;;  %5923 = vmatpush3.bf16.msra.mxu1 %v5922_v21  ;;  %v3919_v21 = vld [vmem:[#allocation21 + $0xb8] sm:$0xff] }
0x1974   :  { %5924 = vmatprep.subr.bf16.mxu1 %v6705_v38  ;;  %v5955_v29 = vpack.c.bf16 %v3919_v21, %v3918_v60  ;;  %v4032_v60 = vld [vmem:[#allocation22 + $0x10] sm:$0xff]  ;;  %v4035_v21 = vld [vmem:[#allocation22 + $0x28] sm:$0xff] }
0x1977   :  { %5926 = vmatpush3.bf16.msra.mxu1 %v5925_v30  ;;  %v3920_v30 = vld [vmem:[#allocation21 + $0xc0] sm:$0xff] }
0x1978   :  { %5927 = vmatprep.subr.bf16.mxu1 %v6705_v38  ;;  %v5958_v7 = vpack.c.bf16 %v3921_v44, %v3920_v30 }
0x197b   :  { %5929 = vmatpush3.bf16.msra.mxu1 %v5928_v42  ;;  %v3922_v42 = vld [vmem:[#allocation21 + $0xd0] sm:$0xff] }
0x197c   :  { %5930 = vmatprep.subr.bf16.mxu1 %v6705_v38 }
0x1a45   :  { %v5287_v11 = vpop.f32.mrb[32].mxu1 }
0x1a46   :  { %v3584_v40 = vadd.f32 %v5287_v11, %v7594_v43  ;;  %v3574_v9 = vpop.f32.mrb[33].mxu1  ;;  %v5901_v43 = vpack.c.bf16 %v3677_v10, %v3676_v59  ;;  %v3801_v11 = vld [vmem:[#allocation21 + $0x40] sm:$0xff] }
0x1a47   :  { %v3583_v39 = vadd.f32 %v3574_v9, %v7596_v2  ;;  %v3679_v2 = vld [vmem:[#allocation19 + $0x28] sm:$0xff] }
0x1a48   :  { %v3592_v51 = vadd.f32 %v4449_v46, %v3584_v40  ;;  %v5904_v56 = vpack.c.bf16 %v3679_v2, %v3678_v19  ;;  %v3802_v40 = vld [vmem:[#allocation21 + $0x48] sm:$0xff]  ;;  %v4454_v2 = vld [vmem:[%s7752_s26] ss:$0 sm:$0xff] }
0x1a49   :  { %v3591_v26 = vadd.f32 %v4449_v46, %v3583_v39  ;;  %v5931_v46 = vpack.c.bf16 %v3800_v20, %v3799_v55  ;;  %v5934_v9 = vpack.c.bf16 %v3802_v40, %v3801_v11  ;;  %v3804_v39 = vld [vmem:[#allocation21 + $0x58] sm:$0xff] }
0x1a4a   :  { %v3927_v55 = vld [vmem:[#allocation21 + $0xf8] sm:$0xff] }
0x1a4b   :  { %v5895_v47 = vpack.c.bf16 %v3592_v51, %v3591_v26  ;;  %5932 = vmatpush3.bf16.msra.mxu1 %v5931_v46  ;;  %v5937_v51 = vpack.c.bf16 %v3804_v39, %v3803_v54  ;;  %v3805_v26 = vld [vmem:[#allocation21 + $0x60] sm:$0xff]  ;;  %v4457_v54 = vld [vmem:[%s7752_s26 + $0x1] ss:$0 sm:$0xff] }
0x1a4c   :  { %5933 = vmatprep.subr.bf16.mxu1 %v6705_v38  ;;  %v5940_v53 = vpack.c.bf16 %v3806_v63, %v3805_v26  ;;  %v4151_v26 = vld [vmem:[#allocation24 + $0x8] sm:$0xff]  ;;  %v4458_v63 = vld [vmem:[%s7753_s14 + $0x1] ss:$0 sm:$0xff] }
0x1a4d   :  { %5896 = vmatpush3.bf16.msra.mxu0 %v5895_v47  ;;  %v3807_v47 = vld [vmem:[#allocation21 + $0x70] sm:$0xff] }
0x1a4e   :  { %5897 = vmatprep.subr.bf16.mxu0 %v6705_v38 }
0x1a4f   :  { %5935 = vmatpush3.bf16.msra.mxu1 %v5934_v9 }
0x1a50   :  { %5293 = vmatmul.mubr.msk.f32.vlgmr.msra.gmra.mrb[66].mxu0 %vm350_vm0, %v4451_v45  ;;  %vm3768_vm0 = vcmask 1041408   ;;  %5936 = vmatprep.subr.bf16.mxu1 %v6705_v38  ;;  %v3808_v45 = vld [vmem:[#allocation21 + $0x78] sm:$0xff] }
0x1a51   :  { %5899 = vmatpush3.bf16.msra.mxu0 %v5898_v32  ;;  %5327 = vmatprep.mubr.msk.f32.mxu0 %vm6706_vm9, %v6704_v22  ;;  %v5943_v32 = vpack.c.bf16 %v3808_v45, %v3807_v47 }
0x1a52   :  { %5900 = vmatprep.subr.bf16.mxu0 %v6705_v38 }
0x1a53   :  { %5938 = vmatpush3.bf16.msra.mxu1 %v5937_v51  ;;  %v4150_v51 = vld [vmem:[#allocation24] sm:$0xff] }
0x1a54   :  { %5939 = vmatprep.subr.bf16.mxu1 %v6705_v38  ;;  %v6002_v47 = vpack.c.bf16 %v4151_v26, %v4150_v51  ;;  %v4043_v51 = vld [vmem:[#allocation22 + $0x68] sm:$0xff]  ;;  %v4045_v26 = vld [vmem:[#allocation22 + $0x78] sm:$0xff] }
0x1a55   :  { %5902 = vmatpush3.bf16.msra.mxu0 %v5901_v43 }
0x1a56   :  { %5903 = vmatprep.subr.bf16.mxu0 %v6705_v38 }
0x1a57   :  { %5941 = vmatpush3.bf16.msra.mxu1 %v5940_v53 }
0x1a58   :  { %5942 = vmatprep.subr.bf16.mxu1 %v6705_v38 }
0x1a59   :  { %5905 = vmatpush3.bf16.msra.mxu0 %v5904_v56 }
0x1a5a   :  { %5906 = vmatprep.subr.bf16.mxu0 %v6705_v38 }
0x1a5b   :  { %5944 = vmatpush3.bf16.msra.mxu1 %v5943_v32  ;;  %v4152_v32 = vld [vmem:[#allocation24 + $0x10] sm:$0xff] }
0x1a5d   :  { %5908 = vmatpush3.bf16.msra.mxu0 %v5907_v57 }
0x1a5e   :  { %5909 = vmatprep.subr.bf16.mxu0 %v6705_v38 }
0x1a61   :  { %5911 = vmatpush3.bf16.msra.mxu0 %v5910_v61 }
0x1a62   :  { %5912 = vmatprep.subr.bf16.mxu0 %v6705_v38 }
0x1a65   :  { %5914 = vmatpush3.bf16.msra.mxu0 %v5913_v12 }
0x1a66   :  { %5915 = vmatprep.subr.bf16.mxu0 %v6705_v38 }
0x1a69   :  { %5917 = vmatpush3.bf16.msra.mxu0 %v5916_v25  ;;  %v3914_v25 = vld [vmem:[#allocation21 + $0x90] sm:$0xff] }
0x1a6a   :  { %5918 = vmatprep.subr.bf16.mxu0 %v6705_v38 }
0x1a6d   :  { %5920 = vmatpush3.bf16.msra.mxu0 %v5919_v17  ;;  %v5949_v17 = vpack.c.bf16 %v3915_v3, %v3914_v25  ;;  %v4164_v25 = vld [vmem:[#allocation24 + $0x70] sm:$0xff] }
0x1a6e   :  { %5945 = vmatprep.subr.bf16.mxu0 %v6705_v38 }
0x1b23   :  { %v7643_v1 = vpop.f32.mrb[66].mxu0 }
0x1b24   :  { %5328 = vmatmul.mubr.f32.vlgmr.msra.gmra.mrb[68].mxu0 %v7643_v1  ;;  %v5294_v35 = vpop.f32.mrb[67].mxu0 }
0x1b25   :  { %5397 = vmatprep.mubr.msk.f32.mxu0 %vm6706_vm9, %v6704_v22  ;;  %5947 = vmatpush3.bf16.msra.mxu0 %v5946_v28  ;;  %v3916_v35 = vld [vmem:[#allocation21 + $0xa0] sm:$0xff]  ;;  %v4165_v28 = vld [vmem:[#allocation24 + $0x78] sm:$0xff] }
0x1b26   :  { %5948 = vmatprep.subr.bf16.mxu0 %v6705_v38  ;;  %v6023_v3 = vpack.c.bf16 %v4165_v28, %v4164_v25 }
0x1b29   :  { %5950 = vmatpush3.bf16.msra.mxu0 %v5949_v17  ;;  %v4459_v17 = vld [vmem:[%s7751_s29 + $0x2] ss:$0 sm:$0xff] }
0x1b2a   :  { %5951 = vmatprep.subr.bf16.mxu0 %v6705_v38 }
0x1bf7   :  { %v3761_v62 = vpop.f32.mrb[68].mxu0 }
0x1bf8   :  { %v3762_v15 = vadd.f32 %v4453_v52, %v3761_v62  ;;  %v5329_v36 = vpop.f32.mrb[69].mxu0  ;;  %v3917_v52 = vld [vmem:[#allocation21 + $0xa8] sm:$0xff] }
0x1bf9   :  { %v5952_v62 = vpack.c.bf16 %v3917_v52, %v3916_v35 }
0x1bfa   :  { %v3765_v4 = vmax.f32 %v3762_v15, 0.0 }
0x1bfb   :  { %5953 = vmatpush3.bf16.msra.mxu0 %v5952_v62 }
0x1bfc   :  { %v3769_v50 = vsel %vm3768_vm0, %v3765_v4, 0.0  ;;  %5954 = vmatprep.subr.bf16.mxu0 %v6705_v38 }
0x1bfd   :  { %3770 = vadd.xlane.f32.xlu0 %v3769_v50 }
0x1bff   :  { %5956 = vmatpush3.bf16.msra.mxu0 %v5955_v29  ;;  %v4037_v29 = vld [vmem:[#allocation22 + $0x38] sm:$0xff] }
0x1c00   :  { %5957 = vmatprep.subr.bf16.mxu0 %v6705_v38  ;;  %v5973_v44 = vpack.c.bf16 %v4037_v29, %v4035_v21  ;;  %v4245_v21 = vld [vmem:[#allocation25] sm:$0xff]  ;;  %v4246_v29 = vld [vmem:[#allocation25 + $0x8] sm:$0xff] }
0x1c03   :  { %5959 = vmatpush3.bf16.msra.mxu0 %v5958_v7  ;;  %v4034_v7 = vld [vmem:[#allocation22 + $0x20] sm:$0xff] }
0x1c04   :  { %5960 = vmatprep.subr.bf16.mxu0 %v6705_v38 }
0x1c8a   :  { %v3771_v18 = vpop.xlane.xlu0 %3770 }
0x1c8b   :  { %v3772_v41 = vmul.f32 0.03125, %v3771_v18  ;;  %v3923_v18 = vld [vmem:[#allocation21 + $0xd8] sm:$0xff] }
0x1c8d   :  { %v3773_v16 = vsub.f32 %v3765_v4, %v3772_v41  ;;  %v5961_v41 = vpack.c.bf16 %v3923_v18, %v3922_v42  ;;  %v4036_v42 = vld [vmem:[#allocation22 + $0x30] sm:$0xff] }
0x1c8f   :  { %v3774_v49 = vmul.f32 %v7037_v23, %v3773_v16  ;;  %v3924_v16 = vld [vmem:[#allocation21 + $0xe0] sm:$0xff]  ;;  %5962 = vmatpush3.bf16.msra.mxu0 %v5961_v41  ;;  %v4041_v41 = vld [vmem:[#allocation22 + $0x58] sm:$0xff] }
0x1c90   :  { %5963 = vmatprep.subr.bf16.mxu0 %v6705_v38 }
0x1c91   :  { %v3775_v31 = vmul.f32 %v3774_v49, %v3774_v49 }
0x1c93   :  { %v3776_v37 = vsel %vm3768_vm0, %v3775_v31, 0.0 }
0x1c94   :  { %3777 = vadd.xlane.f32.xlu1 %v3776_v37  ;;  %v3926_v37 = vld [vmem:[#allocation21 + $0xf0] sm:$0xff] }
0x1c95   :  { %v5967_v20 = vpack.c.bf16 %v3927_v55, %v3926_v37  ;;  %v4038_v37 = vld [vmem:[#allocation22 + $0x40] sm:$0xff]  ;;  %v4040_v55 = vld [vmem:[#allocation22 + $0x50] sm:$0xff] }
0x1d21   :  { %v3778_v59 = vpop.xlane.xlu1 %3777 }
0x1d22   :  { %v3779_v10 = vmul.f32 0.03125, %v3778_v59  ;;  %v4153_v59 = vld [vmem:[#allocation24 + $0x18] sm:$0xff] }
0x1d24   :  { %v3780_v43 = vadd.f32 1e-05, %v3779_v10  ;;  %v6005_v10 = vpack.c.bf16 %v4153_v59, %v4152_v32  ;;  %v4047_v32 = vld [vmem:[#allocation22 + $0x88] sm:$0xff]  ;;  %v4049_v59 = vld [vmem:[#allocation22 + $0x98] sm:$0xff] }
0x1d26   :  { %6269 = vrsqrt.f32 %v3780_v43  ;;  %v4154_v43 = vld [vmem:[#allocation24 + $0x20] sm:$0xff] }
0x1d30   :  { %v6270_v19 = vpop.eup %6269 }
0x1d31   :  { %v3782_v56 = vmul.f32 %v6270_v19, %v3774_v49  ;;  %v3925_v49 = vld [vmem:[#allocation21 + $0xe8] sm:$0xff] }
0x1d32   :  { %v5964_v31 = vpack.c.bf16 %v3925_v49, %v3924_v16  ;;  %v4155_v19 = vld [vmem:[#allocation24 + $0x28] sm:$0xff]  ;;  %v5975_v49 = vpack.c.bf16 %v4036_v42, %v4034_v7  ;;  %v4248_v7 = vld [vmem:[#allocation25 + $0x18] sm:$0xff] }
0x1d33   :  { %v3787_v8 = vmul.f32 %v4454_v2, %v3782_v56  ;;  %v6008_v2 = vpack.c.bf16 %v4155_v19, %v4154_v43  ;;  %v4156_v56 = vld [vmem:[#allocation24 + $0x30] sm:$0xff]  ;;  %v5985_v43 = vpack.c.bf16 %v4049_v59, %v4047_v32 }
0x1d34   :  { %5965 = vmatpush3.bf16.msra.mxu0 %v5964_v31  ;;  %v4048_v19 = vld [vmem:[#allocation22 + $0x90] sm:$0xff] }
0x1d35   :  { %v3792_v57 = vadd.f32 %v4455_v6, %v3787_v8  ;;  %5966 = vmatprep.subr.bf16.mxu0 %v6705_v38  ;;  %v4157_v6 = vld [vmem:[#allocation24 + $0x38] sm:$0xff] }
0x1d36   :  { %v6011_v8 = vpack.c.bf16 %v4157_v6, %v4156_v56  ;;  %v4053_v56 = vld [vmem:[#allocation22 + $0xb8] sm:$0xff] }
0x1d37   :  { %5363 = vmatmul.mubr.f32.vlgmr.msra.gmra.mrb[34].mxu1 %v3792_v57  ;;  %v4158_v57 = vld [vmem:[#allocation24 + $0x40] sm:$0xff] }
0x1d38   :  { %4138 = vmatprep.mubr.f32.mxu1 %v6704_v22  ;;  %5968 = vmatpush3.bf16.msra.mxu0 %v5967_v20  ;;  %v5979_v20 = vpack.c.bf16 %v4040_v55, %v4038_v37  ;;  %v4253_v37 = vld [vmem:[#allocation25 + $0x40] sm:$0xff]  ;;  %v4254_v55 = vld [vmem:[#allocation25 + $0x48] sm:$0xff] }
0x1d39   :  { %6001 = vmatprep.subr.bf16.mxu0 %v6705_v38 }
0x1e0a   :  { %v3880_v0 = vpop.f32.mrb[34].mxu1 }
0x1e0b   :  { %v3881_v61 = vadd.f32 %v4456_v34, %v3880_v0  ;;  %v5364_v13 = vpop.f32.mrb[35].mxu1  ;;  %v4159_v34 = vld [vmem:[#allocation24 + $0x48] sm:$0xff] }
0x1e0c   :  { %v6014_v0 = vpack.c.bf16 %v4159_v34, %v4158_v57  ;;  %v4161_v13 = vld [vmem:[#allocation24 + $0x58] sm:$0xff]  ;;  %v4052_v57 = vld [vmem:[#allocation22 + $0xb0] sm:$0xff]  ;;  %v4055_v34 = vld [vmem:[#allocation22 + $0xc8] sm:$0xff] }
0x1e0d   :  { %v3884_v27 = vmax.f32 %v3881_v61, 0.0  ;;  %v4160_v61 = vld [vmem:[#allocation24 + $0x50] sm:$0xff] }
0x1e0f   :  { %v3887_v12 = vsel %vm3768_vm0, %v3884_v27, 0.0 }
0x1e10   :  { %3888 = vadd.xlane.f32.xlu0 %v3887_v12  ;;  %v4162_v12 = vld [vmem:[#allocation24 + $0x60] sm:$0xff] }
0x1e11   :  { %v6020_v14 = vpack.c.bf16 %v4163_v24, %v4162_v12  ;;  %v4056_v12 = vld [vmem:[#allocation22 + $0xd0] sm:$0xff]  ;;  %v4059_v24 = vld [vmem:[#allocation22 + $0xe8] sm:$0xff] }
0x1e9d   :  { %v3889_v15 = vpop.xlane.xlu0 %3888 }
0x1e9e   :  { %v3890_v36 = vmul.f32 0.03125, %v3889_v15 }
0x1ea0   :  { %v3891_v4 = vsub.f32 %v3884_v27, %v3890_v36  ;;  %v6017_v27 = vpack.c.bf16 %v4161_v13, %v4160_v61 }
0x1ea2   :  { %v3892_v50 = vmul.f32 %v7037_v23, %v3891_v4  ;;  %v4031_v4 = vld [vmem:[#allocation22 + $0x8] sm:$0xff] }
0x1ea4   :  { %v3893_v58 = vmul.f32 %v3892_v50, %v3892_v50 }
0x1ea6   :  { %v3894_v5 = vsel %vm3768_vm0, %v3893_v58, 0.0  ;;  %v4030_v58 = vld [vmem:[#allocation22] sm:$0xff] }
0x1ea7   :  { %3895 = vadd.xlane.f32.xlu1 %v3894_v5  ;;  %v5971_v30 = vpack.c.bf16 %v4032_v60, %v4030_v58  ;;  %v4461_v58 = vld [vmem:[%s7753_s14 + $0x2] ss:$0 sm:$0xff] }
0x1f34   :  { %v3896_v46 = vpop.xlane.xlu1 %3895 }
0x1f35   :  { %v3897_v11 = vmul.f32 0.03125, %v3896_v46 }
0x1f37   :  { %v3898_v40 = vadd.f32 1e-05, %v3897_v11 }
0x1f39   :  { %6271 = vrsqrt.f32 %v3898_v40 }
0x1f43   :  { %v6272_v9 = vpop.eup %6271 }
0x1f44   :  { %v3900_v39 = vmul.f32 %v6272_v9, %v3892_v50  ;;  %v4033_v50 = vld [vmem:[#allocation22 + $0x18] sm:$0xff] }
0x1f45   :  { %v5969_v5 = vpack.c.bf16 %v4033_v50, %v4031_v4  ;;  %v4460_v4 = vld [vmem:[%s7752_s26 + $0x2] ss:$0 sm:$0xff] }
0x1f46   :  { %v3905_v53 = vmul.f32 %v4457_v54, %v3900_v39 }
0x1f47   :  { %5970 = vmatprep.subr.bf16.mxu1 %v5969_v5 }
0x1f48   :  { %v3910_v45 = vadd.f32 %v4458_v63, %v3905_v53  ;;  %5972 = vmatpush1.bf16.msra.mxu1 %v5971_v30  ;;  %v5981_v63 = vpack.c.bf16 %v4045_v26, %v4043_v51  ;;  %v4042_v53 = vld [vmem:[#allocation22 + $0x60] sm:$0xff]  ;;  %v6026_v30 = vpack.c.bf16 %v4246_v29, %v4245_v21  ;;  %v4259_v51 = vld [vmem:[#allocation25 + $0x70] sm:$0xff]  ;;  %v4260_v26 = vld [vmem:[#allocation25 + $0x78] sm:$0xff] }
0x1f49   :  { %5974 = vmatprep.subr.bf16.mxu1 %v5973_v44  ;;  %v4247_v44 = vld [vmem:[#allocation25 + $0x10] sm:$0xff] }
0x1f4a   :  { %5398 = vmatmul.mubr.f32.vlgmr.msra.gmra.mrb[70].mxu0 %v3910_v45  ;;  %v6029_v42 = vpack.c.bf16 %v4248_v7, %v4247_v44 }
0x1f4b   :  { %6003 = vmatpush3.bf16.msra.mxu0 %v6002_v47  ;;  %5432 = vmatprep.mubr.msk.f32.mxu0 %vm6706_vm9, %v6704_v22  ;;  %v4044_v47 = vld [vmem:[#allocation22 + $0x70] sm:$0xff] }
0x1f4c   :  { %6004 = vmatprep.subr.bf16.mxu0 %v6705_v38  ;;  %5976 = vmatpush1.bf16.msra.mxu1 %v5975_v49  ;;  %v5983_v45 = vpack.c.bf16 %v4044_v47, %v4042_v53  ;;  %v4251_v49 = vld [vmem:[#allocation25 + $0x30] sm:$0xff]  ;;  %v4062_v53 = vld [vmem:[%s7754_s20] sm:$0x3] }
0x1f4d   :  { %v4067_v47 = vrot.slane %v4062_v53, %v7073_v33 }
0x1f4f   :  { %6006 = vmatpush3.bf16.msra.mxu0 %v6005_v10  ;;  %v4046_v10 = vld [vmem:[#allocation22 + $0x80] sm:$0xff] }
0x1f50   :  { %6007 = vmatprep.subr.bf16.mxu0 %v6705_v38 }
0x1f53   :  { %6009 = vmatpush3.bf16.msra.mxu0 %v6008_v2  ;;  %v4051_v2 = vld [vmem:[#allocation22 + $0xa8] sm:$0xff] }
0x1f54   :  { %6010 = vmatprep.subr.bf16.mxu0 %v6705_v38  ;;  %v5989_v6 = vpack.c.bf16 %v4053_v56, %v4051_v2  ;;  %v4462_v56 = vld [vmem:[%s6855_s8] ss:$0 sm:$0xff] }
0x1f57   :  { %6012 = vmatpush3.bf16.msra.mxu0 %v6011_v8  ;;  %v4050_v8 = vld [vmem:[#allocation22 + $0xa0] sm:$0xff] }
0x1f58   :  { %6013 = vmatprep.subr.bf16.mxu0 %v6705_v38  ;;  %v5991_v61 = vpack.c.bf16 %v4052_v57, %v4050_v8 }
0x1f5b   :  { %6015 = vmatpush3.bf16.msra.mxu0 %v6014_v0  ;;  %v4057_v0 = vld [vmem:[#allocation22 + $0xd8] sm:$0xff] }
0x1f5c   :  { %6016 = vmatprep.subr.bf16.mxu0 %v6705_v38  ;;  %v5993_v13 = vpack.c.bf16 %v4057_v0, %v4055_v34  ;;  %v4463_v34 = vld [vmem:[%s6865_s12] ss:$0 sm:$0xff] }
0x1f5f   :  { %6018 = vmatpush3.bf16.msra.mxu0 %v6017_v27  ;;  %v4054_v27 = vld [vmem:[#allocation22 + $0xc0] sm:$0xff] }
0x1f60   :  { %6019 = vmatprep.subr.bf16.mxu0 %v6705_v38  ;;  %v5995_v25 = vpack.c.bf16 %v4056_v12, %v4054_v27 }
0x1f63   :  { %6021 = vmatpush3.bf16.msra.mxu0 %v6020_v14  ;;  %v4061_v14 = vld [vmem:[#allocation22 + $0xf8] sm:$0xff] }
0x1f64   :  { %6022 = vmatprep.subr.bf16.mxu0 %v6705_v38  ;;  %v5997_v28 = vpack.c.bf16 %v4061_v14, %v4059_v24 }
0x1f67   :  { %6024 = vmatpush3.bf16.msra.mxu0 %v6023_v3  ;;  %v4058_v3 = vld [vmem:[#allocation22 + $0xe0] sm:$0xff] }
0x1f6a   :  { %5433 = vmatmul.mubr.f32.vlgmr.msra.gmra.mrb[72].mxu0 %v7643_v1  ;;  %v4039_v1 = vld [vmem:[#allocation22 + $0x48] sm:$0xff] }
0x1f6b   :  { %v5977_v31 = vpack.c.bf16 %v4041_v41, %v4039_v1  ;;  %v4249_v1 = vld [vmem:[#allocation25 + $0x20] sm:$0xff]  ;;  %v4250_v41 = vld [vmem:[#allocation25 + $0x28] sm:$0xff] }
0x1f6d   :  { %5978 = vmatprep.subr.bf16.mxu1 %v5977_v31 }
0x1f6e   :  { %5980 = vmatpush1.bf16.msra.mxu1 %v5979_v20  ;;  %v6038_v20 = vpack.c.bf16 %v4254_v55, %v4253_v37 }
0x1f6f   :  { %5982 = vmatprep.subr.bf16.mxu1 %v5981_v63  ;;  %v6047_v63 = vpack.c.bf16 %v4260_v26, %v4259_v51 }
0x1f72   :  { %5984 = vmatpush1.bf16.msra.mxu1 %v5983_v45 }
0x1f73   :  { %5986 = vmatprep.subr.bf16.mxu1 %v5985_v43 }
0x201d   :  { %v3999_v35 = vpop.f32.mrb[70].mxu0 }
0x201e   :  { %v4000_v52 = vadd.f32 %v4459_v17, %v3999_v35  ;;  %v5399_v62 = vpop.f32.mrb[71].mxu0  ;;  %v4060_v17 = vld [vmem:[#allocation22 + $0xf0] sm:$0xff] }
0x201f   :  { %v5999_v35 = vpack.c.bf16 %v4060_v17, %v4058_v3 }
0x2020   :  { %v4003_v15 = vmax.f32 %v4000_v52, 0.0 }
0x2022   :  { %v4006_v36 = vsel %vm3768_vm0, %v4003_v15, 0.0 }
0x2023   :  { %4007 = vadd.xlane.f32.xlu0 %v4006_v36 }
0x203d   :  { %v7688_v18 = vpop.f32.mrb[72].mxu0 }
0x203e   :  { %v5434_v16 = vpop.f32.mrb[73].mxu0  ;;  %v4240_v8 = vadd.f32 %v4462_v56, %v7688_v18 }
0x203f   :  { %v6032_v16 = vpack.c.bf16 %v4250_v41, %v4249_v1 }
0x20b0   :  { %v4008_v46 = vpop.xlane.xlu0 %4007 }
0x20b1   :  { %v4009_v11 = vmul.f32 0.03125, %v4008_v46  ;;  %v4255_v46 = vld [vmem:[#allocation25 + $0x50] sm:$0xff] }
0x20b3   :  { %v4010_v40 = vsub.f32 %v4003_v15, %v4009_v11  ;;  %v4256_v11 = vld [vmem:[#allocation25 + $0x58] sm:$0xff] }
0x20b5   :  { %v4011_v9 = vmul.f32 %v7037_v23, %v4010_v40  ;;  %v5987_v23 = vpack.c.bf16 %v4048_v19, %v4046_v10  ;;  %v6041_v40 = vpack.c.bf16 %v4256_v11, %v4255_v46 }
0x20b7   :  { %v4012_v54 = vmul.f32 %v4011_v9, %v4011_v9  ;;  %5988 = vmatpush1.bf16.msra.mxu1 %v5987_v23 }
0x20b8   :  { %5990 = vmatprep.subr.bf16.mxu1 %v5989_v6 }
0x20b9   :  { %v4013_v39 = vsel %vm3768_vm0, %v4012_v54, 0.0  ;;  %v4258_v54 = vld [vmem:[#allocation25 + $0x68] sm:$0xff] }
0x20ba   :  { %4014 = vadd.xlane.f32.xlu1 %v4013_v39 }
0x20bb   :  { %5992 = vmatpush1.bf16.msra.mxu1 %v5991_v61 }
0x20bc   :  { %5994 = vmatprep.subr.bf16.mxu1 %v5993_v13 }
0x20bf   :  { %5996 = vmatpush1.bf16.msra.mxu1 %v5995_v25 }
0x20c0   :  { %5998 = vmatprep.subr.bf16.mxu1 %v5997_v28 }
0x20c3   :  { %6000 = vmatpush1.bf16.msra.mxu1 %v5999_v35 }
0x20c4   :  { %6025 = vmatprep.subr.bf16.mxu1 %v6705_v38 }
0x2147   :  { %v4015_v52 = vpop.xlane.xlu1 %4014 }
0x2148   :  { %v4016_v62 = vmul.f32 0.03125, %v4015_v52 }
0x214a   :  { %v4017_v15 = vadd.f32 1e-05, %v4016_v62 }
0x214c   :  { %6273 = vrsqrt.f32 %v4017_v15 }
0x2156   :  { %v6274_v36 = vpop.eup %6273 }
0x2157   :  { %v4019_v50 = vmul.f32 %v6274_v36, %v4011_v9  ;;  %v4257_v9 = vld [vmem:[#allocation25 + $0x60] sm:$0xff] }
0x2158   :  { %v6044_v39 = vpack.c.bf16 %v4258_v54, %v4257_v9 }
0x2159   :  { %v4024_v5 = vmul.f32 %v4460_v4, %v4019_v50 }
0x215b   :  { %v4029_v60 = vadd.f32 %v4461_v58, %v4024_v5 }
0x215d   :  { %4139 = vmatmul.mubr.f32.vlgmr.msra.gmra.mrb[36].mxu1 %v4029_v60 }
0x215e   :  { %5467 = vmatprep.mubr.msk.f32.mxu1 %vm6706_vm9, %v6704_v22  ;;  %6027 = vmatpush3.bf16.msra.mxu1 %v6026_v30  ;;  %v4252_v22 = vld [vmem:[#allocation25 + $0x38] sm:$0xff] }
0x215f   :  { %6028 = vmatprep.subr.bf16.mxu1 %v6705_v38  ;;  %v6035_v31 = vpack.c.bf16 %v4252_v22, %v4251_v49 }
0x2162   :  { %6030 = vmatpush3.bf16.msra.mxu1 %v6029_v42 }
0x2163   :  { %6031 = vmatprep.subr.bf16.mxu1 %v6705_v38 }
0x2166   :  { %6033 = vmatpush3.bf16.msra.mxu1 %v6032_v16 }
0x2167   :  { %6034 = vmatprep.subr.bf16.mxu1 %v6705_v38 }
0x216a   :  { %6036 = vmatpush3.bf16.msra.mxu1 %v6035_v31 }
0x216b   :  { %6037 = vmatprep.subr.bf16.mxu1 %v6705_v38 }
0x216e   :  { %6039 = vmatpush3.bf16.msra.mxu1 %v6038_v20 }
0x216f   :  { %6040 = vmatprep.subr.bf16.mxu1 %v6705_v38 }
0x2172   :  { %6042 = vmatpush3.bf16.msra.mxu1 %v6041_v40 }
0x2173   :  { %6043 = vmatprep.subr.bf16.mxu1 %v6705_v38 }
0x2176   :  { %6045 = vmatpush3.bf16.msra.mxu1 %v6044_v39 }
0x2177   :  { %6046 = vmatprep.subr.bf16.mxu1 %v6705_v38  ;;  %v4071_v38 = vrot.slane %v4062_v53, %v7077_v48 }
0x217a   :  { %6048 = vmatpush3.bf16.msra.mxu1 %v6047_v63 }
0x2230   :  { %v4140_v45 = vpop.f32.mrb[36].mxu1 }
0x2231   :  { %v4141_v32 = vadd.f32 %v4140_v45, %v4067_v47  ;;  %v4142_v59 = vpop.f32.mrb[37].mxu1 }
0x2232   :  { %v4143_v23 = vadd.f32 %v4142_v59, %v4071_v38 }
0x2233   :  { %v4145_v10 = vsub.f32 0.0, %v4141_v32 }
0x2235   :  { %v4146_v43 = vmul.f32 1.442695, %v4145_v10 }
0x2237   :  { %6275 = vpow2.f32 %v4146_v43 }
0x2241   :  { %v6276_v19 = vpop.eup %6275 }
0x2242   :  { %v4148_v2 = vadd.f32 1.0, %v6276_v19 }
0x2244   :  { %6277 = vrcp.f32 %v4148_v2 }
0x224e   :  { %v6278_v6 = vpop.eup %6277 }
0x224f   :  { %v4243_v57 = vmul.f32 %v6278_v6, %v4143_v23 }
0x2251   :  { %v4244_v33 = vadd.f32 %v4243_v57, %v4240_v8 }
0x2253   :  { %5468 = vmatmul.mubr.f32.vlgmr.msra.gmra.mrb[38].mxu1 %v4244_v33 }
0x2326   :  { %v4334_v0 = vpop.f32.mrb[38].mxu1 }
0x2327   :  { %v4335_v61 = vadd.f32 %v4463_v34, %v4334_v0  ;;  %v5469_v13 = vpop.f32.mrb[39].mxu1 }
0x2329   :  { %4338 = vst [vmem:[%s6870_s24] sm:$0x3] %v4335_v61 }
0x232a   :  { %4343 = vsyncpa [#allocation3], 1 }
0x232b   :  { %4344 = vsyncpa [#allocation5], 1 }
0x232c   :  { %4345 = vsyncpa [#allocation8], 1 }
0x232d   :  { %4346 = vsyncpa [#allocation11], 1 }
0x232e   :  { %4347 = vsyncpa [#allocation14], 1 }
0x232f   :  { %4348 = vsyncpa [#allocation17], 1 }
0x2330   :  { %4349 = vsyncpa [#allocation20], 1 }
0x2331   :  { %4350 = vsyncpa [#allocation23], 1 }
0x2332   :  { %4351 = vsyncpa [#allocation26], 1 }

</bundles_post_ra>
